<compile_context>
chip_gen: v7x
topology: tpu7x:2x2x1
jax: 0.10.0
libtpu: 0.0.40
codegen_flags: <defaults>
</compile_context>

<pallas_src>
import functools

import jax
import jax.numpy as jnp
from jax.experimental import pallas as pl
from jax.experimental.pallas import tpu as pltpu


def _fused_kernel(x_col_ref, w1_ref, b1_ref, w2_ref, b2_ref, w3_ref, b3_ref,
                  w4_ref, b4_ref, hw1_hbm_ref, hb1_ref, w2bd_ref, hb2_ref,
                  o_ref,
                  y1_ref, y2_ref, p1_ref, y3_ref, y4_ref, hw1_vmem_ref,
                  hw1_sem,
                  *, batch, seq_len):
    """Entire NeuralInterface_CST forward on VMEM-resident data (one call)."""
    # Kick off the big head-weight fetch immediately so it overlaps the whole
    # conv stack instead of sitting serially in front of the kernel.
    hw1_copy = pltpu.make_async_copy(hw1_hbm_ref, hw1_vmem_ref, hw1_sem)
    hw1_copy.start()

    L = seq_len
    rows1 = batch * L - 2            # conv1 output rows (block stride L per batch)
    rows2 = rows1 - 2                # conv2 output rows
    half1 = rows2 // 2               # rows after pool1 (block stride L//2)
    rows3 = half1 - 2                # conv3 output rows
    rows4 = rows3 - 2                # conv4 output rows
    l_final = (L // 2 - 6) // 2      # positions after pool2

    n1 = w1_ref.shape[-1]
    n2 = w2_ref.shape[-1]
    n3 = w3_ref.shape[-1]
    hn = hb1_ref.shape[-1]           # H * numNodes[4]

    def conv_relu_3tap(src_ref, rows_in, c_in, w_ref_, b_ref_):
        # Valid Conv1d(kernel_size=3) as three K=c_in MXU matmuls accumulated
        # in f32 (no 3*c_in lane concat -> far lower vreg pressure).
        n = rows_in - 2
        acc = jnp.dot(src_ref[0:n, 0:c_in], w_ref_[0:c_in, :],
                      preferred_element_type=jnp.float32)
        for k in (1, 2):
            acc = acc + jnp.dot(src_ref[k:k + n, 0:c_in],
                                w_ref_[k * c_in:(k + 1) * c_in, :],
                                preferred_element_type=jnp.float32)
        return jnp.maximum(acc + b_ref_[...], 0.0)

    # ---- cnnBlock1: conv1+ReLU, conv2+ReLU, MaxPool1d(2,2), Dropout(=id) ----
    # conv1: input already im2col'd host-side -> a single MXU matmul.
    y1_ref[...] = jnp.maximum(
        jnp.dot(x_col_ref[...], w1_ref[...],
                preferred_element_type=jnp.float32) + b1_ref[...], 0.0)
    y2_ref[0:rows2, :] = conv_relu_3tap(y1_ref, rows1, n1, w2_ref, b2_ref)

    # pool1: vectorized pair-max via two sublane-strided reads.  Valid because
    # L is even, so every batch segment starts at an even global row (garbage
    # halo rows at batch boundaries are never read by valid positions).
    p1_ref[...] = jnp.maximum(y2_ref[pl.ds(0, half1, stride=2), :],
                              y2_ref[pl.ds(1, half1, stride=2), :])

    # ---- cnnBlock2: conv3+ReLU, conv4+ReLU, MaxPool1d(2,2), Dropout(=id) ----
    y3_ref[...] = conv_relu_3tap(p1_ref, half1, n2, w3_ref, b3_ref)
    y4_ref[0:rows4, :] = conv_relu_3tap(y3_ref, rows3, n3, w4_ref, b4_ref)

    # ---- heads, first layer fused with pool2 + flatten ----------------------
    # hid[b] = sum_l max(y4[b*L/2 + 2l], y4[b*L/2 + 2l + 1]) @ hw1[l]
    # hw1 is laid out host-side as (l_final, c4, H*N), folding the PyTorch
    # flatten order (c*l_final + l); no per-(b,l) loop, no lane-sparse stores.
    hw1_copy.wait()
    stride_b = L // 2                        # conv4 row-block stride per batch
    hid = jnp.zeros((batch, hn), jnp.float32)
    for l in range(l_final):
        even = y4_ref[pl.ds(2 * l, batch, stride=stride_b), :]
        odd = y4_ref[pl.ds(2 * l + 1, batch, stride=stride_b), :]
        p2_l = jnp.maximum(even, odd).astype(hw1_vmem_ref.dtype)   # (B, c4)
        hid = hid + jnp.dot(p2_l, hw1_vmem_ref[l],
                            preferred_element_type=jnp.float32)
    hid = jnp.maximum(hid + hb1_ref[...], 0.0)                     # (B, H*N)

    # ---- heads, second layer: one block-diagonal matmul + exact sigmoid ----
    z = jnp.dot(hid, w2bd_ref[...],
                preferred_element_type=jnp.float32) + hb2_ref[...]  # (B, H)
    o_ref[...] = 1.0 / (1.0 + jnp.exp(-z))


def neural_interface_cst_forward(x_ncw, params):
    """x_ncw: (B, C_in, L) exactly like the PyTorch module.  -> (B, numOutput)."""
    B, c_in, L = x_ncw.shape
    assert L % 4 == 0 and L >= 16, "sequence length must be a multiple of 4, >= 16"

    n1 = params["w1"].shape[-1]
    n2 = params["w2"].shape[-1]
    n3 = params["w3"].shape[-1]
    c4 = params["w4"].shape[-1]
    num_heads = params["hb2"].shape[-1]
    l_final = (L // 2 - 6) // 2
    assert params["hw1"].shape == (l_final, c4, params["hb1"].shape[-1])

    rows1 = B * L - 2
    rows2 = rows1 - 2
    half1 = rows2 // 2
    rows3 = half1 - 2
    rows4 = rows3 - 2

    # Tiny boundary-layout glue (~1 KB, fused by XLA): NCW -> (b*L + t, c) rows,
    # then conv1 im2col so conv1 is a single in-kernel MXU matmul.
    x2d = jnp.transpose(x_ncw, (0, 2, 1)).reshape(B * L, c_in)
    x_col = jnp.concatenate([x2d[k:k + rows1] for k in range(3)], axis=-1)

    # TODO(synk): on v7x, split the batch over a ("parallel",) grid axis to use
    # both TensorCores; kept grid-free here since at this size the kernel is
    # DMA/latency-bound and weights dominate the bytes.
    kernel = functools.partial(_fused_kernel, batch=B, seq_len=L)
    vmem = pl.BlockSpec(memory_space=pltpu.MemorySpace.VMEM)
    hbm = pl.BlockSpec(memory_space=pl.ANY)   # hw1 stays in HBM; DMA'd manually
    return pl.pallas_call(
        kernel,
        out_shape=jax.ShapeDtypeStruct((B, num_heads), jnp.float32),
        in_specs=[vmem] * 9 + [hbm] + [vmem] * 3,
        out_specs=vmem,
        scratch_shapes=[
            pltpu.VMEM((rows1, n1), jnp.float32),              # conv1 out
            pltpu.VMEM((rows2 + 2, n2), jnp.float32),          # conv2 out (+pad)
            pltpu.VMEM((half1, n2), jnp.float32),              # pool1 out
            pltpu.VMEM((rows3, n3), jnp.float32),              # conv3 out
            pltpu.VMEM((rows4 + L // 2, c4), jnp.float32),     # conv4 out (+pad)
            pltpu.VMEM(params["hw1"].shape, params["hw1"].dtype),  # head W1 (bf16)
            pltpu.SemaphoreType.DMA(()),                       # hw1 copy sem
        ],
        compiler_params=pltpu.CompilerParams(vmem_limit_bytes=32 * 1024 * 1024),
    )(x_col, params["w1"], params["b1"], params["w2"], params["b2"],
      params["w3"], params["b3"], params["w4"], params["b4"],
      params["hw1"], params["hb1"], params["w2bd"], params["hb2"])


# --------------------------- parameter preparation ---------------------------
def convert_conv_weight(w_torch):
    """PyTorch Conv1d weight (C_out, C_in, K) -> (K*C_in, C_out), row = k*C_in + c."""
    c_out, c_in, k = w_torch.shape
    return jnp.transpose(w_torch, (2, 1, 0)).reshape(k * c_in, c_out)


def convert_head_weights(hw1_t, hb1_t, hw2_t, hb2_t, c_ch, l_pos):
    """Fold the PyTorch flatten order (c*l_final + l) and the head concat into
    kernel-friendly matrices: hw1 -> (l_final, c4, H*N) bf16 for the per-pool2-
    position accumulation; the 4 second-layer Linears -> one block-diagonal
    (H*N, H) f32 matrix."""
    H, N, F = hw1_t.shape
    assert F == c_ch * l_pos
    w = jnp.transpose(hw1_t, (2, 0, 1)).reshape(c_ch, l_pos, H * N)  # [c, l, h*N+n]
    hw1_lcn = jnp.transpose(w, (1, 0, 2))                            # (l, c, h*N+n)
    hb1_cat = hb1_t.reshape(1, H * N)
    w2 = hw2_t.reshape(H, N)
    w2bd = (w2[:, :, None] * jnp.eye(H, dtype=w2.dtype)[:, None, :]).reshape(H * N, H)
    hb2_row = hb2_t.reshape(1, H)
    # bf16 halves the dominant weight DMA; in-kernel accumulation stays f32.
    return hw1_lcn.astype(jnp.bfloat16), hb1_cat, w2bd, hb2_row


if __name__ == "__main__":
    key = jax.random.PRNGKey(0)
    B, C_IN, L = 2, 4, 32
    numNodes = [128, 128, 128, 64, 256]
    numOutput = 4
    keys = jax.random.split(key, 16)

    def rnd(k, shape, scale=0.05):
        return jax.random.normal(k, shape, dtype=jnp.float32) * scale

    # Deterministic synthetic parameters in native PyTorch layouts.
    cw1 = rnd(keys[0], (numNodes[0], C_IN, 3));        cb1 = rnd(keys[1], (numNodes[0],))
    cw2 = rnd(keys[2], (numNodes[1], numNodes[0], 3)); cb2 = rnd(keys[3], (numNodes[1],))
    cw3 = rnd(keys[4], (numNodes[2], numNodes[1], 3)); cb3 = rnd(keys[5], (numNodes[2],))
    cw4 = rnd(keys[6], (numNodes[3], numNodes[2], 3)); cb4 = rnd(keys[7], (numNodes[3],))

    # Valid-conv / pool lengths: 32 -> 30 -> 28 -> 14 -> 12 -> 10 -> 5.
    l_final = (L // 2 - 6) // 2
    F = numNodes[3] * l_final                          # LazyLinear in-features (=320)

    hw1_t = rnd(keys[8], (numOutput, numNodes[4], F))  # per-head Linear(F, 256).weight
    hb1_t = rnd(keys[9], (numOutput, numNodes[4]))
    hw2_t = rnd(keys[10], (numOutput, 1, numNodes[4])) # per-head Linear(256, 1).weight
    hb2_t = rnd(keys[11], (numOutput,))

    hw1_lcn, hb1_cat, w2bd, hb2_row = convert_head_weights(
        hw1_t, hb1_t, hw2_t, hb2_t, c_ch=numNodes[3], l_pos=l_final)

    params = dict(
        w1=convert_conv_weight(cw1), b1=cb1[None, :],
        w2=convert_conv_weight(cw2), b2=cb2[None, :],
        w3=convert_conv_weight(cw3), b3=cb3[None, :],
        w4=convert_conv_weight(cw4), b4=cb4[None, :],
        hw1=hw1_lcn, hb1=hb1_cat, w2bd=w2bd, hb2=hb2_row,
    )

    x = jax.random.normal(keys[12], (B, C_IN, L), dtype=jnp.float32)  # NCW input
    fwd = jax.jit(neural_interface_cst_forward)
    out = jax.block_until_ready(fwd(x, params))
    assert out.shape == (B, numOutput), out.shape
    assert bool(jnp.all(jnp.isfinite(out)))

    # Pure-JAX reference (eval-mode dropout = identity) for a numerics sanity check.
    def reference(x_ncw):
        def conv1d_relu(y, w, b):
            y = jax.lax.conv_general_dilated(
                y, w, window_strides=(1,), padding="VALID",
                dimension_numbers=("NCW", "OIW", "NCW"))
            return jax.nn.relu(y + b[None, :, None])

        def maxpool2(y):
            Bb, C, Ly = y.shape
            return jnp.max(y[:, :, :(Ly // 2) * 2].reshape(Bb, C, Ly // 2, 2), -1)

        y = conv1d_relu(x_ncw, cw1, cb1)
        y = conv1d_relu(y, cw2, cb2)
        y = maxpool2(y)
        y = conv1d_relu(y, cw3, cb3)
        y = conv1d_relu(y, cw4, cb4)
        y = maxpool2(y)
        flat = y.reshape(y.shape[0], -1)          # torch flatten order: c*l_final + l
        outs = []
        for h in range(numOutput):
            hid = jax.nn.relu(flat @ hw1_t[h].T + hb1_t[h])
            z = hid @ hw2_t[h].T + hb2_t[h]
            outs.append(jax.nn.sigmoid(z))
        return jnp.concatenate(outs, axis=1)

    ref = reference(x)
    err = float(jnp.max(jnp.abs(out - ref)))
    assert err < 2e-2, f"max abs error vs reference: {err}"
    print("KERNEL_OK")
</pallas_src>

<mosaic_0001>
module attributes {stable_mosaic.version = 11 : i64} {
  func.func @_fused_kernel(%arg0: memref<62x12xf32, #tpu.memory_space<vmem>>, %arg1: memref<12x128xf32, #tpu.memory_space<vmem>>, %arg2: memref<1x128xf32, #tpu.memory_space<vmem>>, %arg3: memref<384x128xf32, #tpu.memory_space<vmem>>, %arg4: memref<1x128xf32, #tpu.memory_space<vmem>>, %arg5: memref<384x128xf32, #tpu.memory_space<vmem>>, %arg6: memref<1x128xf32, #tpu.memory_space<vmem>>, %arg7: memref<384x64xf32, #tpu.memory_space<vmem>>, %arg8: memref<1x64xf32, #tpu.memory_space<vmem>>, %arg9: memref<5x64x1024xbf16, #tpu.memory_space<any>>, %arg10: memref<1x1024xf32, #tpu.memory_space<vmem>>, %arg11: memref<1024x4xf32, #tpu.memory_space<vmem>>, %arg12: memref<1x4xf32, #tpu.memory_space<vmem>>, %arg13: memref<2x4xf32, #tpu.memory_space<vmem>>, %arg14: memref<62x128xf32, #tpu.memory_space<vmem>>, %arg15: memref<62x128xf32, #tpu.memory_space<vmem>>, %arg16: memref<30x128xf32, #tpu.memory_space<vmem>>, %arg17: memref<28x128xf32, #tpu.memory_space<vmem>>, %arg18: memref<42x64xf32, #tpu.memory_space<vmem>>, %arg19: memref<5x64x1024xbf16, #tpu.memory_space<vmem>>, %arg20: memref<!tpu.dma_semaphore, #tpu.memory_space<semaphore_mem>>) attributes {dimension_semantics = [], scalar_prefetch = 0 : i64, scratch_operands = 7 : i64, tpu.core_type = #tpu.core_type<tc>} {
    tpu.enqueue_dma source(%arg9 : memref<5x64x1024xbf16, #tpu.memory_space<any>>) target(%arg19 : memref<5x64x1024xbf16, #tpu.memory_space<vmem>>) target_semaphore(%arg20 : memref<!tpu.dma_semaphore, #tpu.memory_space<semaphore_mem>>)
    %c0 = arith.constant 0 : index
    %c0_0 = arith.constant 0 : index
    %0 = vector.load %arg0[%c0, %c0_0] : memref<62x12xf32, #tpu.memory_space<vmem>>, vector<62x12xf32>
    %c0_1 = arith.constant 0 : index
    %c0_2 = arith.constant 0 : index
    %1 = vector.load %arg1[%c0_1, %c0_2] : memref<12x128xf32, #tpu.memory_space<vmem>>, vector<12x128xf32>
    %cst = arith.constant dense<0.000000e+00> : vector<62x128xf32>
    %2 = tpu.matmul %0, %1, %cst {dimension_numbers = #tpu.dot_dimension_numbers<[1], [0], [0], [1], [0, 0, 1, 1], [], []>} : vector<62x12xf32>, vector<12x128xf32>, vector<62x128xf32> -> vector<62x128xf32>
    %c0_3 = arith.constant 0 : index
    %c0_4 = arith.constant 0 : index
    %3 = vector.load %arg2[%c0_3, %c0_4] : memref<1x128xf32, #tpu.memory_space<vmem>>, vector<1x128xf32>
    %4 = vector.broadcast %3 : vector<1x128xf32> to vector<62x128xf32>
    %5 = arith.addf %2, %4 : vector<62x128xf32>
    %cst_5 = arith.constant 0.000000e+00 : f32
    %6 = vector.broadcast %cst_5 : f32 to vector<62x128xf32>
    %7 = arith.maximumf %5, %6 : vector<62x128xf32>
    %c0_6 = arith.constant 0 : index
    %c0_7 = arith.constant 0 : index
    %8 = vector.load %arg14[%c0_6, %c0_7] : memref<62x128xf32, #tpu.memory_space<vmem>>, vector<62x128xf32>
    tpu.vector_store %arg14[%c0_6, %c0_7], %7 {strides = array<i32>} : memref<62x128xf32, #tpu.memory_space<vmem>>, vector<62x128xf32>,
    %c0_8 = arith.constant 0 : index
    %c0_9 = arith.constant 0 : index
    %9 = vector.load %arg14[%c0_8, %c0_9] : memref<62x128xf32, #tpu.memory_space<vmem>>, vector<60x128xf32>
    %c0_10 = arith.constant 0 : index
    %c0_11 = arith.constant 0 : index
    %10 = vector.load %arg3[%c0_10, %c0_11] : memref<384x128xf32, #tpu.memory_space<vmem>>, vector<128x128xf32>
    %cst_12 = arith.constant dense<0.000000e+00> : vector<60x128xf32>
    %11 = tpu.matmul %9, %10, %cst_12 {dimension_numbers = #tpu.dot_dimension_numbers<[1], [0], [0], [1], [0, 0, 1, 1], [], []>} : vector<60x128xf32>, vector<128x128xf32>, vector<60x128xf32> -> vector<60x128xf32>
    %c1 = arith.constant 1 : index
    %c0_13 = arith.constant 0 : index
    %12 = vector.load %arg14[%c1, %c0_13] : memref<62x128xf32, #tpu.memory_space<vmem>>, vector<60x128xf32>
    %c128 = arith.constant 128 : index
    %c0_14 = arith.constant 0 : index
    %13 = vector.load %arg3[%c128, %c0_14] : memref<384x128xf32, #tpu.memory_space<vmem>>, vector<128x128xf32>
    %cst_15 = arith.constant dense<0.000000e+00> : vector<60x128xf32>
    %14 = tpu.matmul %12, %13, %cst_15 {dimension_numbers = #tpu.dot_dimension_numbers<[1], [0], [0], [1], [0, 0, 1, 1], [], []>} : vector<60x128xf32>, vector<128x128xf32>, vector<60x128xf32> -> vector<60x128xf32>
    %15 = arith.addf %11, %14 : vector<60x128xf32>
    %c2 = arith.constant 2 : index
    %c0_16 = arith.constant 0 : index
    %16 = vector.load %arg14[%c2, %c0_16] : memref<62x128xf32, #tpu.memory_space<vmem>>, vector<60x128xf32>
    %c256 = arith.constant 256 : index
    %c0_17 = arith.constant 0 : index
    %17 = vector.load %arg3[%c256, %c0_17] : memref<384x128xf32, #tpu.memory_space<vmem>>, vector<128x128xf32>
    %cst_18 = arith.constant dense<0.000000e+00> : vector<60x128xf32>
    %18 = tpu.matmul %16, %17, %cst_18 {dimension_numbers = #tpu.dot_dimension_numbers<[1], [0], [0], [1], [0, 0, 1, 1], [], []>} : vector<60x128xf32>, vector<128x128xf32>, vector<60x128xf32> -> vector<60x128xf32>
    %19 = arith.addf %15, %18 : vector<60x128xf32>
    %c0_19 = arith.constant 0 : index
    %c0_20 = arith.constant 0 : index
    %20 = vector.load %arg4[%c0_19, %c0_20] : memref<1x128xf32, #tpu.memory_space<vmem>>, vector<1x128xf32>
    %21 = vector.broadcast %20 : vector<1x128xf32> to vector<60x128xf32>
    %22 = arith.addf %19, %21 : vector<60x128xf32>
    %cst_21 = arith.constant 0.000000e+00 : f32
    %23 = vector.broadcast %cst_21 : f32 to vector<60x128xf32>
    %24 = arith.maximumf %22, %23 : vector<60x128xf32>
    %c0_22 = arith.constant 0 : index
    %c0_23 = arith.constant 0 : index
    %25 = vector.load %arg15[%c0_22, %c0_23] : memref<62x128xf32, #tpu.memory_space<vmem>>, vector<60x128xf32>
    tpu.vector_store %arg15[%c0_22, %c0_23], %24 {strides = array<i32>} : memref<62x128xf32, #tpu.memory_space<vmem>>, vector<60x128xf32>,
    %c0_24 = arith.constant 0 : index
    %c0_25 = arith.constant 0 : index
    %26 = tpu.strided_load %arg15[%c0_24, %c0_25] {strides = array<i32: 2, 1>} : memref<62x128xf32, #tpu.memory_space<vmem>>, vector<30x128xf32>
    %c1_26 = arith.constant 1 : index
    %c0_27 = arith.constant 0 : index
    %27 = tpu.strided_load %arg15[%c1_26, %c0_27] {strides = array<i32: 2, 1>} : memref<62x128xf32, #tpu.memory_space<vmem>>, vector<30x128xf32>
    %28 = arith.maximumf %26, %27 : vector<30x128xf32>
    %c0_28 = arith.constant 0 : index
    %c0_29 = arith.constant 0 : index
    %29 = vector.load %arg16[%c0_28, %c0_29] : memref<30x128xf32, #tpu.memory_space<vmem>>, vector<30x128xf32>
    tpu.vector_store %arg16[%c0_28, %c0_29], %28 {strides = array<i32>} : memref<30x128xf32, #tpu.memory_space<vmem>>, vector<30x128xf32>,
    %c0_30 = arith.constant 0 : index
    %c0_31 = arith.constant 0 : index
    %30 = vector.load %arg16[%c0_30, %c0_31] : memref<30x128xf32, #tpu.memory_space<vmem>>, vector<28x128xf32>
    %c0_32 = arith.constant 0 : index
    %c0_33 = arith.constant 0 : index
    %31 = vector.load %arg5[%c0_32, %c0_33] : memref<384x128xf32, #tpu.memory_space<vmem>>, vector<128x128xf32>
    %cst_34 = arith.constant dense<0.000000e+00> : vector<28x128xf32>
    %32 = tpu.matmul %30, %31, %cst_34 {dimension_numbers = #tpu.dot_dimension_numbers<[1], [0], [0], [1], [0, 0, 1, 1], [], []>} : vector<28x128xf32>, vector<128x128xf32>, vector<28x128xf32> -> vector<28x128xf32>
    %c1_35 = arith.constant 1 : index
    %c0_36 = arith.constant 0 : index
    %33 = vector.load %arg16[%c1_35, %c0_36] : memref<30x128xf32, #tpu.memory_space<vmem>>, vector<28x128xf32>
    %c128_37 = arith.constant 128 : index
    %c0_38 = arith.constant 0 : index
    %34 = vector.load %arg5[%c128_37, %c0_38] : memref<384x128xf32, #tpu.memory_space<vmem>>, vector<128x128xf32>
    %cst_39 = arith.constant dense<0.000000e+00> : vector<28x128xf32>
    %35 = tpu.matmul %33, %34, %cst_39 {dimension_numbers = #tpu.dot_dimension_numbers<[1], [0], [0], [1], [0, 0, 1, 1], [], []>} : vector<28x128xf32>, vector<128x128xf32>, vector<28x128xf32> -> vector<28x128xf32>
    %36 = arith.addf %32, %35 : vector<28x128xf32>
    %c2_40 = arith.constant 2 : index
    %c0_41 = arith.constant 0 : index
    %37 = vector.load %arg16[%c2_40, %c0_41] : memref<30x128xf32, #tpu.memory_space<vmem>>, vector<28x128xf32>
    %c256_42 = arith.constant 256 : index
    %c0_43 = arith.constant 0 : index
    %38 = vector.load %arg5[%c256_42, %c0_43] : memref<384x128xf32, #tpu.memory_space<vmem>>, vector<128x128xf32>
    %cst_44 = arith.constant dense<0.000000e+00> : vector<28x128xf32>
    %39 = tpu.matmul %37, %38, %cst_44 {dimension_numbers = #tpu.dot_dimension_numbers<[1], [0], [0], [1], [0, 0, 1, 1], [], []>} : vector<28x128xf32>, vector<128x128xf32>, vector<28x128xf32> -> vector<28x128xf32>
    %40 = arith.addf %36, %39 : vector<28x128xf32>
    %c0_45 = arith.constant 0 : index
    %c0_46 = arith.constant 0 : index
    %41 = vector.load %arg6[%c0_45, %c0_46] : memref<1x128xf32, #tpu.memory_space<vmem>>, vector<1x128xf32>
    %42 = vector.broadcast %41 : vector<1x128xf32> to vector<28x128xf32>
    %43 = arith.addf %40, %42 : vector<28x128xf32>
    %cst_47 = arith.constant 0.000000e+00 : f32
    %44 = vector.broadcast %cst_47 : f32 to vector<28x128xf32>
    %45 = arith.maximumf %43, %44 : vector<28x128xf32>
    %c0_48 = arith.constant 0 : index
    %c0_49 = arith.constant 0 : index
    %46 = vector.load %arg17[%c0_48, %c0_49] : memref<28x128xf32, #tpu.memory_space<vmem>>, vector<28x128xf32>
    tpu.vector_store %arg17[%c0_48, %c0_49], %45 {strides = array<i32>} : memref<28x128xf32, #tpu.memory_space<vmem>>, vector<28x128xf32>,
    %c0_50 = arith.constant 0 : index
    %c0_51 = arith.constant 0 : index
    %47 = vector.load %arg17[%c0_50, %c0_51] : memref<28x128xf32, #tpu.memory_space<vmem>>, vector<26x128xf32>
    %c0_52 = arith.constant 0 : index
    %c0_53 = arith.constant 0 : index
    %48 = vector.load %arg7[%c0_52, %c0_53] : memref<384x64xf32, #tpu.memory_space<vmem>>, vector<128x64xf32>
    %cst_54 = arith.constant dense<0.000000e+00> : vector<26x64xf32>
    %49 = tpu.matmul %47, %48, %cst_54 {dimension_numbers = #tpu.dot_dimension_numbers<[1], [0], [0], [1], [0, 0, 1, 1], [], []>} : vector<26x128xf32>, vector<128x64xf32>, vector<26x64xf32> -> vector<26x64xf32>
    %c1_55 = arith.constant 1 : index
    %c0_56 = arith.constant 0 : index
    %50 = vector.load %arg17[%c1_55, %c0_56] : memref<28x128xf32, #tpu.memory_space<vmem>>, vector<26x128xf32>
    %c128_57 = arith.constant 128 : index
    %c0_58 = arith.constant 0 : index
    %51 = vector.load %arg7[%c128_57, %c0_58] : memref<384x64xf32, #tpu.memory_space<vmem>>, vector<128x64xf32>
    %cst_59 = arith.constant dense<0.000000e+00> : vector<26x64xf32>
    %52 = tpu.matmul %50, %51, %cst_59 {dimension_numbers = #tpu.dot_dimension_numbers<[1], [0], [0], [1], [0, 0, 1, 1], [], []>} : vector<26x128xf32>, vector<128x64xf32>, vector<26x64xf32> -> vector<26x64xf32>
    %53 = arith.addf %49, %52 : vector<26x64xf32>
    %c2_60 = arith.constant 2 : index
    %c0_61 = arith.constant 0 : index
    %54 = vector.load %arg17[%c2_60, %c0_61] : memref<28x128xf32, #tpu.memory_space<vmem>>, vector<26x128xf32>
    %c256_62 = arith.constant 256 : index
    %c0_63 = arith.constant 0 : index
    %55 = vector.load %arg7[%c256_62, %c0_63] : memref<384x64xf32, #tpu.memory_space<vmem>>, vector<128x64xf32>
    %cst_64 = arith.constant dense<0.000000e+00> : vector<26x64xf32>
    %56 = tpu.matmul %54, %55, %cst_64 {dimension_numbers = #tpu.dot_dimension_numbers<[1], [0], [0], [1], [0, 0, 1, 1], [], []>} : vector<26x128xf32>, vector<128x64xf32>, vector<26x64xf32> -> vector<26x64xf32>
    %57 = arith.addf %53, %56 : vector<26x64xf32>
    %c0_65 = arith.constant 0 : index
    %c0_66 = arith.constant 0 : index
    %58 = vector.load %arg8[%c0_65, %c0_66] : memref<1x64xf32, #tpu.memory_space<vmem>>, vector<1x64xf32>
    %59 = vector.broadcast %58 : vector<1x64xf32> to vector<26x64xf32>
    %60 = arith.addf %57, %59 : vector<26x64xf32>
    %cst_67 = arith.constant 0.000000e+00 : f32
    %61 = vector.broadcast %cst_67 : f32 to vector<26x64xf32>
    %62 = arith.maximumf %60, %61 : vector<26x64xf32>
    %c0_68 = arith.constant 0 : index
    %c0_69 = arith.constant 0 : index
    %63 = vector.load %arg18[%c0_68, %c0_69] : memref<42x64xf32, #tpu.memory_space<vmem>>, vector<26x64xf32>
    tpu.vector_store %arg18[%c0_68, %c0_69], %62 {strides = array<i32>} : memref<42x64xf32, #tpu.memory_space<vmem>>, vector<26x64xf32>,
    tpu.wait_dma2 semaphore(%arg20 : memref<!tpu.dma_semaphore, #tpu.memory_space<semaphore_mem>>) src(%arg9 : memref<5x64x1024xbf16, #tpu.memory_space<any>>) dst(%arg19 : memref<5x64x1024xbf16, #tpu.memory_space<vmem>>)
    %cst_70 = arith.constant 0.000000e+00 : f32
    %64 = vector.broadcast %cst_70 : f32 to vector<2x1024xf32>
    %c0_71 = arith.constant 0 : index
    %c0_72 = arith.constant 0 : index
    %65 = tpu.strided_load %arg18[%c0_71, %c0_72] {strides = array<i32: 16, 1>} : memref<42x64xf32, #tpu.memory_space<vmem>>, vector<2x64xf32>
    %c1_73 = arith.constant 1 : index
    %c0_74 = arith.constant 0 : index
    %66 = tpu.strided_load %arg18[%c1_73, %c0_74] {strides = array<i32: 16, 1>} : memref<42x64xf32, #tpu.memory_space<vmem>>, vector<2x64xf32>
    %67 = arith.maximumf %65, %66 : vector<2x64xf32>
    %68 = arith.truncf %67 : vector<2x64xf32> to vector<2x64xbf16>
    %c0_75 = arith.constant 0 : index
    %c0_76 = arith.constant 0 : index
    %c0_77 = arith.constant 0 : index
    %69 = vector.load %arg19[%c0_75, %c0_76, %c0_77] : memref<5x64x1024xbf16, #tpu.memory_space<vmem>>, vector<1x64x1024xbf16>
    %70 = vector.shape_cast %69 : vector<1x64x1024xbf16> to vector<64x1024xbf16>
    %cst_78 = arith.constant dense<0.000000e+00> : vector<2x1024xf32>
    %71 = tpu.matmul %68, %70, %cst_78 {dimension_numbers = #tpu.dot_dimension_numbers<[1], [0], [0], [1], [0, 0, 1, 1], [], []>} : vector<2x64xbf16>, vector<64x1024xbf16>, vector<2x1024xf32> -> vector<2x1024xf32>
    %72 = arith.addf %64, %71 : vector<2x1024xf32>
    %c2_79 = arith.constant 2 : index
    %c0_80 = arith.constant 0 : index
    %73 = tpu.strided_load %arg18[%c2_79, %c0_80] {strides = array<i32: 16, 1>} : memref<42x64xf32, #tpu.memory_space<vmem>>, vector<2x64xf32>
    %c3 = arith.constant 3 : index
    %c0_81 = arith.constant 0 : index
    %74 = tpu.strided_load %arg18[%c3, %c0_81] {strides = array<i32: 16, 1>} : memref<42x64xf32, #tpu.memory_space<vmem>>, vector<2x64xf32>
    %75 = arith.maximumf %73, %74 : vector<2x64xf32>
    %76 = arith.truncf %75 : vector<2x64xf32> to vector<2x64xbf16>
    %c1_82 = arith.constant 1 : index
    %c0_83 = arith.constant 0 : index
    %c0_84 = arith.constant 0 : index
    %77 = vector.load %arg19[%c1_82, %c0_83, %c0_84] : memref<5x64x1024xbf16, #tpu.memory_space<vmem>>, vector<1x64x1024xbf16>
    %78 = vector.shape_cast %77 : vector<1x64x1024xbf16> to vector<64x1024xbf16>
    %cst_85 = arith.constant dense<0.000000e+00> : vector<2x1024xf32>
    %79 = tpu.matmul %76, %78, %cst_85 {dimension_numbers = #tpu.dot_dimension_numbers<[1], [0], [0], [1], [0, 0, 1, 1], [], []>} : vector<2x64xbf16>, vector<64x1024xbf16>, vector<2x1024xf32> -> vector<2x1024xf32>
    %80 = arith.addf %72, %79 : vector<2x1024xf32>
    %c4 = arith.constant 4 : index
    %c0_86 = arith.constant 0 : index
    %81 = tpu.strided_load %arg18[%c4, %c0_86] {strides = array<i32: 16, 1>} : memref<42x64xf32, #tpu.memory_space<vmem>>, vector<2x64xf32>
    %c5 = arith.constant 5 : index
    %c0_87 = arith.constant 0 : index
    %82 = tpu.strided_load %arg18[%c5, %c0_87] {strides = array<i32: 16, 1>} : memref<42x64xf32, #tpu.memory_space<vmem>>, vector<2x64xf32>
    %83 = arith.maximumf %81, %82 : vector<2x64xf32>
    %84 = arith.truncf %83 : vector<2x64xf32> to vector<2x64xbf16>
    %c2_88 = arith.constant 2 : index
    %c0_89 = arith.constant 0 : index
    %c0_90 = arith.constant 0 : index
    %85 = vector.load %arg19[%c2_88, %c0_89, %c0_90] : memref<5x64x1024xbf16, #tpu.memory_space<vmem>>, vector<1x64x1024xbf16>
    %86 = vector.shape_cast %85 : vector<1x64x1024xbf16> to vector<64x1024xbf16>
    %cst_91 = arith.constant dense<0.000000e+00> : vector<2x1024xf32>
    %87 = tpu.matmul %84, %86, %cst_91 {dimension_numbers = #tpu.dot_dimension_numbers<[1], [0], [0], [1], [0, 0, 1, 1], [], []>} : vector<2x64xbf16>, vector<64x1024xbf16>, vector<2x1024xf32> -> vector<2x1024xf32>
    %88 = arith.addf %80, %87 : vector<2x1024xf32>
    %c6 = arith.constant 6 : index
    %c0_92 = arith.constant 0 : index
    %89 = tpu.strided_load %arg18[%c6, %c0_92] {strides = array<i32: 16, 1>} : memref<42x64xf32, #tpu.memory_space<vmem>>, vector<2x64xf32>
    %c7 = arith.constant 7 : index
    %c0_93 = arith.constant 0 : index
    %90 = tpu.strided_load %arg18[%c7, %c0_93] {strides = array<i32: 16, 1>} : memref<42x64xf32, #tpu.memory_space<vmem>>, vector<2x64xf32>
    %91 = arith.maximumf %89, %90 : vector<2x64xf32>
    %92 = arith.truncf %91 : vector<2x64xf32> to vector<2x64xbf16>
    %c3_94 = arith.constant 3 : index
    %c0_95 = arith.constant 0 : index
    %c0_96 = arith.constant 0 : index
    %93 = vector.load %arg19[%c3_94, %c0_95, %c0_96] : memref<5x64x1024xbf16, #tpu.memory_space<vmem>>, vector<1x64x1024xbf16>
    %94 = vector.shape_cast %93 : vector<1x64x1024xbf16> to vector<64x1024xbf16>
    %cst_97 = arith.constant dense<0.000000e+00> : vector<2x1024xf32>
    %95 = tpu.matmul %92, %94, %cst_97 {dimension_numbers = #tpu.dot_dimension_numbers<[1], [0], [0], [1], [0, 0, 1, 1], [], []>} : vector<2x64xbf16>, vector<64x1024xbf16>, vector<2x1024xf32> -> vector<2x1024xf32>
    %96 = arith.addf %88, %95 : vector<2x1024xf32>
    %c8 = arith.constant 8 : index
    %c0_98 = arith.constant 0 : index
    %97 = tpu.strided_load %arg18[%c8, %c0_98] {strides = array<i32: 16, 1>} : memref<42x64xf32, #tpu.memory_space<vmem>>, vector<2x64xf32>
    %c9 = arith.constant 9 : index
    %c0_99 = arith.constant 0 : index
    %98 = tpu.strided_load %arg18[%c9, %c0_99] {strides = array<i32: 16, 1>} : memref<42x64xf32, #tpu.memory_space<vmem>>, vector<2x64xf32>
    %99 = arith.maximumf %97, %98 : vector<2x64xf32>
    %100 = arith.truncf %99 : vector<2x64xf32> to vector<2x64xbf16>
    %c4_100 = arith.constant 4 : index
    %c0_101 = arith.constant 0 : index
    %c0_102 = arith.constant 0 : index
    %101 = vector.load %arg19[%c4_100, %c0_101, %c0_102] : memref<5x64x1024xbf16, #tpu.memory_space<vmem>>, vector<1x64x1024xbf16>
    %102 = vector.shape_cast %101 : vector<1x64x1024xbf16> to vector<64x1024xbf16>
    %cst_103 = arith.constant dense<0.000000e+00> : vector<2x1024xf32>
    %103 = tpu.matmul %100, %102, %cst_103 {dimension_numbers = #tpu.dot_dimension_numbers<[1], [0], [0], [1], [0, 0, 1, 1], [], []>} : vector<2x64xbf16>, vector<64x1024xbf16>, vector<2x1024xf32> -> vector<2x1024xf32>
    %104 = arith.addf %96, %103 : vector<2x1024xf32>
    %c0_104 = arith.constant 0 : index
    %c0_105 = arith.constant 0 : index
    %105 = vector.load %arg10[%c0_104, %c0_105] : memref<1x1024xf32, #tpu.memory_space<vmem>>, vector<1x1024xf32>
    %106 = vector.broadcast %105 : vector<1x1024xf32> to vector<2x1024xf32>
    %107 = arith.addf %104, %106 : vector<2x1024xf32>
    %cst_106 = arith.constant 0.000000e+00 : f32
    %108 = vector.broadcast %cst_106 : f32 to vector<2x1024xf32>
    %109 = arith.maximumf %107, %108 : vector<2x1024xf32>
    %c0_107 = arith.constant 0 : index
    %c0_108 = arith.constant 0 : index
    %110 = vector.load %arg11[%c0_107, %c0_108] : memref<1024x4xf32, #tpu.memory_space<vmem>>, vector<1024x4xf32>
    %cst_109 = arith.constant dense<0.000000e+00> : vector<2x4xf32>
    %111 = tpu.matmul %109, %110, %cst_109 {dimension_numbers = #tpu.dot_dimension_numbers<[1], [0], [0], [1], [0, 0, 1, 1], [], []>} : vector<2x1024xf32>, vector<1024x4xf32>, vector<2x4xf32> -> vector<2x4xf32>
    %c0_110 = arith.constant 0 : index
    %c0_111 = arith.constant 0 : index
    %112 = vector.load %arg12[%c0_110, %c0_111] : memref<1x4xf32, #tpu.memory_space<vmem>>, vector<1x4xf32>
    %113 = vector.broadcast %112 : vector<1x4xf32> to vector<2x4xf32>
    %114 = arith.addf %111, %113 : vector<2x4xf32>
    %cst_112 = arith.constant 0.000000e+00 : f32
    %115 = vector.broadcast %cst_112 : f32 to vector<2x4xf32>
    %116 = arith.subf %115, %114 : vector<2x4xf32>
    %117 = math.exp %116 : vector<2x4xf32>
    %cst_113 = arith.constant 1.000000e+00 : f32
    %118 = vector.broadcast %cst_113 : f32 to vector<2x4xf32>
    %119 = arith.addf %118, %117 : vector<2x4xf32>
    %cst_114 = arith.constant 1.000000e+00 : f32
    %120 = vector.broadcast %cst_114 : f32 to vector<2x4xf32>
    %121 = arith.divf %120, %119 : vector<2x4xf32>
    %c0_115 = arith.constant 0 : index
    %c0_116 = arith.constant 0 : index
    %122 = vector.load %arg13[%c0_115, %c0_116] : memref<2x4xf32, #tpu.memory_space<vmem>>, vector<2x4xf32>
    tpu.vector_store %arg13[%c0_115, %c0_116], %121 {strides = array<i32>} : memref<2x4xf32, #tpu.memory_space<vmem>>, vector<2x4xf32>,
    return
  }
}

</mosaic_0001>

<bundles_post_ra>
// kernel: neural_interface_cst_forward.1
= control target key start
LH: loop header
LB: loop body
LE: loop exit
PB: predicated region body
PF: predicated region fallthrough
CT: control target
= control target key end

     0   :  { %18 = vsyncpa [#allocation10], 0  ;;  %s7444_s0 = inlined_call_operand.vmem [shape: f32[62,12], index: 0, kind: input, shape index: {}]   ;;  %s7445_s1 = inlined_call_operand.vmem [shape: f32[12,128], index: 1, kind: input, shape index: {}]   ;;  %s7446_s2 = inlined_call_operand.vmem [shape: f32[1,128], index: 2, kind: input, shape index: {}]   ;;  %s7447_s3 = inlined_call_operand.vmem [shape: f32[384,128], index: 3, kind: input, shape index: {}]   ;;  %s7448_s4 = inlined_call_operand.vmem [shape: f32[1,128], index: 4, kind: input, shape index: {}]   ;;  %s7449_s5 = inlined_call_operand.hbm [shape: f32[384,128], index: 5, kind: input, shape index: {}]   ;;  %s7450_s6 = inlined_call_operand.vmem [shape: f32[1,128], index: 6, kind: input, shape index: {}]   ;;  %s7451_s7 = inlined_call_operand.vmem [shape: f32[384,64], index: 7, kind: input, shape index: {}]   ;;  %s7452_s8 = inlined_call_operand.vmem [shape: f32[1,64], index: 8, kind: input, shape index: {}]   ;;  %s7453_s9 = inlined_call_operand.vmem [shape: bf16[5,64,1024], index: 9, kind: input, shape index: {}]   ;;  %s7454_s10 = inlined_call_operand.vmem [shape: f32[1,1024], index: 10, kind: input, shape index: {}]   ;;  %s7455_s11 = inlined_call_operand.vmem [shape: f32[1024,4], index: 11, kind: input, shape index: {}]   ;;  %s7456_s12 = inlined_call_operand.vmem [shape: f32[1,4], index: 12, kind: input, shape index: {}]   ;;  %s7457_s13 = inlined_call_operand.hbm [shape: f32[2,4], index: 13, kind: output, shape index: {}]  }
   0x1   :  { %19 = vsyncpa [#allocation11], 0  ;;  %s5520_s25 = smov [#allocation9]   ;;  %s5470_s29 = scalar_lea.hbm %s7449_s5, 6144 }
   0x2   :  { %s35_s26 = sshll.u32 %s5520_s25, 4  ;;  %p5471_p0 = scmp.ne.s32.totalorder %s7449_s5, %s5470_s29  ;;  %s36_s26 = int_to_ptr.vmem [resolvable:$true] %s35_s26 }
   0x3   :  { %p5474_p1 = scmp.lt.u32.totalorder %s5470_s29, %s7449_s5 }
   0x5   :  { %p5476_p2 = pnand %p5474_p1, %p5471_p0 }
   0x7   :  { %5479 = shalt.err (!%p5476_p2)
}
   0x8   :  { %s5480_s17 = scalar_lea.vmem %s36_s26, 6144  ;;  %p5485_p4 = scmp.lt.s32.totalorder %s36_s26, %s36_s26 }
   0x9   :  { %p5481_p3 = scmp.ne.s32.totalorder %s36_s26, %s5480_s17  ;;  %p5486_p5 = scmp.lt.s32.totalorder %s5480_s17, %s5480_s17 }
   0xb   :  { %p5487_p6 = por %p5486_p5, %p5485_p4 }
   0xd   :  { %p5488_p7 = pnand %p5487_p6, %p5481_p3 }
   0xf   :  { %5491 = shalt.err (!%p5488_p7)
}
  0x10   :  { %s5521_s18 = smov 128   ;;  %s5522_s19 = smov 8  }
  0x11   :  { %41 = dma.hbm_to_vmem [thread:$0]  %s7449_s5, 6144, %s36_s26, [#allocation10], %s5521_s18, %s5521_s18, %s5522_s19  }
  0x12   :  { %5514 = dma.done.wait [#allocation10], 6144  }
  0x13   :  { %5515 = vsyncadd [#allocation10], 4294961152  ;;  %v75_v0 = vld [vmem:[%s7453_s9] sm:$0xf]  ;;  %v79_v2 = vld [vmem:[%s7453_s9 + $0x4] sm:$0xf] }
  0x14   :  { %v77_v1 = vld [vmem:[%s7453_s9 + $0x20] sm:$0xf]  ;;  %76 = vst [vmem:[#allocation7] sm:$0xf] %v75_v0  ;;  %80 = vst [vmem:[#allocation7 + $0x8] sm:$0xf] %v79_v2 }
  0x15   :  { %78 = vst [vmem:[#allocation7 + $0x4] sm:$0xf] %v77_v1  ;;  %v81_v3 = vld [vmem:[%s7453_s9 + $0x24] sm:$0xf]  ;;  %v83_v4 = vld [vmem:[%s7453_s9 + $0x8] sm:$0xf] }
  0x16   :  { %v85_v5 = vld [vmem:[%s7453_s9 + $0x28] sm:$0xf]  ;;  %82 = vst [vmem:[#allocation7 + $0xc] sm:$0xf] %v81_v3  ;;  %84 = vst [vmem:[#allocation7 + $0x10] sm:$0xf] %v83_v4 }
  0x17   :  { %86 = vst [vmem:[#allocation7 + $0x14] sm:$0xf] %v85_v5  ;;  %v87_v6 = vld [vmem:[%s7453_s9 + $0xc] sm:$0xf]  ;;  %v91_v8 = vld [vmem:[%s7453_s9 + $0x10] sm:$0xf] }
  0x18   :  { %v89_v7 = vld [vmem:[%s7453_s9 + $0x2c] sm:$0xf]  ;;  %88 = vst [vmem:[#allocation7 + $0x18] sm:$0xf] %v87_v6  ;;  %92 = vst [vmem:[#allocation7 + $0x20] sm:$0xf] %v91_v8 }
  0x19   :  { %90 = vst [vmem:[#allocation7 + $0x1c] sm:$0xf] %v89_v7  ;;  %v93_v9 = vld [vmem:[%s7453_s9 + $0x30] sm:$0xf]  ;;  %v95_v10 = vld [vmem:[%s7453_s9 + $0x14] sm:$0xf] }
  0x1a   :  { %v97_v11 = vld [vmem:[%s7453_s9 + $0x34] sm:$0xf]  ;;  %94 = vst [vmem:[#allocation7 + $0x24] sm:$0xf] %v93_v9  ;;  %96 = vst [vmem:[#allocation7 + $0x28] sm:$0xf] %v95_v10 }
  0x1b   :  { %98 = vst [vmem:[#allocation7 + $0x2c] sm:$0xf] %v97_v11  ;;  %v99_v12 = vld [vmem:[%s7453_s9 + $0x18] sm:$0xf]  ;;  %v103_v14 = vld [vmem:[%s7453_s9 + $0x1c] sm:$0xf] }
  0x1c   :  { %v101_v13 = vld [vmem:[%s7453_s9 + $0x38] sm:$0xf]  ;;  %100 = vst [vmem:[#allocation7 + $0x30] sm:$0xf] %v99_v12  ;;  %104 = vst [vmem:[#allocation7 + $0x38] sm:$0xf] %v103_v14 }
  0x1d   :  { %102 = vst [vmem:[#allocation7 + $0x34] sm:$0xf] %v101_v13  ;;  %v105_v15 = vld [vmem:[%s7453_s9 + $0x3c] sm:$0xff]   ;;  %v111_v17 = vld [vmem:[%s7453_s9 + $0x44] sm:$0xf] }
  0x1e   :  { %v109_v16 = vld [vmem:[%s7453_s9 + $0x60] sm:$0xf]  ;;  %106 = vst [vmem:[#allocation7 + $0x3c] sm:$0xff] %v105_v15   ;;  %112 = vst [vmem:[#allocation7 + $0x48] sm:$0xf] %v111_v17 }
  0x1f   :  { %110 = vst [vmem:[#allocation7 + $0x44] sm:$0xf] %v109_v16  ;;  %v113_v18 = vld [vmem:[%s7453_s9 + $0x64] sm:$0xf]  ;;  %v115_v19 = vld [vmem:[%s7453_s9 + $0x48] sm:$0xf] }
  0x20   :  { %v117_v20 = vld [vmem:[%s7453_s9 + $0x68] sm:$0xf]  ;;  %114 = vst [vmem:[#allocation7 + $0x4c] sm:$0xf] %v113_v18  ;;  %116 = vst [vmem:[#allocation7 + $0x50] sm:$0xf] %v115_v19 }
  0x21   :  { %118 = vst [vmem:[#allocation7 + $0x54] sm:$0xf] %v117_v20  ;;  %v119_v21 = vld [vmem:[%s7453_s9 + $0x4c] sm:$0xf]  ;;  %v123_v23 = vld [vmem:[%s7453_s9 + $0x50] sm:$0xf] }
  0x22   :  { %v121_v22 = vld [vmem:[%s7453_s9 + $0x6c] sm:$0xf]  ;;  %120 = vst [vmem:[#allocation7 + $0x58] sm:$0xf] %v119_v21  ;;  %124 = vst [vmem:[#allocation7 + $0x60] sm:$0xf] %v123_v23 }
  0x23   :  { %122 = vst [vmem:[#allocation7 + $0x5c] sm:$0xf] %v121_v22  ;;  %v125_v24 = vld [vmem:[%s7453_s9 + $0x70] sm:$0xf]  ;;  %v127_v25 = vld [vmem:[%s7453_s9 + $0x54] sm:$0xf] }
  0x24   :  { %v129_v26 = vld [vmem:[%s7453_s9 + $0x74] sm:$0xf]  ;;  %126 = vst [vmem:[#allocation7 + $0x64] sm:$0xf] %v125_v24  ;;  %128 = vst [vmem:[#allocation7 + $0x68] sm:$0xf] %v127_v25 }
  0x25   :  { %130 = vst [vmem:[#allocation7 + $0x6c] sm:$0xf] %v129_v26  ;;  %v131_v27 = vld [vmem:[%s7453_s9 + $0x58] sm:$0xf]  ;;  %v135_v29 = vld [vmem:[%s7453_s9 + $0x5c] sm:$0xf] }
  0x26   :  { %v133_v28 = vld [vmem:[%s7453_s9 + $0x78] sm:$0xf]  ;;  %132 = vst [vmem:[#allocation7 + $0x70] sm:$0xf] %v131_v27  ;;  %136 = vst [vmem:[#allocation7 + $0x78] sm:$0xf] %v135_v29 }
  0x27   :  { %134 = vst [vmem:[#allocation7 + $0x74] sm:$0xf] %v133_v28  ;;  %v137_v30 = vld [vmem:[%s7453_s9 + $0x7c] sm:$0xff]   ;;  %v143_v32 = vld [vmem:[%s7453_s9 + $0x84] sm:$0xf] }
  0x28   :  { %v141_v31 = vld [vmem:[%s7453_s9 + $0xa0] sm:$0xf]  ;;  %138 = vst [vmem:[#allocation7 + $0x7c] sm:$0xff] %v137_v30   ;;  %144 = vst [vmem:[#allocation7 + $0x88] sm:$0xf] %v143_v32 }
  0x29   :  { %142 = vst [vmem:[#allocation7 + $0x84] sm:$0xf] %v141_v31  ;;  %v145_v33 = vld [vmem:[%s7453_s9 + $0xa4] sm:$0xf]  ;;  %v147_v34 = vld [vmem:[%s7453_s9 + $0x88] sm:$0xf] }
  0x2a   :  { %v149_v35 = vld [vmem:[%s7453_s9 + $0xa8] sm:$0xf]  ;;  %146 = vst [vmem:[#allocation7 + $0x8c] sm:$0xf] %v145_v33  ;;  %148 = vst [vmem:[#allocation7 + $0x90] sm:$0xf] %v147_v34 }
  0x2b   :  { %150 = vst [vmem:[#allocation7 + $0x94] sm:$0xf] %v149_v35  ;;  %v151_v36 = vld [vmem:[%s7453_s9 + $0x8c] sm:$0xf]  ;;  %v155_v38 = vld [vmem:[%s7453_s9 + $0x90] sm:$0xf] }
  0x2c   :  { %v153_v37 = vld [vmem:[%s7453_s9 + $0xac] sm:$0xf]  ;;  %152 = vst [vmem:[#allocation7 + $0x98] sm:$0xf] %v151_v36  ;;  %156 = vst [vmem:[#allocation7 + $0xa0] sm:$0xf] %v155_v38 }
  0x2d   :  { %154 = vst [vmem:[#allocation7 + $0x9c] sm:$0xf] %v153_v37  ;;  %v157_v39 = vld [vmem:[%s7453_s9 + $0xb0] sm:$0xf]  ;;  %v159_v40 = vld [vmem:[%s7453_s9 + $0x94] sm:$0xf] }
  0x2e   :  { %v161_v41 = vld [vmem:[%s7453_s9 + $0xb4] sm:$0xf]  ;;  %158 = vst [vmem:[#allocation7 + $0xa4] sm:$0xf] %v157_v39  ;;  %160 = vst [vmem:[#allocation7 + $0xa8] sm:$0xf] %v159_v40 }
  0x2f   :  { %162 = vst [vmem:[#allocation7 + $0xac] sm:$0xf] %v161_v41  ;;  %v163_v42 = vld [vmem:[%s7453_s9 + $0x98] sm:$0xf]  ;;  %v167_v44 = vld [vmem:[%s7453_s9 + $0x9c] sm:$0xf] }
  0x30   :  { %v165_v43 = vld [vmem:[%s7453_s9 + $0xb8] sm:$0xf]  ;;  %164 = vst [vmem:[#allocation7 + $0xb0] sm:$0xf] %v163_v42  ;;  %168 = vst [vmem:[#allocation7 + $0xb8] sm:$0xf] %v167_v44 }
  0x31   :  { %166 = vst [vmem:[#allocation7 + $0xb4] sm:$0xf] %v165_v43  ;;  %v169_v45 = vld [vmem:[%s7453_s9 + $0xbc] sm:$0xff]   ;;  %v175_v47 = vld [vmem:[%s7453_s9 + $0xc4] sm:$0xf] }
  0x32   :  { %v173_v46 = vld [vmem:[%s7453_s9 + $0xe0] sm:$0xf]  ;;  %170 = vst [vmem:[#allocation7 + $0xbc] sm:$0xff] %v169_v45   ;;  %176 = vst [vmem:[#allocation7 + $0xc8] sm:$0xf] %v175_v47 }
  0x33   :  { %174 = vst [vmem:[#allocation7 + $0xc4] sm:$0xf] %v173_v46  ;;  %v177_v48 = vld [vmem:[%s7453_s9 + $0xe4] sm:$0xf]  ;;  %v179_v49 = vld [vmem:[%s7453_s9 + $0xc8] sm:$0xf] }
  0x34   :  { %v181_v50 = vld [vmem:[%s7453_s9 + $0xe8] sm:$0xf]  ;;  %178 = vst [vmem:[#allocation7 + $0xcc] sm:$0xf] %v177_v48  ;;  %180 = vst [vmem:[#allocation7 + $0xd0] sm:$0xf] %v179_v49 }
  0x35   :  { %182 = vst [vmem:[#allocation7 + $0xd4] sm:$0xf] %v181_v50  ;;  %v183_v51 = vld [vmem:[%s7453_s9 + $0xcc] sm:$0xf]  ;;  %v187_v53 = vld [vmem:[%s7453_s9 + $0xd0] sm:$0xf] }
  0x36   :  { %v185_v52 = vld [vmem:[%s7453_s9 + $0xec] sm:$0xf]  ;;  %184 = vst [vmem:[#allocation7 + $0xd8] sm:$0xf] %v183_v51  ;;  %188 = vst [vmem:[#allocation7 + $0xe0] sm:$0xf] %v187_v53 }
  0x37   :  { %186 = vst [vmem:[#allocation7 + $0xdc] sm:$0xf] %v185_v52  ;;  %v189_v54 = vld [vmem:[%s7453_s9 + $0xf0] sm:$0xf]  ;;  %v191_v55 = vld [vmem:[%s7453_s9 + $0xd4] sm:$0xf] }
  0x38   :  { %v193_v56 = vld [vmem:[%s7453_s9 + $0xf4] sm:$0xf]  ;;  %190 = vst [vmem:[#allocation7 + $0xe4] sm:$0xf] %v189_v54  ;;  %192 = vst [vmem:[#allocation7 + $0xe8] sm:$0xf] %v191_v55 }
  0x39   :  { %194 = vst [vmem:[#allocation7 + $0xec] sm:$0xf] %v193_v56  ;;  %v195_v57 = vld [vmem:[%s7453_s9 + $0xd8] sm:$0xf]  ;;  %v199_v59 = vld [vmem:[%s7453_s9 + $0xdc] sm:$0xf] }
  0x3a   :  { %v197_v58 = vld [vmem:[%s7453_s9 + $0xf8] sm:$0xf]  ;;  %196 = vst [vmem:[#allocation7 + $0xf0] sm:$0xf] %v195_v57  ;;  %200 = vst [vmem:[#allocation7 + $0xf8] sm:$0xf] %v199_v59 }
  0x3b   :  { %198 = vst [vmem:[#allocation7 + $0xf4] sm:$0xf] %v197_v58  ;;  %v201_v60 = vld [vmem:[%s7453_s9 + $0xfc] sm:$0xff]   ;;  %v207_v62 = vld [vmem:[%s7453_s9 + $0x104] sm:$0xf] }
  0x3c   :  { %v205_v61 = vld [vmem:[%s7453_s9 + $0x120] sm:$0xf]  ;;  %202 = vst [vmem:[#allocation7 + $0xfc] sm:$0xff] %v201_v60   ;;  %208 = vst [vmem:[#allocation7 + $0x108] sm:$0xf] %v207_v62 }
  0x3d   :  { %206 = vst [vmem:[#allocation7 + $0x104] sm:$0xf] %v205_v61  ;;  %v209_v63 = vld [vmem:[%s7453_s9 + $0x124] sm:$0xf]  ;;  %v211_v0 = vld [vmem:[%s7453_s9 + $0x108] sm:$0xf] }
  0x3e   :  { %v213_v1 = vld [vmem:[%s7453_s9 + $0x128] sm:$0xf]  ;;  %210 = vst [vmem:[#allocation7 + $0x10c] sm:$0xf] %v209_v63  ;;  %212 = vst [vmem:[#allocation7 + $0x110] sm:$0xf] %v211_v0 }
  0x3f   :  { %214 = vst [vmem:[#allocation7 + $0x114] sm:$0xf] %v213_v1  ;;  %v215_v2 = vld [vmem:[%s7453_s9 + $0x10c] sm:$0xf]  ;;  %v219_v4 = vld [vmem:[%s7453_s9 + $0x110] sm:$0xf] }
  0x40   :  { %v217_v3 = vld [vmem:[%s7453_s9 + $0x12c] sm:$0xf]  ;;  %216 = vst [vmem:[#allocation7 + $0x118] sm:$0xf] %v215_v2  ;;  %220 = vst [vmem:[#allocation7 + $0x120] sm:$0xf] %v219_v4 }
  0x41   :  { %218 = vst [vmem:[#allocation7 + $0x11c] sm:$0xf] %v217_v3  ;;  %v221_v5 = vld [vmem:[%s7453_s9 + $0x130] sm:$0xf]  ;;  %v223_v6 = vld [vmem:[%s7453_s9 + $0x114] sm:$0xf] }
  0x42   :  { %v225_v7 = vld [vmem:[%s7453_s9 + $0x134] sm:$0xf]  ;;  %222 = vst [vmem:[#allocation7 + $0x124] sm:$0xf] %v221_v5  ;;  %224 = vst [vmem:[#allocation7 + $0x128] sm:$0xf] %v223_v6 }
  0x43   :  { %226 = vst [vmem:[#allocation7 + $0x12c] sm:$0xf] %v225_v7  ;;  %v227_v8 = vld [vmem:[%s7453_s9 + $0x118] sm:$0xf]  ;;  %v231_v10 = vld [vmem:[%s7453_s9 + $0x11c] sm:$0xf] }
  0x44   :  { %v229_v9 = vld [vmem:[%s7453_s9 + $0x138] sm:$0xf]  ;;  %228 = vst [vmem:[#allocation7 + $0x130] sm:$0xf] %v227_v8  ;;  %232 = vst [vmem:[#allocation7 + $0x138] sm:$0xf] %v231_v10 }
  0x45   :  { %230 = vst [vmem:[#allocation7 + $0x134] sm:$0xf] %v229_v9  ;;  %v233_v11 = vld [vmem:[%s7453_s9 + $0x13c] sm:$0xff]   ;;  %v239_v13 = vld [vmem:[%s7453_s9 + $0x144] sm:$0xf] }
  0x46   :  { %v237_v12 = vld [vmem:[%s7453_s9 + $0x160] sm:$0xf]  ;;  %234 = vst [vmem:[#allocation7 + $0x13c] sm:$0xff] %v233_v11   ;;  %240 = vst [vmem:[#allocation7 + $0x148] sm:$0xf] %v239_v13 }
  0x47   :  { %238 = vst [vmem:[#allocation7 + $0x144] sm:$0xf] %v237_v12  ;;  %v241_v14 = vld [vmem:[%s7453_s9 + $0x164] sm:$0xf]  ;;  %v243_v15 = vld [vmem:[%s7453_s9 + $0x148] sm:$0xf] }
  0x48   :  { %v245_v16 = vld [vmem:[%s7453_s9 + $0x168] sm:$0xf]  ;;  %242 = vst [vmem:[#allocation7 + $0x14c] sm:$0xf] %v241_v14  ;;  %244 = vst [vmem:[#allocation7 + $0x150] sm:$0xf] %v243_v15 }
  0x49   :  { %246 = vst [vmem:[#allocation7 + $0x154] sm:$0xf] %v245_v16  ;;  %v247_v17 = vld [vmem:[%s7453_s9 + $0x14c] sm:$0xf]  ;;  %v251_v19 = vld [vmem:[%s7453_s9 + $0x150] sm:$0xf] }
  0x4a   :  { %v249_v18 = vld [vmem:[%s7453_s9 + $0x16c] sm:$0xf]  ;;  %248 = vst [vmem:[#allocation7 + $0x158] sm:$0xf] %v247_v17  ;;  %252 = vst [vmem:[#allocation7 + $0x160] sm:$0xf] %v251_v19 }
  0x4b   :  { %250 = vst [vmem:[#allocation7 + $0x15c] sm:$0xf] %v249_v18  ;;  %v253_v20 = vld [vmem:[%s7453_s9 + $0x170] sm:$0xf]  ;;  %v255_v21 = vld [vmem:[%s7453_s9 + $0x154] sm:$0xf] }
  0x4c   :  { %v257_v22 = vld [vmem:[%s7453_s9 + $0x174] sm:$0xf]  ;;  %254 = vst [vmem:[#allocation7 + $0x164] sm:$0xf] %v253_v20  ;;  %256 = vst [vmem:[#allocation7 + $0x168] sm:$0xf] %v255_v21 }
  0x4d   :  { %258 = vst [vmem:[#allocation7 + $0x16c] sm:$0xf] %v257_v22  ;;  %v259_v23 = vld [vmem:[%s7453_s9 + $0x158] sm:$0xf]  ;;  %v263_v25 = vld [vmem:[%s7453_s9 + $0x15c] sm:$0xf] }
  0x4e   :  { %v261_v24 = vld [vmem:[%s7453_s9 + $0x178] sm:$0xf]  ;;  %260 = vst [vmem:[#allocation7 + $0x170] sm:$0xf] %v259_v23  ;;  %264 = vst [vmem:[#allocation7 + $0x178] sm:$0xf] %v263_v25 }
  0x4f   :  { %262 = vst [vmem:[#allocation7 + $0x174] sm:$0xf] %v261_v24  ;;  %v265_v26 = vld [vmem:[%s7453_s9 + $0x17c] sm:$0xff]   ;;  %v271_v28 = vld [vmem:[%s7453_s9 + $0x184] sm:$0xf] }
  0x50   :  { %v269_v27 = vld [vmem:[%s7453_s9 + $0x1a0] sm:$0xf]  ;;  %266 = vst [vmem:[#allocation7 + $0x17c] sm:$0xff] %v265_v26   ;;  %272 = vst [vmem:[#allocation7 + $0x188] sm:$0xf] %v271_v28 }
  0x51   :  { %270 = vst [vmem:[#allocation7 + $0x184] sm:$0xf] %v269_v27  ;;  %v273_v29 = vld [vmem:[%s7453_s9 + $0x1a4] sm:$0xf]  ;;  %v275_v30 = vld [vmem:[%s7453_s9 + $0x188] sm:$0xf] }
  0x52   :  { %v277_v31 = vld [vmem:[%s7453_s9 + $0x1a8] sm:$0xf]  ;;  %274 = vst [vmem:[#allocation7 + $0x18c] sm:$0xf] %v273_v29  ;;  %276 = vst [vmem:[#allocation7 + $0x190] sm:$0xf] %v275_v30 }
  0x53   :  { %278 = vst [vmem:[#allocation7 + $0x194] sm:$0xf] %v277_v31  ;;  %v279_v32 = vld [vmem:[%s7453_s9 + $0x18c] sm:$0xf]  ;;  %v283_v34 = vld [vmem:[%s7453_s9 + $0x190] sm:$0xf] }
  0x54   :  { %v281_v33 = vld [vmem:[%s7453_s9 + $0x1ac] sm:$0xf]  ;;  %280 = vst [vmem:[#allocation7 + $0x198] sm:$0xf] %v279_v32  ;;  %284 = vst [vmem:[#allocation7 + $0x1a0] sm:$0xf] %v283_v34 }
  0x55   :  { %282 = vst [vmem:[#allocation7 + $0x19c] sm:$0xf] %v281_v33  ;;  %v285_v35 = vld [vmem:[%s7453_s9 + $0x1b0] sm:$0xf]  ;;  %v287_v36 = vld [vmem:[%s7453_s9 + $0x194] sm:$0xf] }
  0x56   :  { %v289_v37 = vld [vmem:[%s7453_s9 + $0x1b4] sm:$0xf]  ;;  %286 = vst [vmem:[#allocation7 + $0x1a4] sm:$0xf] %v285_v35  ;;  %288 = vst [vmem:[#allocation7 + $0x1a8] sm:$0xf] %v287_v36 }
  0x57   :  { %290 = vst [vmem:[#allocation7 + $0x1ac] sm:$0xf] %v289_v37  ;;  %v291_v38 = vld [vmem:[%s7453_s9 + $0x198] sm:$0xf]  ;;  %v295_v40 = vld [vmem:[%s7453_s9 + $0x19c] sm:$0xf] }
  0x58   :  { %v293_v39 = vld [vmem:[%s7453_s9 + $0x1b8] sm:$0xf]  ;;  %292 = vst [vmem:[#allocation7 + $0x1b0] sm:$0xf] %v291_v38  ;;  %296 = vst [vmem:[#allocation7 + $0x1b8] sm:$0xf] %v295_v40 }
  0x59   :  { %294 = vst [vmem:[#allocation7 + $0x1b4] sm:$0xf] %v293_v39  ;;  %v297_v41 = vld [vmem:[%s7453_s9 + $0x1bc] sm:$0xff]   ;;  %v303_v43 = vld [vmem:[%s7453_s9 + $0x1c4] sm:$0xf] }
  0x5a   :  { %v301_v42 = vld [vmem:[%s7453_s9 + $0x1e0] sm:$0xf]  ;;  %298 = vst [vmem:[#allocation7 + $0x1bc] sm:$0xff] %v297_v41   ;;  %304 = vst [vmem:[#allocation7 + $0x1c8] sm:$0xf] %v303_v43 }
  0x5b   :  { %302 = vst [vmem:[#allocation7 + $0x1c4] sm:$0xf] %v301_v42  ;;  %v305_v44 = vld [vmem:[%s7453_s9 + $0x1e4] sm:$0xf]  ;;  %v307_v45 = vld [vmem:[%s7453_s9 + $0x1c8] sm:$0xf] }
  0x5c   :  { %v309_v46 = vld [vmem:[%s7453_s9 + $0x1e8] sm:$0xf]  ;;  %306 = vst [vmem:[#allocation7 + $0x1cc] sm:$0xf] %v305_v44  ;;  %308 = vst [vmem:[#allocation7 + $0x1d0] sm:$0xf] %v307_v45 }
  0x5d   :  { %310 = vst [vmem:[#allocation7 + $0x1d4] sm:$0xf] %v309_v46  ;;  %v311_v47 = vld [vmem:[%s7453_s9 + $0x1cc] sm:$0xf]  ;;  %v315_v49 = vld [vmem:[%s7453_s9 + $0x1d0] sm:$0xf] }
  0x5e   :  { %v313_v48 = vld [vmem:[%s7453_s9 + $0x1ec] sm:$0xf]  ;;  %312 = vst [vmem:[#allocation7 + $0x1d8] sm:$0xf] %v311_v47  ;;  %316 = vst [vmem:[#allocation7 + $0x1e0] sm:$0xf] %v315_v49 }
  0x5f   :  { %314 = vst [vmem:[#allocation7 + $0x1dc] sm:$0xf] %v313_v48  ;;  %v317_v50 = vld [vmem:[%s7453_s9 + $0x1f0] sm:$0xf]  ;;  %v319_v51 = vld [vmem:[%s7453_s9 + $0x1d4] sm:$0xf] }
  0x60   :  { %v321_v52 = vld [vmem:[%s7453_s9 + $0x1f4] sm:$0xf]  ;;  %318 = vst [vmem:[#allocation7 + $0x1e4] sm:$0xf] %v317_v50  ;;  %320 = vst [vmem:[#allocation7 + $0x1e8] sm:$0xf] %v319_v51 }
  0x61   :  { %322 = vst [vmem:[#allocation7 + $0x1ec] sm:$0xf] %v321_v52  ;;  %v323_v53 = vld [vmem:[%s7453_s9 + $0x1d8] sm:$0xf]  ;;  %v327_v55 = vld [vmem:[%s7453_s9 + $0x1dc] sm:$0xf] }
  0x62   :  { %v325_v54 = vld [vmem:[%s7453_s9 + $0x1f8] sm:$0xf]  ;;  %324 = vst [vmem:[#allocation7 + $0x1f0] sm:$0xf] %v323_v53  ;;  %328 = vst [vmem:[#allocation7 + $0x1f8] sm:$0xf] %v327_v55 }
  0x63   :  { %326 = vst [vmem:[#allocation7 + $0x1f4] sm:$0xf] %v325_v54  ;;  %v329_v56 = vld [vmem:[%s7453_s9 + $0x1fc] sm:$0xff]   ;;  %v335_v58 = vld [vmem:[%s7453_s9 + $0x204] sm:$0xf] }
  0x64   :  { %v333_v57 = vld [vmem:[%s7453_s9 + $0x220] sm:$0xf]  ;;  %330 = vst [vmem:[#allocation7 + $0x1fc] sm:$0xff] %v329_v56   ;;  %336 = vst [vmem:[#allocation7 + $0x208] sm:$0xf] %v335_v58 }
  0x65   :  { %334 = vst [vmem:[#allocation7 + $0x204] sm:$0xf] %v333_v57  ;;  %v337_v59 = vld [vmem:[%s7453_s9 + $0x224] sm:$0xf]  ;;  %v339_v60 = vld [vmem:[%s7453_s9 + $0x208] sm:$0xf] }
  0x66   :  { %v341_v61 = vld [vmem:[%s7453_s9 + $0x228] sm:$0xf]  ;;  %338 = vst [vmem:[#allocation7 + $0x20c] sm:$0xf] %v337_v59  ;;  %340 = vst [vmem:[#allocation7 + $0x210] sm:$0xf] %v339_v60 }
  0x67   :  { %342 = vst [vmem:[#allocation7 + $0x214] sm:$0xf] %v341_v61  ;;  %v343_v62 = vld [vmem:[%s7453_s9 + $0x20c] sm:$0xf]  ;;  %v347_v0 = vld [vmem:[%s7453_s9 + $0x210] sm:$0xf] }
  0x68   :  { %v345_v63 = vld [vmem:[%s7453_s9 + $0x22c] sm:$0xf]  ;;  %344 = vst [vmem:[#allocation7 + $0x218] sm:$0xf] %v343_v62  ;;  %348 = vst [vmem:[#allocation7 + $0x220] sm:$0xf] %v347_v0 }
  0x69   :  { %346 = vst [vmem:[#allocation7 + $0x21c] sm:$0xf] %v345_v63  ;;  %v349_v1 = vld [vmem:[%s7453_s9 + $0x230] sm:$0xf]  ;;  %v351_v2 = vld [vmem:[%s7453_s9 + $0x214] sm:$0xf] }
  0x6a   :  { %v353_v3 = vld [vmem:[%s7453_s9 + $0x234] sm:$0xf]  ;;  %350 = vst [vmem:[#allocation7 + $0x224] sm:$0xf] %v349_v1  ;;  %352 = vst [vmem:[#allocation7 + $0x228] sm:$0xf] %v351_v2 }
  0x6b   :  { %354 = vst [vmem:[#allocation7 + $0x22c] sm:$0xf] %v353_v3  ;;  %v355_v4 = vld [vmem:[%s7453_s9 + $0x218] sm:$0xf]  ;;  %v359_v6 = vld [vmem:[%s7453_s9 + $0x21c] sm:$0xf] }
  0x6c   :  { %v357_v5 = vld [vmem:[%s7453_s9 + $0x238] sm:$0xf]  ;;  %356 = vst [vmem:[#allocation7 + $0x230] sm:$0xf] %v355_v4  ;;  %360 = vst [vmem:[#allocation7 + $0x238] sm:$0xf] %v359_v6 }
  0x6d   :  { %358 = vst [vmem:[#allocation7 + $0x234] sm:$0xf] %v357_v5  ;;  %v361_v7 = vld [vmem:[%s7453_s9 + $0x23c] sm:$0xff]   ;;  %v367_v9 = vld [vmem:[%s7453_s9 + $0x244] sm:$0xf] }
  0x6e   :  { %v365_v8 = vld [vmem:[%s7453_s9 + $0x260] sm:$0xf]  ;;  %362 = vst [vmem:[#allocation7 + $0x23c] sm:$0xff] %v361_v7   ;;  %368 = vst [vmem:[#allocation7 + $0x248] sm:$0xf] %v367_v9 }
  0x6f   :  { %366 = vst [vmem:[#allocation7 + $0x244] sm:$0xf] %v365_v8  ;;  %v369_v10 = vld [vmem:[%s7453_s9 + $0x264] sm:$0xf]  ;;  %v371_v11 = vld [vmem:[%s7453_s9 + $0x248] sm:$0xf] }
  0x70   :  { %v373_v12 = vld [vmem:[%s7453_s9 + $0x268] sm:$0xf]  ;;  %370 = vst [vmem:[#allocation7 + $0x24c] sm:$0xf] %v369_v10  ;;  %372 = vst [vmem:[#allocation7 + $0x250] sm:$0xf] %v371_v11 }
  0x71   :  { %374 = vst [vmem:[#allocation7 + $0x254] sm:$0xf] %v373_v12  ;;  %v375_v13 = vld [vmem:[%s7453_s9 + $0x24c] sm:$0xf]  ;;  %v379_v15 = vld [vmem:[%s7453_s9 + $0x250] sm:$0xf] }
  0x72   :  { %v377_v14 = vld [vmem:[%s7453_s9 + $0x26c] sm:$0xf]  ;;  %376 = vst [vmem:[#allocation7 + $0x258] sm:$0xf] %v375_v13  ;;  %380 = vst [vmem:[#allocation7 + $0x260] sm:$0xf] %v379_v15 }
  0x73   :  { %378 = vst [vmem:[#allocation7 + $0x25c] sm:$0xf] %v377_v14  ;;  %v381_v16 = vld [vmem:[%s7453_s9 + $0x270] sm:$0xf]  ;;  %v383_v17 = vld [vmem:[%s7453_s9 + $0x254] sm:$0xf] }
  0x74   :  { %v385_v18 = vld [vmem:[%s7453_s9 + $0x274] sm:$0xf]  ;;  %382 = vst [vmem:[#allocation7 + $0x264] sm:$0xf] %v381_v16  ;;  %384 = vst [vmem:[#allocation7 + $0x268] sm:$0xf] %v383_v17 }
  0x75   :  { %386 = vst [vmem:[#allocation7 + $0x26c] sm:$0xf] %v385_v18  ;;  %v387_v19 = vld [vmem:[%s7453_s9 + $0x258] sm:$0xf]  ;;  %v391_v21 = vld [vmem:[%s7453_s9 + $0x25c] sm:$0xf] }
  0x76   :  { %v389_v20 = vld [vmem:[%s7453_s9 + $0x278] sm:$0xf]  ;;  %388 = vst [vmem:[#allocation7 + $0x270] sm:$0xf] %v387_v19  ;;  %392 = vst [vmem:[#allocation7 + $0x278] sm:$0xf] %v391_v21 }
  0x77   :  { %390 = vst [vmem:[#allocation7 + $0x274] sm:$0xf] %v389_v20  ;;  %v393_v22 = vld [vmem:[%s7453_s9 + $0x27c] sm:$0xff]   ;;  %v399_v24 = vld [vmem:[%s7453_s9 + $0x284] sm:$0xf] }
  0x78   :  { %v397_v23 = vld [vmem:[%s7453_s9 + $0x2a0] sm:$0xf]  ;;  %394 = vst [vmem:[#allocation7 + $0x27c] sm:$0xff] %v393_v22   ;;  %400 = vst [vmem:[#allocation7 + $0x288] sm:$0xf] %v399_v24 }
  0x79   :  { %398 = vst [vmem:[#allocation7 + $0x284] sm:$0xf] %v397_v23  ;;  %v401_v25 = vld [vmem:[%s7453_s9 + $0x2a4] sm:$0xf]  ;;  %v403_v26 = vld [vmem:[%s7453_s9 + $0x288] sm:$0xf] }
  0x7a   :  { %v405_v27 = vld [vmem:[%s7453_s9 + $0x2a8] sm:$0xf]  ;;  %402 = vst [vmem:[#allocation7 + $0x28c] sm:$0xf] %v401_v25  ;;  %404 = vst [vmem:[#allocation7 + $0x290] sm:$0xf] %v403_v26 }
  0x7b   :  { %406 = vst [vmem:[#allocation7 + $0x294] sm:$0xf] %v405_v27  ;;  %v407_v28 = vld [vmem:[%s7453_s9 + $0x28c] sm:$0xf]  ;;  %v411_v30 = vld [vmem:[%s7453_s9 + $0x290] sm:$0xf] }
  0x7c   :  { %v409_v29 = vld [vmem:[%s7453_s9 + $0x2ac] sm:$0xf]  ;;  %408 = vst [vmem:[#allocation7 + $0x298] sm:$0xf] %v407_v28  ;;  %412 = vst [vmem:[#allocation7 + $0x2a0] sm:$0xf] %v411_v30 }
  0x7d   :  { %410 = vst [vmem:[#allocation7 + $0x29c] sm:$0xf] %v409_v29  ;;  %v413_v31 = vld [vmem:[%s7453_s9 + $0x2b0] sm:$0xf]  ;;  %v415_v32 = vld [vmem:[%s7453_s9 + $0x294] sm:$0xf] }
  0x7e   :  { %v417_v33 = vld [vmem:[%s7453_s9 + $0x2b4] sm:$0xf]  ;;  %414 = vst [vmem:[#allocation7 + $0x2a4] sm:$0xf] %v413_v31  ;;  %416 = vst [vmem:[#allocation7 + $0x2a8] sm:$0xf] %v415_v32 }
  0x7f   :  { %418 = vst [vmem:[#allocation7 + $0x2ac] sm:$0xf] %v417_v33  ;;  %v419_v34 = vld [vmem:[%s7453_s9 + $0x298] sm:$0xf]  ;;  %v423_v36 = vld [vmem:[%s7453_s9 + $0x29c] sm:$0xf] }
  0x80   :  { %v421_v35 = vld [vmem:[%s7453_s9 + $0x2b8] sm:$0xf]  ;;  %420 = vst [vmem:[#allocation7 + $0x2b0] sm:$0xf] %v419_v34  ;;  %424 = vst [vmem:[#allocation7 + $0x2b8] sm:$0xf] %v423_v36 }
  0x81   :  { %422 = vst [vmem:[#allocation7 + $0x2b4] sm:$0xf] %v421_v35  ;;  %v425_v37 = vld [vmem:[%s7453_s9 + $0x2bc] sm:$0xff]   ;;  %v431_v39 = vld [vmem:[%s7453_s9 + $0x2c4] sm:$0xf] }
  0x82   :  { %v429_v38 = vld [vmem:[%s7453_s9 + $0x2e0] sm:$0xf]  ;;  %426 = vst [vmem:[#allocation7 + $0x2bc] sm:$0xff] %v425_v37   ;;  %432 = vst [vmem:[#allocation7 + $0x2c8] sm:$0xf] %v431_v39 }
  0x83   :  { %430 = vst [vmem:[#allocation7 + $0x2c4] sm:$0xf] %v429_v38  ;;  %v433_v40 = vld [vmem:[%s7453_s9 + $0x2e4] sm:$0xf]  ;;  %v435_v41 = vld [vmem:[%s7453_s9 + $0x2c8] sm:$0xf] }
  0x84   :  { %v437_v42 = vld [vmem:[%s7453_s9 + $0x2e8] sm:$0xf]  ;;  %434 = vst [vmem:[#allocation7 + $0x2cc] sm:$0xf] %v433_v40  ;;  %436 = vst [vmem:[#allocation7 + $0x2d0] sm:$0xf] %v435_v41 }
  0x85   :  { %438 = vst [vmem:[#allocation7 + $0x2d4] sm:$0xf] %v437_v42  ;;  %v439_v43 = vld [vmem:[%s7453_s9 + $0x2cc] sm:$0xf]  ;;  %v443_v45 = vld [vmem:[%s7453_s9 + $0x2d0] sm:$0xf] }
  0x86   :  { %v441_v44 = vld [vmem:[%s7453_s9 + $0x2ec] sm:$0xf]  ;;  %440 = vst [vmem:[#allocation7 + $0x2d8] sm:$0xf] %v439_v43  ;;  %444 = vst [vmem:[#allocation7 + $0x2e0] sm:$0xf] %v443_v45 }
  0x87   :  { %442 = vst [vmem:[#allocation7 + $0x2dc] sm:$0xf] %v441_v44  ;;  %v445_v46 = vld [vmem:[%s7453_s9 + $0x2f0] sm:$0xf]  ;;  %v447_v47 = vld [vmem:[%s7453_s9 + $0x2d4] sm:$0xf] }
  0x88   :  { %v449_v48 = vld [vmem:[%s7453_s9 + $0x2f4] sm:$0xf]  ;;  %446 = vst [vmem:[#allocation7 + $0x2e4] sm:$0xf] %v445_v46  ;;  %448 = vst [vmem:[#allocation7 + $0x2e8] sm:$0xf] %v447_v47 }
  0x89   :  { %450 = vst [vmem:[#allocation7 + $0x2ec] sm:$0xf] %v449_v48  ;;  %v451_v49 = vld [vmem:[%s7453_s9 + $0x2d8] sm:$0xf]  ;;  %v455_v51 = vld [vmem:[%s7453_s9 + $0x2dc] sm:$0xf] }
  0x8a   :  { %v453_v50 = vld [vmem:[%s7453_s9 + $0x2f8] sm:$0xf]  ;;  %452 = vst [vmem:[#allocation7 + $0x2f0] sm:$0xf] %v451_v49  ;;  %456 = vst [vmem:[#allocation7 + $0x2f8] sm:$0xf] %v455_v51 }
  0x8b   :  { %454 = vst [vmem:[#allocation7 + $0x2f4] sm:$0xf] %v453_v50  ;;  %v457_v52 = vld [vmem:[%s7453_s9 + $0x2fc] sm:$0xff]   ;;  %v463_v54 = vld [vmem:[%s7453_s9 + $0x304] sm:$0xf] }
  0x8c   :  { %v461_v53 = vld [vmem:[%s7453_s9 + $0x320] sm:$0xf]  ;;  %458 = vst [vmem:[#allocation7 + $0x2fc] sm:$0xff] %v457_v52   ;;  %464 = vst [vmem:[#allocation7 + $0x308] sm:$0xf] %v463_v54 }
  0x8d   :  { %462 = vst [vmem:[#allocation7 + $0x304] sm:$0xf] %v461_v53  ;;  %v465_v55 = vld [vmem:[%s7453_s9 + $0x324] sm:$0xf]  ;;  %v467_v56 = vld [vmem:[%s7453_s9 + $0x308] sm:$0xf] }
  0x8e   :  { %v469_v57 = vld [vmem:[%s7453_s9 + $0x328] sm:$0xf]  ;;  %466 = vst [vmem:[#allocation7 + $0x30c] sm:$0xf] %v465_v55  ;;  %468 = vst [vmem:[#allocation7 + $0x310] sm:$0xf] %v467_v56 }
  0x8f   :  { %470 = vst [vmem:[#allocation7 + $0x314] sm:$0xf] %v469_v57  ;;  %v471_v58 = vld [vmem:[%s7453_s9 + $0x30c] sm:$0xf]  ;;  %v475_v60 = vld [vmem:[%s7453_s9 + $0x310] sm:$0xf] }
  0x90   :  { %v473_v59 = vld [vmem:[%s7453_s9 + $0x32c] sm:$0xf]  ;;  %472 = vst [vmem:[#allocation7 + $0x318] sm:$0xf] %v471_v58  ;;  %476 = vst [vmem:[#allocation7 + $0x320] sm:$0xf] %v475_v60 }
  0x91   :  { %474 = vst [vmem:[#allocation7 + $0x31c] sm:$0xf] %v473_v59  ;;  %v477_v61 = vld [vmem:[%s7453_s9 + $0x330] sm:$0xf]  ;;  %v479_v62 = vld [vmem:[%s7453_s9 + $0x314] sm:$0xf] }
  0x92   :  { %v481_v63 = vld [vmem:[%s7453_s9 + $0x334] sm:$0xf]  ;;  %478 = vst [vmem:[#allocation7 + $0x324] sm:$0xf] %v477_v61  ;;  %480 = vst [vmem:[#allocation7 + $0x328] sm:$0xf] %v479_v62 }
  0x93   :  { %482 = vst [vmem:[#allocation7 + $0x32c] sm:$0xf] %v481_v63  ;;  %v483_v0 = vld [vmem:[%s7453_s9 + $0x318] sm:$0xf]  ;;  %v487_v2 = vld [vmem:[%s7453_s9 + $0x31c] sm:$0xf] }
  0x94   :  { %v485_v1 = vld [vmem:[%s7453_s9 + $0x338] sm:$0xf]  ;;  %484 = vst [vmem:[#allocation7 + $0x330] sm:$0xf] %v483_v0  ;;  %488 = vst [vmem:[#allocation7 + $0x338] sm:$0xf] %v487_v2 }
  0x95   :  { %486 = vst [vmem:[#allocation7 + $0x334] sm:$0xf] %v485_v1  ;;  %v489_v3 = vld [vmem:[%s7453_s9 + $0x33c] sm:$0xff]   ;;  %v495_v5 = vld [vmem:[%s7453_s9 + $0x344] sm:$0xf] }
  0x96   :  { %v493_v4 = vld [vmem:[%s7453_s9 + $0x360] sm:$0xf]  ;;  %490 = vst [vmem:[#allocation7 + $0x33c] sm:$0xff] %v489_v3   ;;  %496 = vst [vmem:[#allocation7 + $0x348] sm:$0xf] %v495_v5 }
  0x97   :  { %494 = vst [vmem:[#allocation7 + $0x344] sm:$0xf] %v493_v4  ;;  %v497_v6 = vld [vmem:[%s7453_s9 + $0x364] sm:$0xf]  ;;  %v499_v7 = vld [vmem:[%s7453_s9 + $0x348] sm:$0xf] }
  0x98   :  { %v501_v8 = vld [vmem:[%s7453_s9 + $0x368] sm:$0xf]  ;;  %498 = vst [vmem:[#allocation7 + $0x34c] sm:$0xf] %v497_v6  ;;  %500 = vst [vmem:[#allocation7 + $0x350] sm:$0xf] %v499_v7 }
  0x99   :  { %502 = vst [vmem:[#allocation7 + $0x354] sm:$0xf] %v501_v8  ;;  %v503_v9 = vld [vmem:[%s7453_s9 + $0x34c] sm:$0xf]  ;;  %v507_v11 = vld [vmem:[%s7453_s9 + $0x350] sm:$0xf] }
  0x9a   :  { %v505_v10 = vld [vmem:[%s7453_s9 + $0x36c] sm:$0xf]  ;;  %504 = vst [vmem:[#allocation7 + $0x358] sm:$0xf] %v503_v9  ;;  %508 = vst [vmem:[#allocation7 + $0x360] sm:$0xf] %v507_v11 }
  0x9b   :  { %506 = vst [vmem:[#allocation7 + $0x35c] sm:$0xf] %v505_v10  ;;  %v509_v12 = vld [vmem:[%s7453_s9 + $0x370] sm:$0xf]  ;;  %v511_v13 = vld [vmem:[%s7453_s9 + $0x354] sm:$0xf] }
  0x9c   :  { %v513_v14 = vld [vmem:[%s7453_s9 + $0x374] sm:$0xf]  ;;  %510 = vst [vmem:[#allocation7 + $0x364] sm:$0xf] %v509_v12  ;;  %512 = vst [vmem:[#allocation7 + $0x368] sm:$0xf] %v511_v13 }
  0x9d   :  { %514 = vst [vmem:[#allocation7 + $0x36c] sm:$0xf] %v513_v14  ;;  %v515_v15 = vld [vmem:[%s7453_s9 + $0x358] sm:$0xf]  ;;  %v519_v17 = vld [vmem:[%s7453_s9 + $0x35c] sm:$0xf] }
  0x9e   :  { %v517_v16 = vld [vmem:[%s7453_s9 + $0x378] sm:$0xf]  ;;  %516 = vst [vmem:[#allocation7 + $0x370] sm:$0xf] %v515_v15  ;;  %520 = vst [vmem:[#allocation7 + $0x378] sm:$0xf] %v519_v17 }
  0x9f   :  { %518 = vst [vmem:[#allocation7 + $0x374] sm:$0xf] %v517_v16  ;;  %v521_v18 = vld [vmem:[%s7453_s9 + $0x37c] sm:$0xff]   ;;  %v527_v20 = vld [vmem:[%s7453_s9 + $0x384] sm:$0xf] }
  0xa0   :  { %v525_v19 = vld [vmem:[%s7453_s9 + $0x3a0] sm:$0xf]  ;;  %522 = vst [vmem:[#allocation7 + $0x37c] sm:$0xff] %v521_v18   ;;  %528 = vst [vmem:[#allocation7 + $0x388] sm:$0xf] %v527_v20 }
  0xa1   :  { %526 = vst [vmem:[#allocation7 + $0x384] sm:$0xf] %v525_v19  ;;  %v529_v21 = vld [vmem:[%s7453_s9 + $0x3a4] sm:$0xf]  ;;  %v531_v22 = vld [vmem:[%s7453_s9 + $0x388] sm:$0xf] }
  0xa2   :  { %v533_v23 = vld [vmem:[%s7453_s9 + $0x3a8] sm:$0xf]  ;;  %530 = vst [vmem:[#allocation7 + $0x38c] sm:$0xf] %v529_v21  ;;  %532 = vst [vmem:[#allocation7 + $0x390] sm:$0xf] %v531_v22 }
  0xa3   :  { %534 = vst [vmem:[#allocation7 + $0x394] sm:$0xf] %v533_v23  ;;  %v535_v24 = vld [vmem:[%s7453_s9 + $0x38c] sm:$0xf]  ;;  %v539_v26 = vld [vmem:[%s7453_s9 + $0x390] sm:$0xf] }
  0xa4   :  { %v537_v25 = vld [vmem:[%s7453_s9 + $0x3ac] sm:$0xf]  ;;  %536 = vst [vmem:[#allocation7 + $0x398] sm:$0xf] %v535_v24  ;;  %540 = vst [vmem:[#allocation7 + $0x3a0] sm:$0xf] %v539_v26 }
  0xa5   :  { %538 = vst [vmem:[#allocation7 + $0x39c] sm:$0xf] %v537_v25  ;;  %v541_v27 = vld [vmem:[%s7453_s9 + $0x3b0] sm:$0xf]  ;;  %v543_v28 = vld [vmem:[%s7453_s9 + $0x394] sm:$0xf] }
  0xa6   :  { %v545_v29 = vld [vmem:[%s7453_s9 + $0x3b4] sm:$0xf]  ;;  %542 = vst [vmem:[#allocation7 + $0x3a4] sm:$0xf] %v541_v27  ;;  %544 = vst [vmem:[#allocation7 + $0x3a8] sm:$0xf] %v543_v28 }
  0xa7   :  { %546 = vst [vmem:[#allocation7 + $0x3ac] sm:$0xf] %v545_v29  ;;  %v547_v30 = vld [vmem:[%s7453_s9 + $0x398] sm:$0xf]  ;;  %v551_v32 = vld [vmem:[%s7453_s9 + $0x39c] sm:$0xf] }
  0xa8   :  { %v549_v31 = vld [vmem:[%s7453_s9 + $0x3b8] sm:$0xf]  ;;  %548 = vst [vmem:[#allocation7 + $0x3b0] sm:$0xf] %v547_v30  ;;  %552 = vst [vmem:[#allocation7 + $0x3b8] sm:$0xf] %v551_v32 }
  0xa9   :  { %550 = vst [vmem:[#allocation7 + $0x3b4] sm:$0xf] %v549_v31  ;;  %v553_v33 = vld [vmem:[%s7453_s9 + $0x3bc] sm:$0xff]   ;;  %v559_v35 = vld [vmem:[%s7453_s9 + $0x3c4] sm:$0xf] }
  0xaa   :  { %v557_v34 = vld [vmem:[%s7453_s9 + $0x3e0] sm:$0xf]  ;;  %554 = vst [vmem:[#allocation7 + $0x3bc] sm:$0xff] %v553_v33   ;;  %560 = vst [vmem:[#allocation7 + $0x3c8] sm:$0xf] %v559_v35 }
  0xab   :  { %558 = vst [vmem:[#allocation7 + $0x3c4] sm:$0xf] %v557_v34  ;;  %v561_v36 = vld [vmem:[%s7453_s9 + $0x3e4] sm:$0xf]  ;;  %v563_v37 = vld [vmem:[%s7453_s9 + $0x3c8] sm:$0xf] }
  0xac   :  { %v565_v38 = vld [vmem:[%s7453_s9 + $0x3e8] sm:$0xf]  ;;  %562 = vst [vmem:[#allocation7 + $0x3cc] sm:$0xf] %v561_v36  ;;  %564 = vst [vmem:[#allocation7 + $0x3d0] sm:$0xf] %v563_v37 }
  0xad   :  { %566 = vst [vmem:[#allocation7 + $0x3d4] sm:$0xf] %v565_v38  ;;  %v567_v39 = vld [vmem:[%s7453_s9 + $0x3cc] sm:$0xf]  ;;  %v571_v41 = vld [vmem:[%s7453_s9 + $0x3d0] sm:$0xf] }
  0xae   :  { %v569_v40 = vld [vmem:[%s7453_s9 + $0x3ec] sm:$0xf]  ;;  %568 = vst [vmem:[#allocation7 + $0x3d8] sm:$0xf] %v567_v39  ;;  %572 = vst [vmem:[#allocation7 + $0x3e0] sm:$0xf] %v571_v41 }
  0xaf   :  { %570 = vst [vmem:[#allocation7 + $0x3dc] sm:$0xf] %v569_v40  ;;  %v573_v42 = vld [vmem:[%s7453_s9 + $0x3f0] sm:$0xf]  ;;  %v575_v43 = vld [vmem:[%s7453_s9 + $0x3d4] sm:$0xf] }
  0xb0   :  { %v577_v44 = vld [vmem:[%s7453_s9 + $0x3f4] sm:$0xf]  ;;  %574 = vst [vmem:[#allocation7 + $0x3e4] sm:$0xf] %v573_v42  ;;  %576 = vst [vmem:[#allocation7 + $0x3e8] sm:$0xf] %v575_v43 }
  0xb1   :  { %578 = vst [vmem:[#allocation7 + $0x3ec] sm:$0xf] %v577_v44  ;;  %v579_v45 = vld [vmem:[%s7453_s9 + $0x3d8] sm:$0xf]  ;;  %v583_v47 = vld [vmem:[%s7453_s9 + $0x3dc] sm:$0xf] }
  0xb2   :  { %v581_v46 = vld [vmem:[%s7453_s9 + $0x3f8] sm:$0xf]  ;;  %580 = vst [vmem:[#allocation7 + $0x3f0] sm:$0xf] %v579_v45  ;;  %584 = vst [vmem:[#allocation7 + $0x3f8] sm:$0xf] %v583_v47 }
  0xb3   :  { %582 = vst [vmem:[#allocation7 + $0x3f4] sm:$0xf] %v581_v46  ;;  %v585_v48 = vld [vmem:[%s7453_s9 + $0x3fc] sm:$0xff]   ;;  %v591_v50 = vld [vmem:[%s7453_s9 + $0x404] sm:$0xf] }
  0xb4   :  { %v589_v49 = vld [vmem:[%s7453_s9 + $0x420] sm:$0xf]  ;;  %586 = vst [vmem:[#allocation7 + $0x3fc] sm:$0xff] %v585_v48   ;;  %592 = vst [vmem:[#allocation7 + $0x408] sm:$0xf] %v591_v50 }
  0xb5   :  { %590 = vst [vmem:[#allocation7 + $0x404] sm:$0xf] %v589_v49  ;;  %v593_v51 = vld [vmem:[%s7453_s9 + $0x424] sm:$0xf]  ;;  %v595_v52 = vld [vmem:[%s7453_s9 + $0x408] sm:$0xf] }
  0xb6   :  { %v597_v53 = vld [vmem:[%s7453_s9 + $0x428] sm:$0xf]  ;;  %594 = vst [vmem:[#allocation7 + $0x40c] sm:$0xf] %v593_v51  ;;  %596 = vst [vmem:[#allocation7 + $0x410] sm:$0xf] %v595_v52 }
  0xb7   :  { %598 = vst [vmem:[#allocation7 + $0x414] sm:$0xf] %v597_v53  ;;  %v599_v54 = vld [vmem:[%s7453_s9 + $0x40c] sm:$0xf]  ;;  %v603_v56 = vld [vmem:[%s7453_s9 + $0x410] sm:$0xf] }
  0xb8   :  { %v601_v55 = vld [vmem:[%s7453_s9 + $0x42c] sm:$0xf]  ;;  %600 = vst [vmem:[#allocation7 + $0x418] sm:$0xf] %v599_v54  ;;  %604 = vst [vmem:[#allocation7 + $0x420] sm:$0xf] %v603_v56 }
  0xb9   :  { %602 = vst [vmem:[#allocation7 + $0x41c] sm:$0xf] %v601_v55  ;;  %v605_v57 = vld [vmem:[%s7453_s9 + $0x430] sm:$0xf]  ;;  %v607_v58 = vld [vmem:[%s7453_s9 + $0x414] sm:$0xf] }
  0xba   :  { %v609_v59 = vld [vmem:[%s7453_s9 + $0x434] sm:$0xf]  ;;  %606 = vst [vmem:[#allocation7 + $0x424] sm:$0xf] %v605_v57  ;;  %608 = vst [vmem:[#allocation7 + $0x428] sm:$0xf] %v607_v58 }
  0xbb   :  { %610 = vst [vmem:[#allocation7 + $0x42c] sm:$0xf] %v609_v59  ;;  %v611_v60 = vld [vmem:[%s7453_s9 + $0x418] sm:$0xf]  ;;  %v615_v62 = vld [vmem:[%s7453_s9 + $0x41c] sm:$0xf] }
  0xbc   :  { %v613_v61 = vld [vmem:[%s7453_s9 + $0x438] sm:$0xf]  ;;  %612 = vst [vmem:[#allocation7 + $0x430] sm:$0xf] %v611_v60  ;;  %616 = vst [vmem:[#allocation7 + $0x438] sm:$0xf] %v615_v62 }
  0xbd   :  { %614 = vst [vmem:[#allocation7 + $0x434] sm:$0xf] %v613_v61  ;;  %v617_v63 = vld [vmem:[%s7453_s9 + $0x43c] sm:$0xff]   ;;  %v623_v1 = vld [vmem:[%s7453_s9 + $0x444] sm:$0xf] }
  0xbe   :  { %v621_v0 = vld [vmem:[%s7453_s9 + $0x460] sm:$0xf]  ;;  %618 = vst [vmem:[#allocation7 + $0x43c] sm:$0xff] %v617_v63   ;;  %624 = vst [vmem:[#allocation7 + $0x448] sm:$0xf] %v623_v1 }
  0xbf   :  { %622 = vst [vmem:[#allocation7 + $0x444] sm:$0xf] %v621_v0  ;;  %v625_v2 = vld [vmem:[%s7453_s9 + $0x464] sm:$0xf]  ;;  %v627_v3 = vld [vmem:[%s7453_s9 + $0x448] sm:$0xf] }
  0xc0   :  { %v629_v4 = vld [vmem:[%s7453_s9 + $0x468] sm:$0xf]  ;;  %626 = vst [vmem:[#allocation7 + $0x44c] sm:$0xf] %v625_v2  ;;  %628 = vst [vmem:[#allocation7 + $0x450] sm:$0xf] %v627_v3 }
  0xc1   :  { %630 = vst [vmem:[#allocation7 + $0x454] sm:$0xf] %v629_v4  ;;  %v631_v5 = vld [vmem:[%s7453_s9 + $0x44c] sm:$0xf]  ;;  %v635_v7 = vld [vmem:[%s7453_s9 + $0x450] sm:$0xf] }
  0xc2   :  { %v633_v6 = vld [vmem:[%s7453_s9 + $0x46c] sm:$0xf]  ;;  %632 = vst [vmem:[#allocation7 + $0x458] sm:$0xf] %v631_v5  ;;  %636 = vst [vmem:[#allocation7 + $0x460] sm:$0xf] %v635_v7 }
  0xc3   :  { %634 = vst [vmem:[#allocation7 + $0x45c] sm:$0xf] %v633_v6  ;;  %v637_v8 = vld [vmem:[%s7453_s9 + $0x470] sm:$0xf]  ;;  %v639_v9 = vld [vmem:[%s7453_s9 + $0x454] sm:$0xf] }
  0xc4   :  { %v641_v10 = vld [vmem:[%s7453_s9 + $0x474] sm:$0xf]  ;;  %638 = vst [vmem:[#allocation7 + $0x464] sm:$0xf] %v637_v8  ;;  %640 = vst [vmem:[#allocation7 + $0x468] sm:$0xf] %v639_v9 }
  0xc5   :  { %642 = vst [vmem:[#allocation7 + $0x46c] sm:$0xf] %v641_v10  ;;  %v643_v11 = vld [vmem:[%s7453_s9 + $0x458] sm:$0xf]  ;;  %v647_v13 = vld [vmem:[%s7453_s9 + $0x45c] sm:$0xf] }
  0xc6   :  { %v645_v12 = vld [vmem:[%s7453_s9 + $0x478] sm:$0xf]  ;;  %644 = vst [vmem:[#allocation7 + $0x470] sm:$0xf] %v643_v11  ;;  %648 = vst [vmem:[#allocation7 + $0x478] sm:$0xf] %v647_v13 }
  0xc7   :  { %646 = vst [vmem:[#allocation7 + $0x474] sm:$0xf] %v645_v12  ;;  %v649_v14 = vld [vmem:[%s7453_s9 + $0x47c] sm:$0xff]   ;;  %v655_v16 = vld [vmem:[%s7453_s9 + $0x484] sm:$0xf] }
  0xc8   :  { %v653_v15 = vld [vmem:[%s7453_s9 + $0x4a0] sm:$0xf]  ;;  %650 = vst [vmem:[#allocation7 + $0x47c] sm:$0xff] %v649_v14   ;;  %656 = vst [vmem:[#allocation7 + $0x488] sm:$0xf] %v655_v16 }
  0xc9   :  { %654 = vst [vmem:[#allocation7 + $0x484] sm:$0xf] %v653_v15  ;;  %v657_v17 = vld [vmem:[%s7453_s9 + $0x4a4] sm:$0xf]  ;;  %v659_v18 = vld [vmem:[%s7453_s9 + $0x488] sm:$0xf] }
  0xca   :  { %v661_v19 = vld [vmem:[%s7453_s9 + $0x4a8] sm:$0xf]  ;;  %658 = vst [vmem:[#allocation7 + $0x48c] sm:$0xf] %v657_v17  ;;  %660 = vst [vmem:[#allocation7 + $0x490] sm:$0xf] %v659_v18 }
  0xcb   :  { %662 = vst [vmem:[#allocation7 + $0x494] sm:$0xf] %v661_v19  ;;  %v663_v20 = vld [vmem:[%s7453_s9 + $0x48c] sm:$0xf]  ;;  %v667_v22 = vld [vmem:[%s7453_s9 + $0x490] sm:$0xf] }
  0xcc   :  { %v665_v21 = vld [vmem:[%s7453_s9 + $0x4ac] sm:$0xf]  ;;  %664 = vst [vmem:[#allocation7 + $0x498] sm:$0xf] %v663_v20  ;;  %668 = vst [vmem:[#allocation7 + $0x4a0] sm:$0xf] %v667_v22 }
  0xcd   :  { %666 = vst [vmem:[#allocation7 + $0x49c] sm:$0xf] %v665_v21  ;;  %v669_v23 = vld [vmem:[%s7453_s9 + $0x4b0] sm:$0xf]  ;;  %v671_v24 = vld [vmem:[%s7453_s9 + $0x494] sm:$0xf] }
  0xce   :  { %v673_v25 = vld [vmem:[%s7453_s9 + $0x4b4] sm:$0xf]  ;;  %670 = vst [vmem:[#allocation7 + $0x4a4] sm:$0xf] %v669_v23  ;;  %672 = vst [vmem:[#allocation7 + $0x4a8] sm:$0xf] %v671_v24 }
  0xcf   :  { %674 = vst [vmem:[#allocation7 + $0x4ac] sm:$0xf] %v673_v25  ;;  %v675_v26 = vld [vmem:[%s7453_s9 + $0x498] sm:$0xf]  ;;  %v679_v28 = vld [vmem:[%s7453_s9 + $0x49c] sm:$0xf] }
  0xd0   :  { %v677_v27 = vld [vmem:[%s7453_s9 + $0x4b8] sm:$0xf]  ;;  %676 = vst [vmem:[#allocation7 + $0x4b0] sm:$0xf] %v675_v26  ;;  %680 = vst [vmem:[#allocation7 + $0x4b8] sm:$0xf] %v679_v28 }
  0xd1   :  { %678 = vst [vmem:[#allocation7 + $0x4b4] sm:$0xf] %v677_v27  ;;  %v681_v29 = vld [vmem:[%s7453_s9 + $0x4bc] sm:$0xff]   ;;  %v687_v31 = vld [vmem:[%s7453_s9 + $0x4c4] sm:$0xf] }
  0xd2   :  { %v685_v30 = vld [vmem:[%s7453_s9 + $0x4e0] sm:$0xf]  ;;  %682 = vst [vmem:[#allocation7 + $0x4bc] sm:$0xff] %v681_v29   ;;  %688 = vst [vmem:[#allocation7 + $0x4c8] sm:$0xf] %v687_v31 }
  0xd3   :  { %686 = vst [vmem:[#allocation7 + $0x4c4] sm:$0xf] %v685_v30  ;;  %v689_v32 = vld [vmem:[%s7453_s9 + $0x4e4] sm:$0xf]  ;;  %v691_v33 = vld [vmem:[%s7453_s9 + $0x4c8] sm:$0xf] }
  0xd4   :  { %v693_v34 = vld [vmem:[%s7453_s9 + $0x4e8] sm:$0xf]  ;;  %690 = vst [vmem:[#allocation7 + $0x4cc] sm:$0xf] %v689_v32  ;;  %692 = vst [vmem:[#allocation7 + $0x4d0] sm:$0xf] %v691_v33 }
  0xd5   :  { %694 = vst [vmem:[#allocation7 + $0x4d4] sm:$0xf] %v693_v34  ;;  %v695_v35 = vld [vmem:[%s7453_s9 + $0x4cc] sm:$0xf]  ;;  %v699_v37 = vld [vmem:[%s7453_s9 + $0x4d0] sm:$0xf] }
  0xd6   :  { %v697_v36 = vld [vmem:[%s7453_s9 + $0x4ec] sm:$0xf]  ;;  %696 = vst [vmem:[#allocation7 + $0x4d8] sm:$0xf] %v695_v35  ;;  %700 = vst [vmem:[#allocation7 + $0x4e0] sm:$0xf] %v699_v37 }
  0xd7   :  { %698 = vst [vmem:[#allocation7 + $0x4dc] sm:$0xf] %v697_v36  ;;  %v701_v38 = vld [vmem:[%s7453_s9 + $0x4f0] sm:$0xf]  ;;  %v703_v39 = vld [vmem:[%s7453_s9 + $0x4d4] sm:$0xf] }
  0xd8   :  { %v705_v40 = vld [vmem:[%s7453_s9 + $0x4f4] sm:$0xf]  ;;  %702 = vst [vmem:[#allocation7 + $0x4e4] sm:$0xf] %v701_v38  ;;  %704 = vst [vmem:[#allocation7 + $0x4e8] sm:$0xf] %v703_v39 }
  0xd9   :  { %706 = vst [vmem:[#allocation7 + $0x4ec] sm:$0xf] %v705_v40  ;;  %v707_v41 = vld [vmem:[%s7453_s9 + $0x4d8] sm:$0xf]  ;;  %v711_v43 = vld [vmem:[%s7453_s9 + $0x4dc] sm:$0xf] }
  0xda   :  { %v709_v42 = vld [vmem:[%s7453_s9 + $0x4f8] sm:$0xf]  ;;  %708 = vst [vmem:[#allocation7 + $0x4f0] sm:$0xf] %v707_v41  ;;  %712 = vst [vmem:[#allocation7 + $0x4f8] sm:$0xf] %v711_v43 }
  0xdb   :  { %710 = vst [vmem:[#allocation7 + $0x4f4] sm:$0xf] %v709_v42  ;;  %v713_v44 = vld [vmem:[%s7453_s9 + $0x4fc] sm:$0xf] }
  0xdc   :  { %714 = vst [vmem:[#allocation7 + $0x4fc] sm:$0xf] %v713_v44 }
  0xdd   :  { %1385 = vsyncadd [#allocation8], 20480  ;;  %v1394_v45 = vld [vmem:[%s7445_s1] sm:$0xff]  ;;  %v1395_v46 = vld [vmem:[%s7445_s1 + $0x8] sm:$0xf]  ;;  %vm1428_vm0 = vcmask 1043456  }
  0xde   :  { %v5006_v47 = vpack.c.bf16 %v1395_v46, %v1394_v45  ;;  %v1386_v48 = vld [vmem:[%s7444_s0] sm:$0xff]  ;;  %vm1403_vm1 = vcmask 97280   ;;  %vm5523_vm2 = vmmov 1   ;;  %v1387_v49 = vld [vmem:[%s7444_s0 + $0x8] sm:$0xff]  ;;  %v1587_v52 = vld [vmem:[%s7447_s3 + $0x90] sm:$0xff]  ;;  %vm2674_vm4 = vcmask 523264  }
  0xdf   :  { %vm5007_vm3 = vmpackc.low %vm1428_vm0, %vm5523_vm2  ;;  %4634 = vmatprep.mubr.msk.f32.mxu0 %vm1403_vm1, %v1386_v48  ;;  %v1585_v50 = vld [vmem:[%s7447_s3 + $0x80] sm:$0xff]  ;;  %v1586_v51 = vld [vmem:[%s7447_s3 + $0x88] sm:$0xff]  ;;  %vm2678_vm5 = vcmask 517120  }
  0xe0   :  { %5008 = vmatprep.subr.msk.bf16.mxu0 %vm5007_vm3, %v5006_v47  ;;  %v1388_v53 = vld [vmem:[%s7444_s0 + $0x10] sm:$0xff]  ;;  %v5012_v54 = vpack.c.bf16 %v1586_v51, %v1585_v50  ;;  %v1588_v55 = vld [vmem:[%s7447_s3 + $0x98] sm:$0xff]  ;;  %v1589_v57 = vld [vmem:[%s7447_s3 + $0xa0] sm:$0xff] }
  0xe1   :  { %5011 = vmatpush3.bf16.msk.msra.mxu0 %vm5007_vm3, %v5006_v47  ;;  %v5016_v56 = vpack.c.bf16 %v1588_v55, %v1587_v52  ;;  %v1590_v58 = vld [vmem:[%s7447_s3 + $0xa8] sm:$0xff]  ;;  %v1389_v59 = vld [vmem:[%s7444_s0 + $0x18] sm:$0xff]  ;;  %v1390_v60 = vld [vmem:[%s7444_s0 + $0x20] sm:$0xff] }
  0xe2   :  { %5013 = vmatprep.subr.bf16.mxu1 %v5012_v54  ;;  %v5020_v61 = vpack.c.bf16 %v1590_v58, %v1589_v57  ;;  %v1591_v62 = vld [vmem:[%s7447_s3 + $0xb0] sm:$0xff]  ;;  %v1592_v63 = vld [vmem:[%s7447_s3 + $0xb8] sm:$0xff]  ;;  %v1391_v0 = vld [vmem:[%s7444_s0 + $0x28] sm:$0xff] }
  0xe3   :  { %5015 = vmatpush3.bf16.msra.mxu1 %v5012_v54  ;;  %v1392_v1 = vld [vmem:[%s7444_s0 + $0x30] sm:$0xff]  ;;  %v5024_v2 = vpack.c.bf16 %v1592_v63, %v1591_v62  ;;  %v1393_v3 = vld [vmem:[%s7444_s0 + $0x38] sm:$0x3f]  ;;  %v1593_v4 = vld [vmem:[%s7447_s3 + $0xc0] sm:$0xff] }
  0xe4   :  { %4635 = vmatmul.mubr.msk.f32.vlgmr.msra.gmra.mrb[0].mxu0 %vm1403_vm1, %v1387_v49  ;;  %5017 = vmatprep.subr.bf16.mxu1 %v5016_v56  ;;  %v1594_v5 = vld [vmem:[%s7447_s3 + $0xc8] sm:$0xff]  ;;  %v1595_v7 = vld [vmem:[%s7447_s3 + $0xd0] sm:$0xff]  ;;  %v1596_v8 = vld [vmem:[%s7447_s3 + $0xd8] sm:$0xff] }
  0xe5   :  { %4637 = vmatprep.mubr.msk.f32.mxu0 %vm1403_vm1, %v1388_v53  ;;  %v5028_v6 = vpack.c.bf16 %v1594_v5, %v1593_v4  ;;  %v5032_v9 = vpack.c.bf16 %v1596_v8, %v1595_v7  ;;  %v1597_v10 = vld [vmem:[%s7447_s3 + $0xe0] sm:$0xff]  ;;  %v1598_v11 = vld [vmem:[%s7447_s3 + $0xe8] sm:$0xff]  ;;  %v1599_v13 = vld [vmem:[%s7447_s3 + $0xf0] sm:$0xff] }
  0xe6   :  { %v5036_v12 = vpack.c.bf16 %v1598_v11, %v1597_v10  ;;  %v1600_v14 = vld [vmem:[%s7447_s3 + $0xf8] sm:$0xff]  ;;  %v1561_v16 = vld [vmem:[%s7447_s3] sm:$0xff]  ;;  %v1562_v17 = vld [vmem:[%s7447_s3 + $0x8] sm:$0xff] }
  0xe7   :  { %5019 = vmatpush3.bf16.msra.mxu1 %v5016_v56  ;;  %v5040_v15 = vpack.c.bf16 %v1600_v14, %v1599_v13  ;;  %v5044_v18 = vpack.c.bf16 %v1562_v17, %v1561_v16  ;;  %v2026_v19 = vld [vmem:[#allocation9 + $0x80] sm:$0xff]  ;;  %v2027_v20 = vld [vmem:[#allocation9 + $0x88] sm:$0xff]  ;;  %v4253_v22 = vld [vmem:[%s7446_s2] ss:$0 sm:$0xff] }
  0xe8   :  { %4638 = vmatmul.mubr.msk.f32.gmra.mrb[2].mxu0 %vm1403_vm1, %v1389_v59  ;;  %5021 = vmatprep.subr.bf16.mxu1 %v5020_v61  ;;  %v5108_v21 = vpack.c.bf16 %v2027_v20, %v2026_v19  ;;  %v1563_v45 = vld [vmem:[%s7447_s3 + $0x10] sm:$0xff]  ;;  %v1564_v46 = vld [vmem:[%s7447_s3 + $0x18] sm:$0xff]  ;;  %v1565_v51 = vld [vmem:[%s7447_s3 + $0x20] sm:$0xff] }
  0xe9   :  { %4640 = vmatprep.mubr.msk.f32.mxu0 %vm1403_vm1, %v1390_v60  ;;  %v5048_v50 = vpack.c.bf16 %v1564_v46, %v1563_v45  ;;  %v1566_v54 = vld [vmem:[%s7447_s3 + $0x28] sm:$0xff]  ;;  %v1567_v56 = vld [vmem:[%s7447_s3 + $0x30] sm:$0xff]  ;;  %v1568_v59 = vld [vmem:[%s7447_s3 + $0x38] sm:$0xff] }
  0xea   :  { %5109 = vmatprep.subr.bf16.mxu0 %v5108_v21  ;;  %v5052_v55 = vpack.c.bf16 %v1566_v54, %v1565_v51  ;;  %v5056_v60 = vpack.c.bf16 %v1568_v59, %v1567_v56  ;;  %v1572_v4 = vld [vmem:[%s7447_s3 + $0x58] sm:$0xff]  ;;  %v1574_v7 = vld [vmem:[%s7447_s3 + $0x68] sm:$0xff]  ;;  %v2028_v45 = vld [vmem:[#allocation9 + $0x90] sm:$0xff] }
  0xeb   :  { %5023 = vmatpush3.bf16.msra.mxu1 %v5020_v61  ;;  %5111 = vmatpush3.bf16.msra.mxu0 %v5108_v21  ;;  %v1569_v61 = vld [vmem:[%s7447_s3 + $0x40] sm:$0xff]  ;;  %v1576_v10 = vld [vmem:[%s7447_s3 + $0x78] sm:$0xff]  ;;  %v1820_v13 = vld [vmem:[%s7447_s3 + $0x108] sm:$0xff] }
  0xec   :  { %4641 = vmatmul.mubr.msk.f32.gmra.mrb[4].mxu0 %vm1403_vm1, %v1391_v0  ;;  %5025 = vmatprep.subr.bf16.mxu1 %v5024_v2  ;;  %v1570_v0 = vld [vmem:[%s7447_s3 + $0x48] sm:$0xff]  ;;  %v1822_v16 = vld [vmem:[%s7447_s3 + $0x118] sm:$0xff]  ;;  %v1825_v21 = vld [vmem:[%s7447_s3 + $0x130] sm:$0xff] }
  0xed   :  { %4643 = vmatprep.mubr.msk.f32.mxu0 %vm1403_vm1, %v1392_v1  ;;  %v1824_v19 = vld [vmem:[%s7447_s3 + $0x128] sm:$0xff]  ;;  %v2032_v51 = vld [vmem:[#allocation9 + $0xb0] sm:$0xff]  ;;  %v2034_v54 = vld [vmem:[#allocation9 + $0xc0] sm:$0xff] }
  0xee   :  { %v2029_v46 = vld [vmem:[#allocation9 + $0x98] sm:$0xff] }
  0xef   :  { %5027 = vmatpush3.bf16.msra.mxu1 %v5024_v2  ;;  %v5060_v2 = vpack.c.bf16 %v1570_v0, %v1569_v61  ;;  %v2039_v61 = vld [vmem:[#allocation9 + $0xe8] sm:$0xff]  ;;  %v2041_v0 = vld [vmem:[#allocation9 + $0xf8] sm:$0xff] }
  0xf0   :  { %4644 = vmatmul.mubr.msk.f32.gmra.mrb[6].mxu0 %vm1403_vm1, %v1393_v3  ;;  %5029 = vmatprep.subr.bf16.mxu1 %v5028_v6  ;;  %v1571_v3 = vld [vmem:[%s7447_s3 + $0x50] sm:$0xff] }
  0xf1   :  { %v5064_v5 = vpack.c.bf16 %v1572_v4, %v1571_v3  ;;  %v2007_v3 = vld [vmem:[#allocation9 + $0x8] sm:$0xff] }
  0xf3   :  { %5031 = vmatpush3.bf16.msra.mxu1 %v5028_v6  ;;  %v1573_v6 = vld [vmem:[%s7447_s3 + $0x60] sm:$0xff] }
  0xf4   :  { %5033 = vmatprep.subr.bf16.mxu1 %v5032_v9  ;;  %v5068_v8 = vpack.c.bf16 %v1574_v7, %v1573_v6  ;;  %v2365_v6 = vld [vmem:[%s7451_s7 + $0x88] sm:$0xff]  ;;  %v2366_v7 = vld [vmem:[%s7451_s7 + $0x90] sm:$0xff] }
  0xf7   :  { %5035 = vmatpush3.bf16.msra.mxu1 %v5032_v9  ;;  %v1575_v9 = vld [vmem:[%s7447_s3 + $0x70] sm:$0xff] }
  0xf8   :  { %5037 = vmatprep.subr.bf16.mxu1 %v5036_v12  ;;  %v5072_v11 = vpack.c.bf16 %v1576_v10, %v1575_v9  ;;  %v2367_v9 = vld [vmem:[%s7451_s7 + $0x98] sm:$0xff] }
  0xf9   :  { %v5208_v10 = vpack.c.bf16 %v2367_v9, %v2366_v7  ;;  %v2016_v7 = vld [vmem:[#allocation9 + $0x50] sm:$0xff]  ;;  %v2018_v9 = vld [vmem:[#allocation9 + $0x60] sm:$0xff] }
  0xfb   :  { %5039 = vmatpush3.bf16.msra.mxu1 %v5036_v12  ;;  %v1819_v12 = vld [vmem:[%s7447_s3 + $0x100] sm:$0xff] }
  0xfc   :  { %5041 = vmatprep.subr.bf16.mxu1 %v5040_v15  ;;  %v5076_v14 = vpack.c.bf16 %v1820_v13, %v1819_v12  ;;  %v2369_v12 = vld [vmem:[%s7451_s7 + $0xa8] sm:$0xff] }
  0xff   :  { %5043 = vmatpush3.bf16.msra.mxu1 %v5040_v15  ;;  %v1821_v15 = vld [vmem:[%s7447_s3 + $0x110] sm:$0xff] }
 0x100   :  { %5045 = vmatprep.subr.bf16.mxu1 %v5044_v18  ;;  %v5080_v17 = vpack.c.bf16 %v1822_v16, %v1821_v15  ;;  %v2371_v15 = vld [vmem:[%s7451_s7 + $0xb8] sm:$0xff] }
 0x1b7   :  { %v4636_v23 = vpop.f32.mrb[0].mxu0 }
 0x1b8   :  { %v6606_v24 = vadd.f32 %v4636_v23, %v4253_v22  ;;  %v1498_v25 = vpop.f32.mrb[1].mxu0 }
 0x1b9   :  { %v6608_v26 = vadd.f32 %v4253_v22, %v1498_v25  ;;  %v1828_v25 = vld [vmem:[%s7447_s3 + $0x148] sm:$0xff] }
 0x1ba   :  { %v1538_v27 = vmax.f32 %v6606_v24, 0.0  ;;  %v1827_v24 = vld [vmem:[%s7447_s3 + $0x140] sm:$0xff] }
 0x1bb   :  { %v1537_v28 = vmax.f32 %v6608_v26, 0.0  ;;  %v4639_v29 = vpop.f32.mrb[2].mxu0  ;;  %v5092_v26 = vpack.c.bf16 %v1828_v25, %v1827_v24 }
 0x1bc   :  { %1546 = vst [vmem:[#allocation2 + $0x8] sm:$0xff] %v1538_v27  ;;  %v6614_v30 = vadd.f32 %v4639_v29, %v4253_v22  ;;  %v1508_v31 = vpop.f32.mrb[3].mxu0  ;;  %v1830_v29 = vld [vmem:[%s7447_s3 + $0x158] sm:$0xff] }
 0x1bd   :  { %1545 = vst [vmem:[#allocation2] sm:$0xff] %v1537_v28  ;;  %v6618_v32 = vadd.f32 %v4253_v22, %v1508_v31 }
 0x1be   :  { %v1540_v33 = vmax.f32 %v6614_v30, 0.0 }
 0x1bf   :  { %v1539_v34 = vmax.f32 %v6618_v32, 0.0  ;;  %v4642_v35 = vpop.f32.mrb[4].mxu0  ;;  %v1831_v32 = vld [vmem:[%s7447_s3 + $0x160] sm:$0xff] }
 0x1c0   :  { %1548 = vst [vmem:[#allocation2 + $0x18] sm:$0xff] %v1540_v33  ;;  %v6624_v36 = vadd.f32 %v4642_v35, %v4253_v22  ;;  %v1518_v37 = vpop.f32.mrb[5].mxu0  ;;  %v1833_v35 = vld [vmem:[%s7447_s3 + $0x170] sm:$0xff] }
 0x1c1   :  { %1547 = vst [vmem:[#allocation2 + $0x10] sm:$0xff] %v1539_v34  ;;  %v6628_v38 = vadd.f32 %v4253_v22, %v1518_v37 }
 0x1c2   :  { %v1542_v39 = vmax.f32 %v6624_v36, 0.0  ;;  %v1834_v36 = vld [vmem:[%s7447_s3 + $0x178] sm:$0xff] }
 0x1c3   :  { %v1541_v40 = vmax.f32 %v6628_v38, 0.0  ;;  %v4645_v41 = vpop.f32.mrb[6].mxu0  ;;  %v5104_v37 = vpack.c.bf16 %v1834_v36, %v1833_v35 }
 0x1c4   :  { %1550 = vst [vmem:[#allocation2 + $0x28] sm:$0xff] %v1542_v39  ;;  %v1534_v42 = vadd.f32 %v4645_v41, %v4253_v22  ;;  %v1528_v43 = vpop.f32.mrb[7].mxu0  ;;  %v1577_v44 = vld [vmem:[#allocation2 + $0x1] sm:$0xff] }
 0x1c5   :  { %1549 = vst [vmem:[#allocation2 + $0x20] sm:$0xff] %v1541_v40  ;;  %v6642_v47 = vadd.f32 %v4253_v22, %v1528_v43  ;;  %4678 = vmatprep.mubr.f32.mxu1 %v1577_v44  ;;  %v1826_v22 = vld [vmem:[%s7447_s3 + $0x138] sm:$0xff]  ;;  %v1811_v30 = vld [vmem:[#allocation2 + $0x2] sm:$0xff] }
 0x1c6   :  { %v1544_v48 = vmax.f32 %v1534_v42, 0.0  ;;  %v5088_v23 = vpack.c.bf16 %v1826_v22, %v1825_v21 }
 0x1c7   :  { %v1543_v49 = vmax.f32 %v6642_v47, 0.0  ;;  %v5112_v47 = vpack.c.bf16 %v2029_v46, %v2028_v45 }
 0x1c8   :  { %1552 = vst [vmem:[#allocation2 + $0x38] sm:$0x3f] %v1544_v48  ;;  %v1578_v52 = vld [vmem:[#allocation2 + $0x9] sm:$0xff]  ;;  %v1579_v53 = vld [vmem:[#allocation2 + $0x11] sm:$0xff] }
 0x1c9   :  { %1551 = vst [vmem:[#allocation2 + $0x30] sm:$0xff] %v1543_v49  ;;  %4679 = vmatmul.mubr.f32.vlgmr.msra.gmra.mrb[0].mxu1 %v1578_v52  ;;  %v1812_v38 = vld [vmem:[#allocation2 + $0xa] sm:$0xff]  ;;  %5113 = vmatprep.subr.bf16.mxu0 %v5112_v47 }
 0x1ca   :  { %5047 = vmatpush3.bf16.msra.mxu1 %v5044_v18  ;;  %4681 = vmatprep.mubr.f32.mxu1 %v1579_v53  ;;  %v1823_v18 = vld [vmem:[%s7447_s3 + $0x120] sm:$0xff]  ;;  %v2030_v48 = vld [vmem:[#allocation9 + $0xa0] sm:$0xff]  ;;  %v2033_v52 = vld [vmem:[#allocation9 + $0xb8] sm:$0xff] }
 0x1cb   :  { %5049 = vmatprep.subr.bf16.mxu1 %v5048_v50  ;;  %v5084_v20 = vpack.c.bf16 %v1824_v19, %v1823_v18  ;;  %5115 = vmatpush3.bf16.msra.mxu0 %v5112_v47  ;;  %v5120_v53 = vpack.c.bf16 %v2033_v52, %v2032_v51 }
 0x1cc   :  { %v1580_v57 = vld [vmem:[#allocation2 + $0x19] sm:$0xff]  ;;  %v1581_v58 = vld [vmem:[#allocation2 + $0x21] sm:$0xff] }
 0x1cd   :  { %4682 = vmatmul.mubr.f32.gmra.mrb[2].mxu1 %v1580_v57  ;;  %v1815_v41 = vld [vmem:[#allocation2 + $0x22] sm:$0xff] }
 0x1ce   :  { %5051 = vmatpush3.bf16.msra.mxu1 %v5048_v50  ;;  %4684 = vmatprep.mubr.f32.mxu1 %v1581_v58  ;;  %v2036_v57 = vld [vmem:[#allocation9 + $0xd0] sm:$0xff]  ;;  %v2037_v58 = vld [vmem:[#allocation9 + $0xd8] sm:$0xff] }
 0x1cf   :  { %5053 = vmatprep.subr.bf16.mxu1 %v5052_v55  ;;  %v1584_v1 = vld [vmem:[#allocation2 + $0x39] sm:$0xf]  ;;  %v5128_v59 = vpack.c.bf16 %v2037_v58, %v2036_v57 }
 0x1d0   :  { %v1582_v62 = vld [vmem:[#allocation2 + $0x29] sm:$0xff]  ;;  %v1583_v63 = vld [vmem:[#allocation2 + $0x31] sm:$0xff]  ;;  %v1818_v44 = vld [vmem:[#allocation2 + $0x3a] sm:$0xf] }
 0x1d1   :  { %4685 = vmatmul.mubr.f32.gmra.mrb[4].mxu1 %v1582_v62  ;;  %v1816_v42 = vld [vmem:[#allocation2 + $0x2a] sm:$0xff]  ;;  %v1817_v43 = vld [vmem:[#allocation2 + $0x32] sm:$0xff] }
 0x1d2   :  { %5055 = vmatpush3.bf16.msra.mxu1 %v5052_v55  ;;  %4687 = vmatprep.mubr.f32.mxu1 %v1583_v63  ;;  %v2035_v55 = vld [vmem:[#allocation9 + $0xc8] sm:$0xff]  ;;  %v2040_v63 = vld [vmem:[#allocation9 + $0xf0] sm:$0xff] }
 0x1d3   :  { %5057 = vmatprep.subr.bf16.mxu1 %v5056_v60  ;;  %v5124_v56 = vpack.c.bf16 %v2035_v55, %v2034_v54  ;;  %v2008_v55 = vld [vmem:[#allocation9 + $0x10] sm:$0xff] }
 0x1d5   :  { %4688 = vmatmul.mubr.f32.gmra.mrb[6].mxu1 %v1584_v1  ;;  %v5136_v1 = vpack.c.bf16 %v2041_v0, %v2040_v63 }
 0x1d6   :  { %5059 = vmatpush3.bf16.msra.mxu1 %v5056_v60  ;;  %4722 = vmatprep.mubr.f32.mxu1 %v1537_v28  ;;  %v1829_v28 = vld [vmem:[%s7447_s3 + $0x150] sm:$0xff] }
 0x1d7   :  { %5061 = vmatprep.subr.bf16.mxu1 %v5060_v2  ;;  %v5096_v31 = vpack.c.bf16 %v1830_v29, %v1829_v28  ;;  %v2038_v60 = vld [vmem:[#allocation9 + $0xe0] sm:$0xff] }
 0x1d8   :  { %v5132_v62 = vpack.c.bf16 %v2039_v61, %v2038_v60  ;;  %v2011_v60 = vld [vmem:[#allocation9 + $0x28] sm:$0xff] }
 0x1da   :  { %5063 = vmatpush3.bf16.msra.mxu1 %v5060_v2  ;;  %v2006_v2 = vld [vmem:[#allocation9] sm:$0xff] }
 0x1db   :  { %5065 = vmatprep.subr.bf16.mxu1 %v5064_v5  ;;  %v6745_v4 = vpack.c.bf16 %v2007_v3, %v2006_v2  ;;  %v2014_v3 = vld [vmem:[#allocation9 + $0x40] sm:$0xff] }
 0x1de   :  { %5067 = vmatpush3.bf16.msra.mxu1 %v5064_v5  ;;  %v2364_v5 = vld [vmem:[%s7451_s7 + $0x80] sm:$0xff] }
 0x1df   :  { %5069 = vmatprep.subr.bf16.mxu1 %v5068_v8 }
 0x1e2   :  { %5071 = vmatpush3.bf16.msra.mxu1 %v5068_v8  ;;  %v5204_v8 = vpack.c.bf16 %v2365_v6, %v2364_v5  ;;  %v2015_v5 = vld [vmem:[#allocation9 + $0x48] sm:$0xff] }
 0x1e3   :  { %5073 = vmatprep.subr.bf16.mxu1 %v5072_v11  ;;  %v5156_v6 = vpack.c.bf16 %v2015_v5, %v2014_v3 }
 0x1e6   :  { %5075 = vmatpush3.bf16.msra.mxu1 %v5072_v11  ;;  %v2368_v11 = vld [vmem:[%s7451_s7 + $0xa0] sm:$0xff] }
 0x1e7   :  { %5077 = vmatprep.subr.bf16.mxu1 %v5076_v14  ;;  %v5212_v13 = vpack.c.bf16 %v2369_v12, %v2368_v11  ;;  %v2020_v12 = vld [vmem:[#allocation9 + $0x70] sm:$0xff] }
 0x1e9   :  { %4723 = vmatmul.mubr.f32.vlgmr.msra.gmra.mrb[0].mxu1 %v1538_v27  ;;  %v1560_v27 = vld [vmem:[#allocation2 + $0x38] sm:$0xf] }
 0x1ea   :  { %4725 = vmatprep.mubr.f32.mxu1 %v1539_v34  ;;  %5079 = vmatpush3.bf16.msra.mxu1 %v5076_v14  ;;  %v2370_v14 = vld [vmem:[%s7451_s7 + $0xb0] sm:$0xff] }
 0x1eb   :  { %5081 = vmatprep.subr.bf16.mxu1 %v5080_v17  ;;  %v5216_v16 = vpack.c.bf16 %v2371_v15, %v2370_v14  ;;  %v2216_v15 = vld [vmem:[#allocation9 + $0x100] sm:$0xff] }
 0x1ed   :  { %4726 = vmatmul.mubr.f32.gmra.mrb[2].mxu1 %v1540_v33  ;;  %v1832_v33 = vld [vmem:[%s7447_s3 + $0x168] sm:$0xff] }
 0x1ee   :  { %4728 = vmatprep.mubr.f32.mxu1 %v1541_v40  ;;  %5083 = vmatpush3.bf16.msra.mxu1 %v5080_v17  ;;  %v5100_v34 = vpack.c.bf16 %v1832_v33, %v1831_v32  ;;  %v1814_v40 = vld [vmem:[#allocation2 + $0x1a] sm:$0xff] }
 0x1ef   :  { %5085 = vmatprep.subr.bf16.mxu1 %v5084_v20  ;;  %v4263_v17 = vld [vmem:[%s7448_s4] ss:$0 sm:$0xff] }
 0x1f1   :  { %4729 = vmatmul.mubr.f32.gmra.mrb[4].mxu1 %v1542_v39  ;;  %v1813_v39 = vld [vmem:[#allocation2 + $0x12] sm:$0xff] }
 0x1f2   :  { %4731 = vmatprep.mubr.f32.mxu1 %v1543_v49  ;;  %5087 = vmatpush3.bf16.msra.mxu1 %v5084_v20  ;;  %v2031_v49 = vld [vmem:[#allocation9 + $0xa8] sm:$0xff] }
 0x1f3   :  { %5089 = vmatprep.subr.bf16.mxu1 %v5088_v23  ;;  %v5116_v50 = vpack.c.bf16 %v2031_v49, %v2030_v48 }
 0x1f5   :  { %4732 = vmatmul.mubr.f32.gmra.mrb[6].mxu1 %v1560_v27  ;;  %5117 = vmatprep.subr.bf16.mxu0 %v5116_v50 }
 0x1f6   :  { %5091 = vmatpush3.bf16.msra.mxu1 %v5088_v23  ;;  %4766 = vmatprep.mubr.f32.mxu1 %v1811_v30 }
 0x1f7   :  { %5093 = vmatprep.subr.bf16.mxu1 %v5092_v26  ;;  %5119 = vmatpush3.bf16.msra.mxu0 %v5116_v50 }
 0x1f8   :  { %5121 = vmatprep.subr.bf16.mxu0 %v5120_v53 }
 0x1fa   :  { %5095 = vmatpush3.bf16.msra.mxu1 %v5092_v26 }
 0x1fb   :  { %5097 = vmatprep.subr.bf16.mxu1 %v5096_v31  ;;  %5123 = vmatpush3.bf16.msra.mxu0 %v5120_v53 }
 0x1fc   :  { %5125 = vmatprep.subr.bf16.mxu0 %v5124_v56 }
 0x1fe   :  { %5099 = vmatpush3.bf16.msra.mxu1 %v5096_v31 }
 0x1ff   :  { %5101 = vmatprep.subr.bf16.mxu1 %v5100_v34  ;;  %5127 = vmatpush3.bf16.msra.mxu0 %v5124_v56  ;;  %v2009_v56 = vld [vmem:[#allocation9 + $0x18] sm:$0xff] }
 0x200   :  { %5129 = vmatprep.subr.bf16.mxu0 %v5128_v59  ;;  %v5144_v57 = vpack.c.bf16 %v2009_v56, %v2008_v55  ;;  %v2344_v56 = vld [vmem:[%s7451_s7] sm:$0xff] }
 0x202   :  { %5103 = vmatpush3.bf16.msra.mxu1 %v5100_v34 }
 0x203   :  { %5105 = vmatprep.subr.bf16.mxu1 %v5104_v37  ;;  %5131 = vmatpush3.bf16.msra.mxu0 %v5128_v59  ;;  %v2010_v59 = vld [vmem:[#allocation9 + $0x20] sm:$0xff] }
 0x204   :  { %5133 = vmatprep.subr.bf16.mxu0 %v5132_v62  ;;  %v5148_v61 = vpack.c.bf16 %v2011_v60, %v2010_v59  ;;  %v4264_v59 = vld [vmem:[%s7450_s6] ss:$0 sm:$0xff] }
 0x206   :  { %5107 = vmatpush3.bf16.msra.mxu1 %v5104_v37 }
 0x207   :  { %5135 = vmatpush3.bf16.msra.mxu0 %v5132_v62  ;;  %5205 = vmatprep.subr.bf16.mxu1 %v5204_v8  ;;  %v2012_v62 = vld [vmem:[#allocation9 + $0x30] sm:$0xff] }
 0x208   :  { %5137 = vmatprep.subr.bf16.mxu0 %v5136_v1 }
 0x209   :  { %4767 = vmatmul.mubr.f32.vlgmr.msra.gmra.mrb[0].mxu1 %v1812_v38 }
 0x20a   :  { %4769 = vmatprep.mubr.f32.mxu1 %v1813_v39  ;;  %5207 = vmatpush3.bf16.msra.mxu1 %v5204_v8  ;;  %v2017_v8 = vld [vmem:[#allocation9 + $0x58] sm:$0xff] }
 0x20b   :  { %5139 = vmatpush3.bf16.msra.mxu0 %v5136_v1  ;;  %5209 = vmatprep.subr.bf16.mxu1 %v5208_v10  ;;  %v2013_v1 = vld [vmem:[#allocation9 + $0x38] sm:$0xff] }
 0x20c   :  { %5141 = vmatprep.subr.bf16.mxu0 %v6745_v4  ;;  %v5152_v2 = vpack.c.bf16 %v2013_v1, %v2012_v62 }
 0x20d   :  { %4770 = vmatmul.mubr.f32.gmra.mrb[2].mxu1 %v1814_v40 }
 0x20e   :  { %4772 = vmatprep.mubr.f32.mxu1 %v1815_v41  ;;  %5211 = vmatpush3.bf16.msra.mxu1 %v5208_v10  ;;  %v2019_v10 = vld [vmem:[#allocation9 + $0x68] sm:$0xff] }
 0x20f   :  { %5213 = vmatprep.subr.bf16.mxu1 %v5212_v13  ;;  %v5164_v11 = vpack.c.bf16 %v2019_v10, %v2018_v9  ;;  %v2346_v9 = vld [vmem:[%s7451_s7 + $0x10] sm:$0xff]  ;;  %v2347_v10 = vld [vmem:[%s7451_s7 + $0x18] sm:$0xff] }
 0x211   :  { %4773 = vmatmul.mubr.f32.gmra.mrb[4].mxu1 %v1816_v42 }
 0x212   :  { %4775 = vmatprep.mubr.f32.mxu1 %v1817_v43  ;;  %5215 = vmatpush3.bf16.msra.mxu1 %v5212_v13  ;;  %v2021_v13 = vld [vmem:[#allocation9 + $0x78] sm:$0xff] }
 0x213   :  { %5217 = vmatprep.subr.bf16.mxu1 %v5216_v16  ;;  %v5168_v14 = vpack.c.bf16 %v2021_v13, %v2020_v12  ;;  %v2348_v12 = vld [vmem:[%s7451_s7 + $0x20] sm:$0xff] }
 0x215   :  { %4776 = vmatmul.mubr.f32.gmra.mrb[6].mxu1 %v1818_v44 }
 0x216   :  { %5219 = vmatpush3.bf16.msra.mxu1 %v5216_v16  ;;  %v2217_v16 = vld [vmem:[#allocation9 + $0x108] sm:$0xff] }
 0x2dc   :  { %v4768_v18 = vpop.f32.mrb[0].mxu1 }
 0x2dd   :  { %v1956_v19 = vadd.f32 %v4768_v18, %v4263_v17  ;;  %v1901_v20 = vpop.f32.mrb[1].mxu1  ;;  %v2218_v18 = vld [vmem:[#allocation9 + $0x110] sm:$0xff] }
 0x2de   :  { %v1955_v21 = vadd.f32 %v4263_v17, %v1901_v20 }
 0x2df   :  { %v1964_v22 = vmax.f32 %v1956_v19, 0.0  ;;  %v2219_v19 = vld [vmem:[#allocation9 + $0x118] sm:$0xff] }
 0x2e0   :  { %v1963_v23 = vmax.f32 %v1955_v21, 0.0  ;;  %v4771_v24 = vpop.f32.mrb[2].mxu1  ;;  %v5176_v20 = vpack.c.bf16 %v2219_v19, %v2218_v18  ;;  %v2220_v21 = vld [vmem:[#allocation9 + $0x120] sm:$0xff]  ;;  %v2351_v19 = vld [vmem:[%s7451_s7 + $0x38] sm:$0xff] }
 0x2e1   :  { %1972 = vst [vmem:[#allocation3 + $0x8] sm:$0xff] %v1964_v22  ;;  %v1958_v25 = vadd.f32 %v4771_v24, %v4263_v17  ;;  %v1911_v26 = vpop.f32.mrb[3].mxu1  ;;  %v2221_v22 = vld [vmem:[#allocation9 + $0x128] sm:$0xff]  ;;  %v2350_v18 = vld [vmem:[%s7451_s7 + $0x30] sm:$0xff] }
 0x2e2   :  { %1971 = vst [vmem:[#allocation3] sm:$0xff] %v1963_v23  ;;  %v1957_v27 = vadd.f32 %v4263_v17, %v1911_v26  ;;  %v5180_v23 = vpack.c.bf16 %v2221_v22, %v2220_v21  ;;  %v2223_v26 = vld [vmem:[#allocation9 + $0x138] sm:$0xff]  ;;  %v2352_v21 = vld [vmem:[%s7451_s7 + $0x40] sm:$0xff] }
 0x2e3   :  { %v1966_v28 = vmax.f32 %v1958_v25, 0.0  ;;  %v2222_v25 = vld [vmem:[#allocation9 + $0x130] sm:$0xff]  ;;  %v2353_v22 = vld [vmem:[%s7451_s7 + $0x48] sm:$0xff] }
 0x2e4   :  { %v1965_v29 = vmax.f32 %v1957_v27, 0.0  ;;  %v4774_v30 = vpop.f32.mrb[4].mxu1 }
 0x2e5   :  { %1974 = vst [vmem:[#allocation3 + $0x18] sm:$0xff] %v1966_v28  ;;  %v1960_v31 = vadd.f32 %v4774_v30, %v4263_v17  ;;  %v1921_v32 = vpop.f32.mrb[5].mxu1  ;;  %v5184_v28 = vpack.c.bf16 %v2223_v26, %v2222_v25  ;;  %v2225_v30 = vld [vmem:[#allocation9 + $0x148] sm:$0xff] }
 0x2e6   :  { %1973 = vst [vmem:[#allocation3 + $0x10] sm:$0xff] %v1965_v29  ;;  %v1959_v33 = vadd.f32 %v4263_v17, %v1921_v32  ;;  %v2224_v29 = vld [vmem:[#allocation9 + $0x140] sm:$0xff]  ;;  %v2226_v32 = vld [vmem:[#allocation9 + $0x150] sm:$0xff]  ;;  %v2355_v25 = vld [vmem:[%s7451_s7 + $0x58] sm:$0xff] }
 0x2e7   :  { %v1968_v34 = vmax.f32 %v1960_v31, 0.0  ;;  %v5188_v31 = vpack.c.bf16 %v2225_v30, %v2224_v29  ;;  %v2358_v30 = vld [vmem:[%s7451_s7 + $0x70] sm:$0xff] }
 0x2e8   :  { %v1967_v35 = vmax.f32 %v1959_v33, 0.0  ;;  %v4777_v36 = vpop.f32.mrb[6].mxu1  ;;  %v2227_v33 = vld [vmem:[#allocation9 + $0x158] sm:$0xff] }
 0x2e9   :  { %v1979_v37 = vld [vmem:[#allocation3] ss:$2 sm:$0xff]  ;;  %v1987_v38 = vld [vmem:[#allocation3 + $0x1] ss:$2 sm:$0xff]  ;;  %1976 = vst [vmem:[#allocation3 + $0x28] sm:$0xff] %v1968_v34  ;;  %v1962_v39 = vadd.f32 %v4777_v36, %v4263_v17  ;;  %v1931_v40 = vpop.f32.mrb[7].mxu1  ;;  %v5192_v34 = vpack.c.bf16 %v2227_v33, %v2226_v32 }
 0x2ea   :  { %1975 = vst [vmem:[#allocation3 + $0x20] sm:$0xff] %v1967_v35  ;;  %v1961_v41 = vadd.f32 %v4263_v17, %v1931_v40  ;;  %v1994_v42 = vmax.f32 %v1979_v37, %v1987_v38  ;;  %v5172_v17 = vpack.c.bf16 %v2217_v16, %v2216_v15  ;;  %v2228_v35 = vld [vmem:[#allocation9 + $0x160] sm:$0xff]  ;;  %v2229_v36 = vld [vmem:[#allocation9 + $0x168] sm:$0xff]  ;;  %v2230_v38 = vld [vmem:[#allocation9 + $0x170] sm:$0xff] }
 0x2eb   :  { %v1970_v43 = vmax.f32 %v1962_v39, 0.0  ;;  %v5196_v37 = vpack.c.bf16 %v2229_v36, %v2228_v35  ;;  %v2231_v39 = vld [vmem:[#allocation9 + $0x178] sm:$0xff]  ;;  %v2554_v33 = vld [vmem:[%s7451_s7 + $0x100] sm:$0xff]  ;;  %v2556_v36 = vld [vmem:[%s7451_s7 + $0x110] sm:$0xff] }
 0x2ec   :  { %v1969_v44 = vmax.f32 %v1961_v41, 0.0  ;;  %1998 = vst [vmem:[#allocation4] sm:$0xff] %v1994_v42  ;;  %v5200_v40 = vpack.c.bf16 %v2231_v39, %v2230_v38  ;;  %v2349_v15 = vld [vmem:[%s7451_s7 + $0x28] sm:$0xff]  ;;  %v2558_v39 = vld [vmem:[%s7451_s7 + $0x120] sm:$0xff] }
 0x2ed   :  { %v1981_v45 = vld [vmem:[#allocation3 + $0x10] ss:$2 sm:$0xff]  ;;  %v1989_v46 = vld [vmem:[#allocation3 + $0x11] ss:$2 sm:$0xff]  ;;  %1978 = vst [vmem:[#allocation3 + $0x38] sm:$0xf] %v1970_v43  ;;  %v5244_v16 = vpack.c.bf16 %v2349_v15, %v2348_v12 }
 0x2ee   :  { %1977 = vst [vmem:[#allocation3 + $0x30] sm:$0xff] %v1969_v44  ;;  %v6775_v47 = vmax.f32 %v1981_v45, %v1989_v46  ;;  %v2372_v44 = vld [vmem:[%s7451_s7 + $0xc0] sm:$0xff]  ;;  %v2373_v45 = vld [vmem:[%s7451_s7 + $0xc8] sm:$0xff] }
 0x2ef   :  { %v5220_v46 = vpack.c.bf16 %v2373_v45, %v2372_v44  ;;  %v2561_v44 = vld [vmem:[%s7451_s7 + $0x138] sm:$0xff] }
 0x2f0   :  { %1999 = vst [vmem:[#allocation4 + $0x8] sm:$0xff] %v6775_v47 }
 0x2f1   :  { %v1983_v48 = vld [vmem:[#allocation3 + $0x20] ss:$2 sm:$0xff]  ;;  %v1991_v49 = vld [vmem:[#allocation3 + $0x21] ss:$2 sm:$0xff]  ;;  %5221 = vmatprep.subr.bf16.mxu1 %v5220_v46 }
 0x2f2   :  { %v1996_v50 = vmax.f32 %v1983_v48, %v1991_v49  ;;  %5223 = vmatpush3.bf16.msra.mxu1 %v5220_v46  ;;  %v2375_v48 = vld [vmem:[%s7451_s7 + $0xd8] sm:$0xff] }
 0x2f4   :  { %2000 = vst [vmem:[#allocation4 + $0x10] sm:$0xff] %v1996_v50 }
 0x2f5   :  { %v1985_v51 = vld [vmem:[#allocation3 + $0x30] ss:$2 sm:$0x3f]  ;;  %v1993_v52 = vld [vmem:[#allocation3 + $0x31] ss:$2 sm:$0x3f] }
 0x2f6   :  { %v1997_v53 = vmax.f32 %v1985_v51, %v1993_v52  ;;  %v2377_v51 = vld [vmem:[%s7451_s7 + $0xe8] sm:$0xff] }
 0x2f7   :  { %v2022_v54 = vld [vmem:[#allocation4 + $0x1] sm:$0xff] }
 0x2f8   :  { %4810 = vmatprep.mubr.f32.mxu0 %v2022_v54  ;;  %2001 = vst [vmem:[#allocation4 + $0x18] sm:$0x3f] %v1997_v53  ;;  %v2212_v27 = vld [vmem:[#allocation4 + $0x2] sm:$0xff]  ;;  %v2378_v53 = vld [vmem:[%s7451_s7 + $0xf0] sm:$0xff]  ;;  %v2379_v54 = vld [vmem:[%s7451_s7 + $0xf8] sm:$0xff] }
 0x2f9   :  { %v5232_v55 = vpack.c.bf16 %v2379_v54, %v2378_v53  ;;  %v2566_v53 = vld [vmem:[%s7451_s7 + $0x160] sm:$0xff]  ;;  %v2567_v54 = vld [vmem:[%s7451_s7 + $0x168] sm:$0xff] }
 0x2fb   :  { %v2023_v58 = vld [vmem:[#allocation4 + $0x9] sm:$0xff] }
 0x2fc   :  { %4811 = vmatmul.mubr.f32.vlgmr.msra.gmra.mrb[8].mxu0 %v2023_v58  ;;  %v2213_v41 = vld [vmem:[#allocation4 + $0xa] sm:$0xff] }
 0x2fd   :  { %5143 = vmatpush3.bf16.msra.mxu0 %v6745_v4  ;;  %v5160_v4 = vpack.c.bf16 %v2017_v8, %v2016_v7 }
 0x2fe   :  { %5145 = vmatprep.subr.bf16.mxu0 %v5144_v57 }
 0x2ff   :  { %v2024_v63 = vld [vmem:[#allocation4 + $0x11] sm:$0xff]  ;;  %v2025_v0 = vld [vmem:[#allocation4 + $0x19] sm:$0xf] }
 0x300   :  { %4813 = vmatprep.mubr.f32.mxu0 %v2024_v63  ;;  %v2005_v24 = vld [vmem:[#allocation4 + $0x18] sm:$0xf] }
 0x301   :  { %5147 = vmatpush3.bf16.msra.mxu0 %v5144_v57  ;;  %v2215_v43 = vld [vmem:[#allocation4 + $0x1a] sm:$0xf]  ;;  %v2345_v57 = vld [vmem:[%s7451_s7 + $0x8] sm:$0xff] }
 0x302   :  { %4814 = vmatmul.mubr.f32.gmra.mrb[10].mxu0 %v2025_v0  ;;  %5149 = vmatprep.subr.bf16.mxu0 %v5148_v61  ;;  %v5236_v58 = vpack.c.bf16 %v2345_v57, %v2344_v56  ;;  %v2568_v56 = vld [vmem:[%s7451_s7 + $0x170] sm:$0xff]  ;;  %v2569_v57 = vld [vmem:[%s7451_s7 + $0x178] sm:$0xff] }
 0x303   :  { %4848 = vmatprep.mubr.f32.mxu0 %v1994_v42  ;;  %v2214_v42 = vld [vmem:[#allocation4 + $0x12] sm:$0xff] }
 0x305   :  { %5151 = vmatpush3.bf16.msra.mxu0 %v5148_v61 }
 0x306   :  { %5153 = vmatprep.subr.bf16.mxu0 %v5152_v2 }
 0x309   :  { %5155 = vmatpush3.bf16.msra.mxu0 %v5152_v2 }
 0x30a   :  { %5157 = vmatprep.subr.bf16.mxu0 %v5156_v6 }
 0x30d   :  { %5159 = vmatpush3.bf16.msra.mxu0 %v5156_v6 }
 0x30e   :  { %5161 = vmatprep.subr.bf16.mxu0 %v5160_v4 }
 0x311   :  { %5163 = vmatpush3.bf16.msra.mxu0 %v5160_v4 }
 0x312   :  { %5165 = vmatprep.subr.bf16.mxu0 %v5164_v11 }
 0x315   :  { %5167 = vmatpush3.bf16.msra.mxu0 %v5164_v11  ;;  %v5240_v11 = vpack.c.bf16 %v2347_v10, %v2346_v9 }
 0x316   :  { %5169 = vmatprep.subr.bf16.mxu0 %v5168_v14 }
 0x319   :  { %5171 = vmatpush3.bf16.msra.mxu0 %v5168_v14 }
 0x31a   :  { %5173 = vmatprep.subr.bf16.mxu0 %v5172_v17 }
 0x31c   :  { %4849 = vmatmul.mubr.f32.vlgmr.msra.gmra.mrb[8].mxu0 %v6775_v47  ;;  %v2374_v47 = vld [vmem:[%s7451_s7 + $0xd0] sm:$0xff] }
 0x31d   :  { %4851 = vmatprep.mubr.f32.mxu0 %v1996_v50  ;;  %5175 = vmatpush3.bf16.msra.mxu0 %v5172_v17  ;;  %v5224_v49 = vpack.c.bf16 %v2375_v48, %v2374_v47  ;;  %v2376_v50 = vld [vmem:[%s7451_s7 + $0xe0] sm:$0xff]  ;;  %v2563_v48 = vld [vmem:[%s7451_s7 + $0x148] sm:$0xff] }
 0x31e   :  { %5177 = vmatprep.subr.bf16.mxu0 %v5176_v20  ;;  %v5228_v52 = vpack.c.bf16 %v2377_v51, %v2376_v50  ;;  %v2562_v47 = vld [vmem:[%s7451_s7 + $0x140] sm:$0xff]  ;;  %v2564_v50 = vld [vmem:[%s7451_s7 + $0x150] sm:$0xff]  ;;  %v2565_v51 = vld [vmem:[%s7451_s7 + $0x158] sm:$0xff] }
 0x31f   :  { %5225 = vmatprep.subr.bf16.mxu1 %v5224_v49 }
 0x320   :  { %4852 = vmatmul.mubr.f32.gmra.mrb[10].mxu0 %v2005_v24  ;;  %5227 = vmatpush3.bf16.msra.mxu1 %v5224_v49  ;;  %v2354_v24 = vld [vmem:[%s7451_s7 + $0x50] sm:$0xff]  ;;  %v5284_v49 = vpack.c.bf16 %v2563_v48, %v2562_v47 }
 0x321   :  { %5179 = vmatpush3.bf16.msra.mxu0 %v5176_v20  ;;  %4886 = vmatprep.mubr.f32.mxu0 %v2212_v27  ;;  %v5248_v20 = vpack.c.bf16 %v2351_v19, %v2350_v18  ;;  %v5256_v26 = vpack.c.bf16 %v2355_v25, %v2354_v24  ;;  %v2356_v27 = vld [vmem:[%s7451_s7 + $0x60] sm:$0xff] }
 0x322   :  { %5181 = vmatprep.subr.bf16.mxu0 %v5180_v23  ;;  %5229 = vmatprep.subr.bf16.mxu1 %v5228_v52 }
 0x324   :  { %5231 = vmatpush3.bf16.msra.mxu1 %v5228_v52  ;;  %v5288_v52 = vpack.c.bf16 %v2565_v51, %v2564_v50 }
 0x325   :  { %5183 = vmatpush3.bf16.msra.mxu0 %v5180_v23  ;;  %5233 = vmatprep.subr.bf16.mxu1 %v5232_v55  ;;  %v5252_v23 = vpack.c.bf16 %v2353_v22, %v2352_v21 }
 0x326   :  { %5185 = vmatprep.subr.bf16.mxu0 %v5184_v28 }
 0x328   :  { %5235 = vmatpush3.bf16.msra.mxu1 %v5232_v55  ;;  %v5292_v55 = vpack.c.bf16 %v2567_v54, %v2566_v53 }
 0x329   :  { %5187 = vmatpush3.bf16.msra.mxu0 %v5184_v28  ;;  %5237 = vmatprep.subr.bf16.mxu1 %v5236_v58  ;;  %v2357_v28 = vld [vmem:[%s7451_s7 + $0x68] sm:$0xff] }
 0x32a   :  { %5189 = vmatprep.subr.bf16.mxu0 %v5188_v31  ;;  %v5260_v29 = vpack.c.bf16 %v2357_v28, %v2356_v27 }
 0x32d   :  { %5191 = vmatpush3.bf16.msra.mxu0 %v5188_v31  ;;  %v2359_v31 = vld [vmem:[%s7451_s7 + $0x78] sm:$0xff] }
 0x32e   :  { %5193 = vmatprep.subr.bf16.mxu0 %v5192_v34  ;;  %v5264_v32 = vpack.c.bf16 %v2359_v31, %v2358_v30 }
 0x331   :  { %5195 = vmatpush3.bf16.msra.mxu0 %v5192_v34  ;;  %v2555_v34 = vld [vmem:[%s7451_s7 + $0x108] sm:$0xff] }
 0x332   :  { %5197 = vmatprep.subr.bf16.mxu0 %v5196_v37  ;;  %v5268_v35 = vpack.c.bf16 %v2555_v34, %v2554_v33 }
 0x335   :  { %5199 = vmatpush3.bf16.msra.mxu0 %v5196_v37  ;;  %v2557_v37 = vld [vmem:[%s7451_s7 + $0x118] sm:$0xff] }
 0x336   :  { %5201 = vmatprep.subr.bf16.mxu0 %v5200_v40  ;;  %v5272_v38 = vpack.c.bf16 %v2557_v37, %v2556_v36 }
 0x339   :  { %5203 = vmatpush3.bf16.msra.mxu0 %v5200_v40  ;;  %v2559_v40 = vld [vmem:[%s7451_s7 + $0x128] sm:$0xff] }
 0x33c   :  { %4887 = vmatmul.mubr.f32.vlgmr.msra.gmra.mrb[8].mxu0 %v2213_v41  ;;  %v5276_v41 = vpack.c.bf16 %v2559_v40, %v2558_v39 }
 0x33d   :  { %4889 = vmatprep.mubr.f32.mxu0 %v2214_v42 }
 0x340   :  { %4890 = vmatmul.mubr.f32.gmra.mrb[10].mxu0 %v2215_v43  ;;  %v2560_v43 = vld [vmem:[%s7451_s7 + $0x130] sm:$0xff] }
 0x341   :  { %v5280_v46 = vpack.c.bf16 %v2561_v44, %v2560_v43 }
 0x40f   :  { %v4888_v60 = vpop.f32.mrb[8].mxu0 }
 0x410   :  { %v6813_v61 = vadd.f32 %v4888_v60, %v4264_v59  ;;  %v2298_v62 = vpop.f32.mrb[9].mxu0 }
 0x411   :  { %v2328_v63 = vadd.f32 %v4264_v59, %v2298_v62  ;;  %v4265_v62 = vld [vmem:[%s7452_s8] ss:$0 sm:$0xff] }
 0x412   :  { %v2333_v0 = vmax.f32 %v6813_v61, 0.0 }
 0x413   :  { %v2332_v1 = vmax.f32 %v2328_v63, 0.0  ;;  %v4891_v2 = vpop.f32.mrb[10].mxu0 }
 0x414   :  { %2337 = vst [vmem:[#allocation5 + $0x8] sm:$0xff] %v2333_v0  ;;  %v2331_v3 = vadd.f32 %v4891_v2, %v4264_v59  ;;  %v2308_v5 = vpop.f32.mrb[11].mxu0 }
 0x415   :  { %2336 = vst [vmem:[#allocation5] sm:$0xff] %v2332_v1  ;;  %v2330_v6 = vadd.f32 %v4264_v59, %v2308_v5 }
 0x416   :  { %v2335_v7 = vmax.f32 %v2331_v3, 0.0 }
 0x417   :  { %v2334_v8 = vmax.f32 %v2330_v6, 0.0 }
 0x418   :  { %2339 = vst [vmem:[#allocation5 + $0x18] sm:$0xf] %v2335_v7 }
 0x419   :  { %2338 = vst [vmem:[#allocation5 + $0x10] sm:$0xff] %v2334_v8 }
 0x41c   :  { %v2360_v4 = vld [vmem:[#allocation5 + $0x1] sm:$0xff] }
 0x41d   :  { %4924 = vmatprep.mubr.f32.mxu1 %v2360_v4  ;;  %v2550_v45 = vld [vmem:[#allocation5 + $0x2] sm:$0xff] }
 0x41f   :  { %v2363_v17 = vld [vmem:[#allocation5 + $0x19] sm:$0x3] }
 0x420   :  { %v2361_v13 = vld [vmem:[#allocation5 + $0x9] sm:$0xff]  ;;  %v2362_v14 = vld [vmem:[#allocation5 + $0x11] sm:$0xff]  ;;  %v2553_v61 = vld [vmem:[#allocation5 + $0x1a] sm:$0x3] }
 0x421   :  { %4925 = vmatmul.mubr.f32.vlgmr.msra.gmra.mrb[8].mxu1 %v2361_v13  ;;  %v2343_v42 = vld [vmem:[#allocation5 + $0x18] sm:$0x3]  ;;  %v2551_v59 = vld [vmem:[#allocation5 + $0xa] sm:$0xff] }
 0x422   :  { %5239 = vmatpush3.bf16.msra.mxu1 %v5236_v58  ;;  %4927 = vmatprep.mubr.f32.mxu1 %v2362_v14  ;;  %v5296_v58 = vpack.c.bf16 %v2569_v57, %v2568_v56  ;;  %v2552_v60 = vld [vmem:[#allocation5 + $0x12] sm:$0xff] }
 0x423   :  { %5241 = vmatprep.subr.bf16.mxu1 %v5240_v11 }
 0x425   :  { %4928 = vmatmul.mubr.f32.gmra.mrb[10].mxu1 %v2363_v17 }
 0x426   :  { %5243 = vmatpush3.bf16.msra.mxu1 %v5240_v11  ;;  %4962 = vmatprep.mubr.f32.mxu1 %v2332_v1 }
 0x427   :  { %5245 = vmatprep.subr.bf16.mxu1 %v5244_v16 }
 0x42a   :  { %5247 = vmatpush3.bf16.msra.mxu1 %v5244_v16 }
 0x42b   :  { %5249 = vmatprep.subr.bf16.mxu1 %v5248_v20 }
 0x42e   :  { %5251 = vmatpush3.bf16.msra.mxu1 %v5248_v20 }
 0x42f   :  { %5253 = vmatprep.subr.bf16.mxu1 %v5252_v23 }
 0x432   :  { %5255 = vmatpush3.bf16.msra.mxu1 %v5252_v23 }
 0x433   :  { %5257 = vmatprep.subr.bf16.mxu1 %v5256_v26 }
 0x436   :  { %5259 = vmatpush3.bf16.msra.mxu1 %v5256_v26 }
 0x437   :  { %5261 = vmatprep.subr.bf16.mxu1 %v5260_v29 }
 0x43a   :  { %5263 = vmatpush3.bf16.msra.mxu1 %v5260_v29 }
 0x43b   :  { %5265 = vmatprep.subr.bf16.mxu1 %v5264_v32 }
 0x43e   :  { %5267 = vmatpush3.bf16.msra.mxu1 %v5264_v32 }
 0x43f   :  { %5269 = vmatprep.subr.bf16.mxu1 %v5268_v35 }
 0x441   :  { %4963 = vmatmul.mubr.f32.vlgmr.msra.gmra.mrb[8].mxu1 %v2333_v0 }
 0x442   :  { %4965 = vmatprep.mubr.f32.mxu1 %v2334_v8  ;;  %5271 = vmatpush3.bf16.msra.mxu1 %v5268_v35 }
 0x443   :  { %5273 = vmatprep.subr.bf16.mxu1 %v5272_v38 }
 0x445   :  { %4966 = vmatmul.mubr.f32.gmra.mrb[10].mxu1 %v2343_v42 }
 0x446   :  { %5275 = vmatpush3.bf16.msra.mxu1 %v5272_v38  ;;  %5000 = vmatprep.mubr.f32.mxu1 %v2550_v45 }
 0x447   :  { %5277 = vmatprep.subr.bf16.mxu1 %v5276_v41 }
 0x44a   :  { %5279 = vmatpush3.bf16.msra.mxu1 %v5276_v41 }
 0x44b   :  { %5281 = vmatprep.subr.bf16.mxu1 %v5280_v46 }
 0x44e   :  { %5283 = vmatpush3.bf16.msra.mxu1 %v5280_v46 }
 0x44f   :  { %5285 = vmatprep.subr.bf16.mxu1 %v5284_v49 }
 0x452   :  { %5287 = vmatpush3.bf16.msra.mxu1 %v5284_v49 }
 0x453   :  { %5289 = vmatprep.subr.bf16.mxu1 %v5288_v52 }
 0x456   :  { %5291 = vmatpush3.bf16.msra.mxu1 %v5288_v52 }
 0x457   :  { %5293 = vmatprep.subr.bf16.mxu1 %v5292_v55 }
 0x45a   :  { %5295 = vmatpush3.bf16.msra.mxu1 %v5292_v55 }
 0x45b   :  { %5297 = vmatprep.subr.bf16.mxu1 %v5296_v58 }
 0x45e   :  { %5299 = vmatpush3.bf16.msra.mxu1 %v5296_v58 }
 0x461   :  { %5001 = vmatmul.mubr.f32.vlgmr.msra.gmra.mrb[8].mxu1 %v2551_v59 }
 0x462   :  { %5003 = vmatprep.mubr.f32.mxu1 %v2552_v60 }
 0x465   :  { %5004 = vmatmul.mubr.f32.gmra.mrb[10].mxu1 %v2553_v61 }
 0x534   :  { %v5002_v63 = vpop.f32.mrb[8].mxu1 }
 0x535   :  { %v2667_v0 = vadd.f32 %v5002_v63, %v4265_v62  ;;  %v2636_v1 = vpop.f32.mrb[9].mxu1 }
 0x536   :  { %v2666_v2 = vadd.f32 %v4265_v62, %v2636_v1 }
 0x537   :  { %v2671_v3 = vmax.f32 %v2667_v0, 0.0 }
 0x538   :  { %v2670_v5 = vmax.f32 %v2666_v2, 0.0  ;;  %v5005_v6 = vpop.f32.mrb[10].mxu1 }
 0x539   :  { %2676 = vst.msk [vmem:[#allocation6 + $0x8] sm:$0xff] %vm2674_vm4, %v2671_v3  ;;  %v2669_v7 = vadd.f32 %v5005_v6, %v4265_v62  ;;  %v2646_v8 = vpop.f32.mrb[11].mxu1 }
 0x53a   :  { %2675 = vst.msk [vmem:[#allocation6] sm:$0xff] %vm2674_vm4, %v2670_v5  ;;  %v2668_v4 = vadd.f32 %v4265_v62, %v2646_v8 }
 0x53b   :  { %v2673_v9 = vmax.f32 %v2669_v7, 0.0 }
 0x53c   :  { %v2672_v10 = vmax.f32 %v2668_v4, 0.0 }
 0x53d   :  { %2679 = vst.msk [vmem:[#allocation6 + $0x18] sm:$0x3] %vm2678_vm5, %v2673_v9 }
 0x53e   :  { %2677 = vst.msk [vmem:[#allocation6 + $0x10] sm:$0xff] %vm2674_vm4, %v2672_v10 }
 0x53f   :  { %5516 = dma.done.wait [#allocation8], 20480 }
 0x540   :  { %5517 = vsyncadd [#allocation8], 4294946816  ;;  %v5524_v11 = vmov 0   ;;  %v2730_v12 = vld [vmem:[#allocation7 + $0x108] sm:$0xff]  ;;  %v2729_v14 = vld [vmem:[#allocation7 + $0x100] sm:$0xff]  ;;  %vm4216_vm6 = vcmask 25600  }
 0x541   :  { %2796 = vmatprep.mubr.bf16.mxu0 %v5524_v11  ;;  %3045 = vmatprep.mubr.bf16.mxu1 %v5524_v11  ;;  %v2695_v13 = vld [vmem:[#allocation7 + $0x28] sm:$0xff]  ;;  %v2694_v15 = vld [vmem:[#allocation7 + $0x20] sm:$0xff]  ;;  %v2732_v34 = vld [vmem:[#allocation7 + $0x118] sm:$0xff] }
 0x542   :  { %2764 = vmatprep.subr.bf16.mxu0 %v2730_v12  ;;  %3013 = vmatprep.subr.bf16.mxu1 %v2695_v13  ;;  %v2738_v16 = vld [vmem:[#allocation7 + $0x148] sm:$0xff]  ;;  %v2737_v18 = vld [vmem:[#allocation7 + $0x140] sm:$0xff]  ;;  %v2731_v38 = vld [vmem:[#allocation7 + $0x110] sm:$0xff] }
 0x543   :  { %v2703_v17 = vld [vmem:[#allocation7 + $0x68] sm:$0xff]  ;;  %2765 = vmatpush1.bf16.msra.mxu0 %v2729_v14  ;;  %3014 = vmatpush1.bf16.msra.mxu1 %v2694_v15  ;;  %v2702_v19 = vld [vmem:[#allocation7 + $0x60] sm:$0xff]  ;;  %v2740_v40 = vld [vmem:[#allocation7 + $0x158] sm:$0xff] }
 0x544   :  { %2766 = vmatprep.subr.bf16.mxu0 %v2738_v16  ;;  %3015 = vmatprep.subr.bf16.mxu1 %v2703_v17  ;;  %v2746_v20 = vld [vmem:[#allocation7 + $0x188] sm:$0xff]  ;;  %v2745_v22 = vld [vmem:[#allocation7 + $0x180] sm:$0xff]  ;;  %v2739_v42 = vld [vmem:[#allocation7 + $0x150] sm:$0xff] }
 0x545   :  { %v2711_v21 = vld [vmem:[#allocation7 + $0xa8] sm:$0xff]  ;;  %v2710_v23 = vld [vmem:[#allocation7 + $0xa0] sm:$0xff]  ;;  %v2748_v44 = vld [vmem:[#allocation7 + $0x198] sm:$0xff] }
 0x546   :  { %v2723_v24 = vld [vmem:[#allocation6 + $0x2] ss:$16 sm:$0x3]  ;;  %v2725_v25 = vld [vmem:[#allocation6 + $0x3] ss:$16 sm:$0x3] }
 0x547   :  { %2767 = vmatpush1.bf16.msra.mxu0 %v2737_v18  ;;  %3016 = vmatpush1.bf16.msra.mxu1 %v2702_v19  ;;  %v2685_v26 = vld [vmem:[#allocation6] ss:$16 sm:$0x3]  ;;  %v2687_v27 = vld [vmem:[#allocation6 + $0x1] ss:$16 sm:$0x3]  ;;  %v2726_v30 = vmax.f32 %v2723_v24, %v2725_v25 }
 0x548   :  { %2768 = vmatprep.subr.bf16.mxu0 %v2746_v20  ;;  %3017 = vmatprep.subr.bf16.mxu1 %v2711_v21  ;;  %v2754_v28 = vld [vmem:[#allocation7 + $0x1c8] sm:$0xff]  ;;  %v2688_v31 = vmax.f32 %v2685_v26, %v2687_v27  ;;  %v2753_v32 = vld [vmem:[#allocation7 + $0x1c0] sm:$0xff]  ;;  %v2747_v48 = vld [vmem:[#allocation7 + $0x190] sm:$0xff] }
 0x549   :  { %v2719_v29 = vld [vmem:[#allocation7 + $0xe8] sm:$0xff]  ;;  %v2718_v33 = vld [vmem:[#allocation7 + $0xe0] sm:$0xff]  ;;  %v6918_v36 = vpack.c.bf16 %v2726_v30, %v2726_v30  ;;  %v2756_v50 = vld [vmem:[#allocation7 + $0x1d8] sm:$0xff] }
 0x54a   :  { %v3103_v35 = vld [vmem:[#allocation7 + $0x208] sm:$0xff]  ;;  %v6920_v37 = vpack.c.bf16 %v2688_v31, %v2688_v31  ;;  %v3102_v39 = vld [vmem:[#allocation7 + $0x200] sm:$0xff]  ;;  %v2755_v53 = vld [vmem:[#allocation7 + $0x1d0] sm:$0xff] }
 0x54b   :  { %2769 = vmatpush1.bf16.msra.mxu0 %v2745_v22  ;;  %3018 = vmatpush1.bf16.msra.mxu1 %v2710_v23  ;;  %v3111_v41 = vld [vmem:[#allocation7 + $0x248] sm:$0xff]  ;;  %v3110_v43 = vld [vmem:[#allocation7 + $0x240] sm:$0xff]  ;;  %v2736_v4 = vld [vmem:[#allocation7 + $0x138] sm:$0xff] }
 0x54c   :  { %2770 = vmatprep.subr.bf16.mxu0 %v2754_v28  ;;  %3019 = vmatprep.subr.bf16.mxu1 %v2719_v29  ;;  %v3119_v45 = vld [vmem:[#allocation7 + $0x288] sm:$0xff]  ;;  %v3096_v46 = vld [vmem:[#allocation6 + $0x4] ss:$16 sm:$0x3]  ;;  %v2744_v13 = vld [vmem:[#allocation7 + $0x178] sm:$0xff] }
 0x54d   :  { %v3098_v47 = vld [vmem:[#allocation6 + $0x5] ss:$16 sm:$0x3]  ;;  %v3127_v51 = vld [vmem:[#allocation7 + $0x2c8] sm:$0xff]  ;;  %v2752_v17 = vld [vmem:[#allocation7 + $0x1b8] sm:$0xff] }
 0x54e   :  { %v3118_v49 = vld [vmem:[#allocation7 + $0x280] sm:$0xff]  ;;  %v3099_v52 = vmax.f32 %v3096_v46, %v3098_v47  ;;  %v2734_v55 = vld [vmem:[#allocation7 + $0x128] sm:$0xff]  ;;  %v2735_v10 = vld [vmem:[#allocation7 + $0x130] sm:$0xff] }
 0x54f   :  { %2771 = vmatpush1.bf16.msra.mxu0 %v2753_v32  ;;  %3020 = vmatpush1.bf16.msra.mxu1 %v2718_v33  ;;  %v3126_v54 = vld [vmem:[#allocation7 + $0x2c0] sm:$0xff]  ;;  %v3107_v56 = vld [vmem:[#allocation7 + $0x228] sm:$0xff]  ;;  %v2743_v15 = vld [vmem:[#allocation7 + $0x170] sm:$0xff] }
 0x550   :  { %2805 = vmatprep.subr.bf16.mxu0 %v2732_v34  ;;  %3137 = vmatprep.subr.bf16.mxu1 %v3103_v35  ;;  %v6928_v57 = vpack.c.bf16 %v3099_v52, %v3099_v52  ;;  %v2733_v58 = vld [vmem:[#allocation7 + $0x120] sm:$0xff]  ;;  %v2742_v60 = vld [vmem:[#allocation7 + $0x168] sm:$0xff]  ;;  %v2751_v21 = vld [vmem:[#allocation7 + $0x1b0] sm:$0xff] }
 0x551   :  { %v3106_v59 = vld [vmem:[#allocation7 + $0x220] sm:$0xff]  ;;  %v3115_v61 = vld [vmem:[#allocation7 + $0x268] sm:$0xff]  ;;  %v2760_v23 = vld [vmem:[#allocation7 + $0x1f8] sm:$0xff] }
 0x552   :  { %4266 = vmatmul.mubr.msk.bf16.vlgmr.msra.gmra.mrb[12].mxu0 %vm2674_vm4, %v6918_v36  ;;  %4272 = vmatmul.mubr.msk.bf16.vlgmr.msra.gmra.mrb[12].mxu1 %vm2674_vm4, %v6920_v37  ;;  %v2741_v62 = vld [vmem:[#allocation7 + $0x160] sm:$0xff]  ;;  %v2750_v0 = vld [vmem:[#allocation7 + $0x1a8] sm:$0xff]  ;;  %v2759_v26 = vld [vmem:[#allocation7 + $0x1f0] sm:$0xff] }
 0x553   :  { %2806 = vmatpush1.bf16.msra.mxu0 %v2731_v38  ;;  %3138 = vmatpush1.bf16.msra.mxu1 %v3102_v39  ;;  %v3114_v63 = vld [vmem:[#allocation7 + $0x260] sm:$0xff]  ;;  %v3123_v1 = vld [vmem:[#allocation7 + $0x2a8] sm:$0xff]  ;;  %v2693_v46 = vld [vmem:[#allocation7 + $0x18] sm:$0xff] }
 0x554   :  { %2807 = vmatprep.subr.bf16.mxu0 %v2740_v40  ;;  %3139 = vmatprep.subr.bf16.mxu1 %v3111_v41  ;;  %v2749_v2 = vld [vmem:[#allocation7 + $0x1a0] sm:$0xff]  ;;  %v2758_v5 = vld [vmem:[#allocation7 + $0x1e8] sm:$0xff]  ;;  %v2700_v52 = vld [vmem:[#allocation7 + $0x50] sm:$0xff] }
 0x555   :  { %2837 = vmatprep.mubr.bf16.mxu0 %v5524_v11  ;;  %3169 = vmatprep.mubr.bf16.mxu1 %v5524_v11  ;;  %v3122_v3 = vld [vmem:[#allocation7 + $0x2a0] sm:$0xff]  ;;  %v3131_v6 = vld [vmem:[#allocation7 + $0x2e8] sm:$0xff] }
 0x556   :  { %v2757_v7 = vld [vmem:[#allocation7 + $0x1e0] sm:$0xff]  ;;  %v3317_v9 = vld [vmem:[#allocation7 + $0x308] sm:$0xff] }
 0x557   :  { %2808 = vmatpush1.bf16.msra.mxu0 %v2739_v42  ;;  %3140 = vmatpush1.bf16.msra.mxu1 %v3110_v43  ;;  %v3130_v8 = vld [vmem:[#allocation7 + $0x2e0] sm:$0xff]  ;;  %v3325_v14 = vld [vmem:[#allocation7 + $0x348] sm:$0xff] }
 0x558   :  { %2809 = vmatprep.subr.bf16.mxu0 %v2748_v44  ;;  %3141 = vmatprep.subr.bf16.mxu1 %v3119_v45  ;;  %v3316_v12 = vld [vmem:[#allocation7 + $0x300] sm:$0xff]  ;;  %v3333_v18 = vld [vmem:[#allocation7 + $0x388] sm:$0xff] }
 0x559   :  { %v3324_v16 = vld [vmem:[#allocation7 + $0x340] sm:$0xff]  ;;  %v3341_v24 = vld [vmem:[#allocation7 + $0x3c8] sm:$0xff] }
 0x55a   :  { %v3310_v19 = vld [vmem:[#allocation6 + $0x6] ss:$16 sm:$0x3]  ;;  %v3312_v20 = vld [vmem:[#allocation6 + $0x7] ss:$16 sm:$0x3] }
 0x55b   :  { %2810 = vmatpush1.bf16.msra.mxu0 %v2747_v48  ;;  %3142 = vmatpush1.bf16.msra.mxu1 %v3118_v49  ;;  %v3332_v22 = vld [vmem:[#allocation7 + $0x380] sm:$0xff]  ;;  %v3313_v25 = vmax.f32 %v3310_v19, %v3312_v20  ;;  %v2691_v28 = vld [vmem:[#allocation7 + $0x8] sm:$0xff]  ;;  %v2692_v48 = vld [vmem:[#allocation7 + $0x10] sm:$0xff] }
 0x55c   :  { %2811 = vmatprep.subr.bf16.mxu0 %v2756_v50  ;;  %3143 = vmatprep.subr.bf16.mxu1 %v3127_v51  ;;  %v3340_v27 = vld [vmem:[#allocation7 + $0x3c0] sm:$0xff]  ;;  %v3321_v29 = vld [vmem:[#allocation7 + $0x328] sm:$0xff]  ;;  %v2701_v50 = vld [vmem:[#allocation7 + $0x58] sm:$0xff] }
 0x55d   :  { %v6942_v30 = vpack.c.bf16 %v3313_v25, %v3313_v25  ;;  %v2690_v31 = vld [vmem:[#allocation7] sm:$0xff]  ;;  %v2699_v33 = vld [vmem:[#allocation7 + $0x48] sm:$0xff]  ;;  %v3105_v20 = vld [vmem:[#allocation7 + $0x218] sm:$0xff] }
 0x55e   :  { %v3320_v32 = vld [vmem:[#allocation7 + $0x320] sm:$0xff]  ;;  %v3329_v34 = vld [vmem:[#allocation7 + $0x368] sm:$0xff]  ;;  %v3120_v25 = vld [vmem:[#allocation7 + $0x290] sm:$0xff] }
 0x55f   :  { %2812 = vmatpush1.bf16.msra.mxu0 %v2755_v53  ;;  %3144 = vmatpush1.bf16.msra.mxu1 %v3126_v54  ;;  %v2698_v35 = vld [vmem:[#allocation7 + $0x40] sm:$0xff]  ;;  %v2707_v39 = vld [vmem:[#allocation7 + $0x88] sm:$0xff]  ;;  %v2709_v54 = vld [vmem:[#allocation7 + $0x98] sm:$0xff] }
 0x560   :  { %2846 = vmatprep.subr.bf16.mxu0 %v2734_v55  ;;  %3219 = vmatprep.subr.bf16.mxu1 %v3107_v56  ;;  %v3328_v38 = vld [vmem:[#allocation7 + $0x360] sm:$0xff]  ;;  %v3337_v40 = vld [vmem:[#allocation7 + $0x3a8] sm:$0xff] }
 0x561   :  { %v3336_v41 = vld [vmem:[#allocation7 + $0x3a0] sm:$0xff]  ;;  %v2715_v42 = vld [vmem:[#allocation7 + $0xc8] sm:$0xff] }
 0x562   :  { %4267 = vmatmul.mubr.msk.bf16.vlgmr.msra.gmra.mrb[16].mxu0 %vm2674_vm4, %v6918_v36  ;;  %4274 = vmatmul.mubr.msk.bf16.vlgmr.msra.gmra.mrb[16].mxu1 %vm2674_vm4, %v6928_v57  ;;  %v3345_v43 = vld [vmem:[#allocation7 + $0x3e8] sm:$0xff]  ;;  %v2714_v44 = vld [vmem:[#allocation7 + $0xc0] sm:$0xff] }
 0x563   :  { %2847 = vmatpush1.bf16.msra.mxu0 %v2733_v58  ;;  %3220 = vmatpush1.bf16.msra.mxu1 %v3106_v59  ;;  %v3344_v45 = vld [vmem:[#allocation7 + $0x3e0] sm:$0xff]  ;;  %v3531_v47 = vld [vmem:[#allocation7 + $0x408] sm:$0xff]  ;;  %v2708_v59 = vld [vmem:[#allocation7 + $0x90] sm:$0xff] }
 0x564   :  { %2848 = vmatprep.subr.bf16.mxu0 %v2742_v60  ;;  %3221 = vmatprep.subr.bf16.mxu1 %v3115_v61  ;;  %v3530_v49 = vld [vmem:[#allocation7 + $0x400] sm:$0xff]  ;;  %v3539_v51 = vld [vmem:[#allocation7 + $0x448] sm:$0xff]  ;;  %v2717_v61 = vld [vmem:[#allocation7 + $0xd8] sm:$0xff] }
 0x565   :  { %2878 = vmatprep.mubr.bf16.mxu0 %v5524_v11  ;;  %3251 = vmatprep.mubr.bf16.mxu1 %v5524_v11  ;;  %v3538_v53 = vld [vmem:[#allocation7 + $0x440] sm:$0xff]  ;;  %v3547_v55 = vld [vmem:[#allocation7 + $0x488] sm:$0xff] }
 0x566   :  { %v3524_v56 = vld [vmem:[#allocation6 + $0x8] ss:$16 sm:$0x3]  ;;  %v3526_v58 = vld [vmem:[#allocation6 + $0x9] ss:$16 sm:$0x3] }
 0x567   :  { %2849 = vmatpush1.bf16.msra.mxu0 %v2741_v62  ;;  %3222 = vmatpush1.bf16.msra.mxu1 %v3114_v63  ;;  %v3546_v60 = vld [vmem:[#allocation7 + $0x480] sm:$0xff]  ;;  %v3555_v62 = vld [vmem:[#allocation7 + $0x4c8] sm:$0xff]  ;;  %v3527_v63 = vmax.f32 %v3524_v56, %v3526_v58  ;;  %v3323_v56 = vld [vmem:[#allocation7 + $0x338] sm:$0xff] }
 0x568   :  { %2850 = vmatprep.subr.bf16.mxu0 %v2750_v0  ;;  %3223 = vmatprep.subr.bf16.mxu1 %v3123_v1  ;;  %v2716_v0 = vld [vmem:[#allocation7 + $0xd0] sm:$0xff]  ;;  %v3554_v1 = vld [vmem:[#allocation7 + $0x4c0] sm:$0xff] }
 0x569   :  { %v3558_v19 = vld [vmem:[#allocation7 + $0x4e0] sm:$0xff]  ;;  %v3322_v58 = vld [vmem:[#allocation7 + $0x330] sm:$0xff] }
 0x56b   :  { %2851 = vmatpush1.bf16.msra.mxu0 %v2749_v2  ;;  %3224 = vmatpush1.bf16.msra.mxu1 %v3122_v3  ;;  %v2697_v2 = vld [vmem:[#allocation7 + $0x38] sm:$0xff]  ;;  %v3535_v3 = vld [vmem:[#allocation7 + $0x428] sm:$0xff] }
 0x56c   :  { %2852 = vmatprep.subr.bf16.mxu0 %v2758_v5  ;;  %3225 = vmatprep.subr.bf16.mxu1 %v3131_v6  ;;  %v6956_v5 = vpack.c.bf16 %v3527_v63, %v3527_v63  ;;  %v2696_v6 = vld [vmem:[#allocation7 + $0x30] sm:$0xff] }
 0x56d   :  { %v3799_v63 = vld [vmem:[%s7455_s11 + $0x20] sm:$0xff] }
 0x56f   :  { %2853 = vmatpush1.bf16.msra.mxu0 %v2757_v7  ;;  %3226 = vmatpush1.bf16.msra.mxu1 %v3130_v8  ;;  %v3534_v7 = vld [vmem:[#allocation7 + $0x420] sm:$0xff]  ;;  %v2705_v8 = vld [vmem:[#allocation7 + $0x78] sm:$0xff] }
 0x570   :  { %2887 = vmatprep.subr.bf16.mxu0 %v2736_v4  ;;  %3351 = vmatprep.subr.bf16.mxu1 %v3317_v9  ;;  %v3543_v4 = vld [vmem:[#allocation7 + $0x468] sm:$0xff]  ;;  %v2704_v9 = vld [vmem:[#allocation7 + $0x70] sm:$0xff] }
 0x572   :  { %4268 = vmatmul.mubr.msk.bf16.vlgmr.msra.gmra.mrb[20].mxu0 %vm2674_vm4, %v6918_v36  ;;  %4276 = vmatmul.mubr.msk.bf16.vlgmr.msra.gmra.mrb[20].mxu1 %vm2674_vm4, %v6928_v57 }
 0x573   :  { %2888 = vmatpush1.bf16.msra.mxu0 %v2735_v10  ;;  %3352 = vmatpush1.bf16.msra.mxu1 %v3316_v12  ;;  %v3542_v10 = vld [vmem:[#allocation7 + $0x460] sm:$0xff]  ;;  %v2713_v12 = vld [vmem:[#allocation7 + $0xb8] sm:$0xff] }
 0x574   :  { %2889 = vmatprep.subr.bf16.mxu0 %v2744_v13  ;;  %3353 = vmatprep.subr.bf16.mxu1 %v3325_v14  ;;  %v3551_v13 = vld [vmem:[#allocation7 + $0x4a8] sm:$0xff]  ;;  %v2712_v14 = vld [vmem:[#allocation7 + $0xb0] sm:$0xff] }
 0x575   :  { %2919 = vmatprep.mubr.bf16.mxu0 %v5524_v11  ;;  %3383 = vmatprep.mubr.bf16.mxu1 %v5524_v11 }
 0x577   :  { %2890 = vmatpush1.bf16.msra.mxu0 %v2743_v15  ;;  %3354 = vmatpush1.bf16.msra.mxu1 %v3324_v16  ;;  %v3550_v15 = vld [vmem:[#allocation7 + $0x4a0] sm:$0xff]  ;;  %v2721_v16 = vld [vmem:[#allocation7 + $0xf8] sm:$0xff] }
 0x578   :  { %2891 = vmatprep.subr.bf16.mxu0 %v2752_v17  ;;  %3355 = vmatprep.subr.bf16.mxu1 %v3333_v18  ;;  %v3559_v17 = vld [vmem:[#allocation7 + $0x4e8] sm:$0xff]  ;;  %v2720_v18 = vld [vmem:[#allocation7 + $0xf0] sm:$0xff] }
 0x57b   :  { %2892 = vmatpush1.bf16.msra.mxu0 %v2751_v21  ;;  %3356 = vmatpush1.bf16.msra.mxu1 %v3332_v22  ;;  %v3104_v21 = vld [vmem:[#allocation7 + $0x210] sm:$0xff]  ;;  %v3113_v22 = vld [vmem:[#allocation7 + $0x258] sm:$0xff] }
 0x57c   :  { %2893 = vmatprep.subr.bf16.mxu0 %v2760_v23  ;;  %3357 = vmatprep.subr.bf16.mxu1 %v3341_v24  ;;  %v3112_v23 = vld [vmem:[#allocation7 + $0x250] sm:$0xff]  ;;  %v3121_v24 = vld [vmem:[#allocation7 + $0x298] sm:$0xff] }
 0x57f   :  { %2894 = vmatpush1.bf16.msra.mxu0 %v2759_v26  ;;  %3358 = vmatpush1.bf16.msra.mxu1 %v3340_v27  ;;  %v3129_v26 = vld [vmem:[#allocation7 + $0x2d8] sm:$0xff]  ;;  %v3128_v27 = vld [vmem:[#allocation7 + $0x2d0] sm:$0xff] }
 0x580   :  { %2931 = vmatprep.subr.bf16.mxu0 %v2691_v28  ;;  %3433 = vmatprep.subr.bf16.mxu1 %v3321_v29  ;;  %v3109_v28 = vld [vmem:[#allocation7 + $0x238] sm:$0xff] }
 0x581   :  { %v3117_v29 = vld [vmem:[#allocation7 + $0x278] sm:$0xff] }
 0x582   :  { %4269 = vmatmul.mubr.msk.bf16.vlgmr.msra.gmra.mrb[24].mxu0 %vm2674_vm4, %v6918_v36  ;;  %4278 = vmatmul.mubr.msk.bf16.vlgmr.msra.gmra.mrb[24].mxu1 %vm2674_vm4, %v6942_v30  ;;  %v2706_v36 = vld [vmem:[#allocation7 + $0x80] sm:$0xff] }
 0x583   :  { %2932 = vmatpush1.bf16.msra.mxu0 %v2690_v31  ;;  %3434 = vmatpush1.bf16.msra.mxu1 %v3320_v32  ;;  %v3116_v31 = vld [vmem:[#allocation7 + $0x270] sm:$0xff]  ;;  %v3125_v32 = vld [vmem:[#allocation7 + $0x2b8] sm:$0xff] }
 0x584   :  { %2933 = vmatprep.subr.bf16.mxu0 %v2699_v33  ;;  %3435 = vmatprep.subr.bf16.mxu1 %v3329_v34  ;;  %v3124_v33 = vld [vmem:[#allocation7 + $0x2b0] sm:$0xff]  ;;  %v3133_v34 = vld [vmem:[#allocation7 + $0x2f8] sm:$0xff] }
 0x585   :  { %2963 = vmatprep.mubr.bf16.mxu0 %v5524_v11  ;;  %3465 = vmatprep.mubr.bf16.mxu1 %v5524_v11 }
 0x587   :  { %2934 = vmatpush1.bf16.msra.mxu0 %v2698_v35  ;;  %3436 = vmatpush1.bf16.msra.mxu1 %v3328_v38  ;;  %v3132_v35 = vld [vmem:[#allocation7 + $0x2f0] sm:$0xff]  ;;  %v3319_v38 = vld [vmem:[#allocation7 + $0x318] sm:$0xff] }
 0x588   :  { %2935 = vmatprep.subr.bf16.mxu0 %v2707_v39  ;;  %3437 = vmatprep.subr.bf16.mxu1 %v3337_v40  ;;  %v3318_v39 = vld [vmem:[#allocation7 + $0x310] sm:$0xff]  ;;  %v3327_v40 = vld [vmem:[#allocation7 + $0x358] sm:$0xff] }
 0x58b   :  { %2936 = vmatpush1.bf16.msra.mxu0 %v2706_v36  ;;  %3438 = vmatpush1.bf16.msra.mxu1 %v3336_v41  ;;  %v3326_v36 = vld [vmem:[#allocation7 + $0x350] sm:$0xff]  ;;  %v3335_v41 = vld [vmem:[#allocation7 + $0x398] sm:$0xff] }
 0x58c   :  { %2937 = vmatprep.subr.bf16.mxu0 %v2715_v42  ;;  %3439 = vmatprep.subr.bf16.mxu1 %v3345_v43  ;;  %v3334_v42 = vld [vmem:[#allocation7 + $0x390] sm:$0xff]  ;;  %v3343_v43 = vld [vmem:[#allocation7 + $0x3d8] sm:$0xff] }
 0x58f   :  { %2938 = vmatpush1.bf16.msra.mxu0 %v2714_v44  ;;  %3440 = vmatpush1.bf16.msra.mxu1 %v3344_v45  ;;  %v3811_v44 = vld [vmem:[%s7455_s11 + $0x80] sm:$0xff]  ;;  %v3812_v45 = vld [vmem:[%s7455_s11 + $0x88] sm:$0xff] }
 0x590   :  { %2972 = vmatprep.subr.bf16.mxu0 %v2693_v46  ;;  %3565 = vmatprep.subr.bf16.mxu1 %v3531_v47  ;;  %v5300_v46 = vpack.c.bf16 %v3812_v45, %v3811_v44  ;;  %v3796_v47 = vld [vmem:[%s7455_s11 + $0x8] sm:$0xff] }
 0x591   :  { %v3557_v45 = vld [vmem:[#allocation7 + $0x4d8] sm:$0xff] }
 0x592   :  { %4270 = vmatmul.mubr.msk.bf16.vlgmr.msra.gmra.mrb[28].mxu0 %vm2674_vm4, %v6920_v37  ;;  %4280 = vmatmul.mubr.msk.bf16.vlgmr.msra.gmra.mrb[28].mxu1 %vm2674_vm4, %v6942_v30 }
 0x593   :  { %2973 = vmatpush1.bf16.msra.mxu0 %v2692_v48  ;;  %3566 = vmatpush1.bf16.msra.mxu1 %v3530_v49  ;;  %v3813_v48 = vld [vmem:[%s7455_s11 + $0x90] sm:$0xff]  ;;  %v3814_v49 = vld [vmem:[%s7455_s11 + $0x98] sm:$0xff] }
 0x594   :  { %2974 = vmatprep.subr.bf16.mxu0 %v2701_v50  ;;  %3567 = vmatprep.subr.bf16.mxu1 %v3539_v51  ;;  %v5304_v51 = vpack.c.bf16 %v3814_v49, %v3813_v48  ;;  %v3556_v48 = vld [vmem:[#allocation7 + $0x4d0] sm:$0xff]  ;;  %v3537_v49 = vld [vmem:[#allocation7 + $0x438] sm:$0xff] }
 0x595   :  { %3004 = vmatprep.mubr.bf16.mxu0 %v5524_v11  ;;  %3597 = vmatprep.mubr.bf16.mxu1 %v5524_v11 }
 0x597   :  { %2975 = vmatpush1.bf16.msra.mxu0 %v2700_v52  ;;  %3568 = vmatpush1.bf16.msra.mxu1 %v3538_v53  ;;  %v3797_v52 = vld [vmem:[%s7455_s11 + $0x10] sm:$0xff]  ;;  %v3798_v53 = vld [vmem:[%s7455_s11 + $0x18] sm:$0xff] }
 0x598   :  { %2976 = vmatprep.subr.bf16.mxu0 %v2709_v54  ;;  %3569 = vmatprep.subr.bf16.mxu1 %v3547_v55  ;;  %v3342_v54 = vld [vmem:[#allocation7 + $0x3d0] sm:$0xff]  ;;  %v5306_v55 = vpack.c.bf16 %v3798_v53, %v3797_v52  ;;  %v3553_v53 = vld [vmem:[#allocation7 + $0x4b8] sm:$0xff] }
 0x599   :  { %v3544_v52 = vld [vmem:[#allocation7 + $0x470] sm:$0xff] }
 0x59b   :  { %2977 = vmatpush1.bf16.msra.mxu0 %v2708_v59  ;;  %3570 = vmatpush1.bf16.msra.mxu1 %v3546_v60  ;;  %v3331_v59 = vld [vmem:[#allocation7 + $0x378] sm:$0xff]  ;;  %v3815_v60 = vld [vmem:[%s7455_s11 + $0xa0] sm:$0xff] }
 0x59c   :  { %2978 = vmatprep.subr.bf16.mxu0 %v2717_v61  ;;  %3571 = vmatprep.subr.bf16.mxu1 %v3555_v62  ;;  %v3816_v61 = vld [vmem:[%s7455_s11 + $0xa8] sm:$0xff] }
 0x59d   :  { %v5308_v62 = vpack.c.bf16 %v3816_v61, %v3815_v60 }
 0x59f   :  { %2979 = vmatpush1.bf16.msra.mxu0 %v2716_v0  ;;  %3572 = vmatpush1.bf16.msra.mxu1 %v3554_v1  ;;  %v3800_v0 = vld [vmem:[%s7455_s11 + $0x28] sm:$0xff]  ;;  %v3330_v1 = vld [vmem:[#allocation7 + $0x370] sm:$0xff] }
 0x5a0   :  { %3054 = vmatprep.subr.bf16.mxu0 %v2697_v2  ;;  %3647 = vmatprep.subr.bf16.mxu1 %v3535_v3  ;;  %v5310_v2 = vpack.c.bf16 %v3800_v0, %v3799_v63  ;;  %v3339_v3 = vld [vmem:[#allocation7 + $0x3b8] sm:$0xff] }
 0x5a2   :  { %4271 = vmatmul.mubr.msk.bf16.vlgmr.msra.gmra.mrb[32].mxu0 %vm2674_vm4, %v6920_v37  ;;  %4282 = vmatmul.mubr.msk.bf16.vlgmr.msra.gmra.mrb[32].mxu1 %vm2674_vm4, %v6956_v5 }
 0x5a3   :  { %3055 = vmatpush1.bf16.msra.mxu0 %v2696_v6  ;;  %3648 = vmatpush1.bf16.msra.mxu1 %v3534_v7  ;;  %v3817_v6 = vld [vmem:[%s7455_s11 + $0xb0] sm:$0xff]  ;;  %v3818_v7 = vld [vmem:[%s7455_s11 + $0xb8] sm:$0xff] }
 0x5a4   :  { %3056 = vmatprep.subr.bf16.mxu0 %v2705_v8  ;;  %3649 = vmatprep.subr.bf16.mxu1 %v3543_v4  ;;  %v5312_v8 = vpack.c.bf16 %v3818_v7, %v3817_v6  ;;  %v3801_v4 = vld [vmem:[%s7455_s11 + $0x30] sm:$0xff] }
 0x5a5   :  { %3086 = vmatprep.mubr.bf16.mxu0 %v5524_v11  ;;  %3679 = vmatprep.mubr.bf16.mxu1 %v5524_v11 }
 0x5a7   :  { %3057 = vmatpush1.bf16.msra.mxu0 %v2704_v9  ;;  %3650 = vmatpush1.bf16.msra.mxu1 %v3542_v10  ;;  %v3802_v9 = vld [vmem:[%s7455_s11 + $0x38] sm:$0xff]  ;;  %v3338_v10 = vld [vmem:[#allocation7 + $0x3b0] sm:$0xff] }
 0x5a8   :  { %3058 = vmatprep.subr.bf16.mxu0 %v2713_v12  ;;  %3651 = vmatprep.subr.bf16.mxu1 %v3551_v13  ;;  %v3347_v12 = vld [vmem:[#allocation7 + $0x3f8] sm:$0xff]  ;;  %v5314_v13 = vpack.c.bf16 %v3802_v9, %v3801_v4  ;;  %v3843_v9 = vld [vmem:[%s7455_s11 + $0x180] sm:$0xff] }
 0x5ab   :  { %3059 = vmatpush1.bf16.msra.mxu0 %v2712_v14  ;;  %3652 = vmatpush1.bf16.msra.mxu1 %v3550_v15  ;;  %v3819_v14 = vld [vmem:[%s7455_s11 + $0xc0] sm:$0xff]  ;;  %v3820_v15 = vld [vmem:[%s7455_s11 + $0xc8] sm:$0xff] }
 0x5ac   :  { %3060 = vmatprep.subr.bf16.mxu0 %v2721_v16  ;;  %3653 = vmatprep.subr.bf16.mxu1 %v3559_v17  ;;  %v3803_v16 = vld [vmem:[%s7455_s11 + $0x40] sm:$0xff]  ;;  %v5316_v17 = vpack.c.bf16 %v3820_v15, %v3819_v14  ;;  %v3828_v14 = vld [vmem:[%s7455_s11 + $0x108] sm:$0xff]  ;;  %v3845_v15 = vld [vmem:[%s7455_s11 + $0x190] sm:$0xff] }
 0x5af   :  { %3061 = vmatpush1.bf16.msra.mxu0 %v2720_v18  ;;  %3654 = vmatpush1.bf16.msra.mxu1 %v3558_v19  ;;  %v3804_v18 = vld [vmem:[%s7455_s11 + $0x48] sm:$0xff]  ;;  %v3821_v19 = vld [vmem:[%s7455_s11 + $0xd0] sm:$0xff] }
 0x5b0   :  { %3178 = vmatprep.subr.bf16.mxu0 %v3105_v20  ;;  %5301 = vmatprep.subr.bf16.mxu1 %v5300_v46  ;;  %v3822_v20 = vld [vmem:[%s7455_s11 + $0xd8] sm:$0xff]  ;;  %v3876_v46 = vld [vmem:[%s7455_s11 + $0x288] sm:$0xff] }
 0x5b2   :  { %4273 = vmatmul.mubr.msk.bf16.vlgmr.msra.gmra.mrb[36].mxu0 %vm2674_vm4, %v6920_v37  ;;  %4284 = vmatmul.mubr.msk.bf16.vlgmr.msra.gmra.mrb[36].mxu1 %vm2674_vm4, %v6956_v5  ;;  %v3108_v37 = vld [vmem:[#allocation7 + $0x230] sm:$0xff] }
 0x5b3   :  { %3179 = vmatpush1.bf16.msra.mxu0 %v3104_v21  ;;  %3210 = vmatprep.mubr.bf16.mxu0 %v5524_v11  ;;  %v5318_v21 = vpack.c.bf16 %v3804_v18, %v3803_v16  ;;  %v3846_v16 = vld [vmem:[%s7455_s11 + $0x198] sm:$0xff] }
 0x5b4   :  { %3180 = vmatprep.subr.bf16.mxu0 %v3113_v22  ;;  %v5320_v22 = vpack.c.bf16 %v3822_v20, %v3821_v19  ;;  %v5336_v18 = vpack.c.bf16 %v3846_v16, %v3845_v15  ;;  %v3829_v19 = vld [vmem:[%s7455_s11 + $0x110] sm:$0xff]  ;;  %v3830_v20 = vld [vmem:[%s7455_s11 + $0x118] sm:$0xff] }
 0x5b7   :  { %3181 = vmatpush1.bf16.msra.mxu0 %v3112_v23  ;;  %v3805_v23 = vld [vmem:[%s7455_s11 + $0x50] sm:$0xff] }
 0x5b8   :  { %3182 = vmatprep.subr.bf16.mxu0 %v3121_v24  ;;  %v3806_v24 = vld [vmem:[%s7455_s11 + $0x58] sm:$0xff] }
 0x5bb   :  { %3183 = vmatpush1.bf16.msra.mxu0 %v3120_v25  ;;  %v3346_v25 = vld [vmem:[#allocation7 + $0x3f0] sm:$0xff] }
 0x5bc   :  { %3184 = vmatprep.subr.bf16.mxu0 %v3129_v26  ;;  %v3533_v26 = vld [vmem:[#allocation7 + $0x418] sm:$0xff] }
 0x5bf   :  { %3185 = vmatpush1.bf16.msra.mxu0 %v3128_v27  ;;  %v5322_v27 = vpack.c.bf16 %v3806_v24, %v3805_v23  ;;  %v3848_v23 = vld [vmem:[%s7455_s11 + $0x1a8] sm:$0xff] }
 0x5c0   :  { %3260 = vmatprep.subr.bf16.mxu0 %v3109_v28  ;;  %v3532_v28 = vld [vmem:[#allocation7 + $0x410] sm:$0xff] }
 0x5c2   :  { %4275 = vmatmul.mubr.msk.bf16.vlgmr.msra.gmra.mrb[40].mxu0 %vm2674_vm4, %v6928_v57 }
 0x5c3   :  { %3261 = vmatpush1.bf16.msra.mxu0 %v3108_v37  ;;  %3292 = vmatprep.mubr.bf16.mxu0 %v5524_v11  ;;  %v3541_v37 = vld [vmem:[#allocation7 + $0x458] sm:$0xff] }
 0x5c4   :  { %3262 = vmatprep.subr.bf16.mxu0 %v3117_v29  ;;  %v3823_v29 = vld [vmem:[%s7455_s11 + $0xe0] sm:$0xff] }
 0x5c7   :  { %3263 = vmatpush1.bf16.msra.mxu0 %v3116_v31  ;;  %v3824_v31 = vld [vmem:[%s7455_s11 + $0xe8] sm:$0xff] }
 0x5c8   :  { %3264 = vmatprep.subr.bf16.mxu0 %v3125_v32  ;;  %v5324_v32 = vpack.c.bf16 %v3824_v31, %v3823_v29 }
 0x5cb   :  { %3265 = vmatpush1.bf16.msra.mxu0 %v3124_v33  ;;  %v3807_v33 = vld [vmem:[%s7455_s11 + $0x60] sm:$0xff] }
 0x5cc   :  { %3266 = vmatprep.subr.bf16.mxu0 %v3133_v34  ;;  %v3540_v34 = vld [vmem:[#allocation7 + $0x450] sm:$0xff] }
 0x5cf   :  { %3267 = vmatpush1.bf16.msra.mxu0 %v3132_v35 }
 0x5d0   :  { %3392 = vmatprep.subr.bf16.mxu0 %v3319_v38  ;;  %v3549_v38 = vld [vmem:[#allocation7 + $0x498] sm:$0xff] }
 0x5d2   :  { %4277 = vmatmul.mubr.msk.bf16.vlgmr.msra.gmra.mrb[44].mxu0 %vm2674_vm4, %v6928_v57  ;;  %v3795_v57 = vld [vmem:[%s7455_s11] sm:$0xff] }
 0x5d3   :  { %3393 = vmatpush1.bf16.msra.mxu0 %v3318_v39  ;;  %3424 = vmatprep.mubr.bf16.mxu0 %v5524_v11  ;;  %v5302_v50 = vpack.c.bf16 %v3796_v47, %v3795_v57  ;;  %v3825_v39 = vld [vmem:[%s7455_s11 + $0xf0] sm:$0xff]  ;;  %v3875_v57 = vld [vmem:[%s7455_s11 + $0x280] sm:$0xff] }
 0x5d4   :  { %3394 = vmatprep.subr.bf16.mxu0 %v3327_v40  ;;  %v3826_v40 = vld [vmem:[%s7455_s11 + $0xf8] sm:$0xff]  ;;  %v5364_v47 = vpack.c.bf16 %v3876_v46, %v3875_v57  ;;  %v3852_v46 = vld [vmem:[%s7455_s11 + $0x1c8] sm:$0xff] }
 0x5d5   :  { %5303 = vmatpush3.bf16.msra.mxu1 %v5302_v50  ;;  %v3536_v50 = vld [vmem:[#allocation7 + $0x430] sm:$0xff] }
 0x5d6   :  { %5305 = vmatprep.subr.bf16.mxu1 %v5304_v51  ;;  %v3545_v51 = vld [vmem:[#allocation7 + $0x478] sm:$0xff] }
 0x5d7   :  { %3395 = vmatpush1.bf16.msra.mxu0 %v3326_v36  ;;  %v5328_v36 = vpack.c.bf16 %v3826_v40, %v3825_v39 }
 0x5d8   :  { %3396 = vmatprep.subr.bf16.mxu0 %v3335_v41  ;;  %v3809_v41 = vld [vmem:[%s7455_s11 + $0x70] sm:$0xff] }
 0x5d9   :  { %5307 = vmatpush3.bf16.msra.mxu1 %v5306_v55  ;;  %v3561_v55 = vld [vmem:[#allocation7 + $0x4f8] sm:$0xff] }
 0x5da   :  { %5309 = vmatprep.subr.bf16.mxu1 %v5308_v62 }
 0x5db   :  { %3397 = vmatpush1.bf16.msra.mxu0 %v3334_v42  ;;  %v3810_v42 = vld [vmem:[%s7455_s11 + $0x78] sm:$0xff] }
 0x5dc   :  { %3398 = vmatprep.subr.bf16.mxu0 %v3343_v43  ;;  %v3548_v43 = vld [vmem:[#allocation7 + $0x490] sm:$0xff]  ;;  %v5330_v44 = vpack.c.bf16 %v3810_v42, %v3809_v41  ;;  %v3833_v42 = vld [vmem:[%s7455_s11 + $0x130] sm:$0xff] }
 0x5dd   :  { %5311 = vmatpush3.bf16.msra.mxu1 %v5310_v2 }
 0x5de   :  { %5313 = vmatprep.subr.bf16.mxu1 %v5312_v8 }
 0x5df   :  { %3399 = vmatpush1.bf16.msra.mxu0 %v3342_v54  ;;  %v3552_v54 = vld [vmem:[#allocation7 + $0x4b0] sm:$0xff] }
 0x5e0   :  { %3474 = vmatprep.subr.bf16.mxu0 %v3323_v56  ;;  %v3560_v56 = vld [vmem:[#allocation7 + $0x4f0] sm:$0xff] }
 0x5e1   :  { %5315 = vmatpush3.bf16.msra.mxu1 %v5314_v13 }
 0x5e2   :  { %4279 = vmatmul.mubr.msk.bf16.vlgmr.msra.gmra.mrb[48].mxu0 %vm2674_vm4, %v6942_v30  ;;  %5317 = vmatprep.subr.bf16.mxu1 %v5316_v17 }
 0x5e3   :  { %3475 = vmatpush1.bf16.msra.mxu0 %v3322_v58  ;;  %3506 = vmatprep.mubr.bf16.mxu0 %v5524_v11 }
 0x5e4   :  { %3476 = vmatprep.subr.bf16.mxu0 %v3331_v59 }
 0x5e5   :  { %5319 = vmatpush3.bf16.msra.mxu1 %v5318_v21  ;;  %v5338_v21 = vpack.c.bf16 %v3830_v20, %v3829_v19  ;;  %v3907_v20 = vld [vmem:[%s7455_s11 + $0x380] sm:$0xff] }
 0x5e6   :  { %5321 = vmatprep.subr.bf16.mxu1 %v5320_v22  ;;  %v3847_v22 = vld [vmem:[%s7455_s11 + $0x1a0] sm:$0xff] }
 0x5e7   :  { %3477 = vmatpush1.bf16.msra.mxu0 %v3330_v1  ;;  %v5340_v24 = vpack.c.bf16 %v3848_v23, %v3847_v22 }
 0x5e8   :  { %3478 = vmatprep.subr.bf16.mxu0 %v3339_v3 }
 0x5e9   :  { %5323 = vmatpush3.bf16.msra.mxu1 %v5322_v27 }
 0x5ea   :  { %5325 = vmatprep.subr.bf16.mxu1 %v5324_v32 }
 0x5eb   :  { %3479 = vmatpush1.bf16.msra.mxu0 %v3338_v10  ;;  %v3844_v10 = vld [vmem:[%s7455_s11 + $0x188] sm:$0xff] }
 0x5ec   :  { %3480 = vmatprep.subr.bf16.mxu0 %v3347_v12  ;;  %v3827_v12 = vld [vmem:[%s7455_s11 + $0x100] sm:$0xff]  ;;  %v5332_v13 = vpack.c.bf16 %v3844_v10, %v3843_v9 }
 0x5ed   :  { %v5334_v17 = vpack.c.bf16 %v3828_v14, %v3827_v12  ;;  %v3857_v12 = vld [vmem:[%s7455_s11 + $0x1f0] sm:$0xff] }
 0x5ef   :  { %3481 = vmatpush1.bf16.msra.mxu0 %v3346_v25  ;;  %v3831_v25 = vld [vmem:[%s7455_s11 + $0x120] sm:$0xff] }
 0x5f0   :  { %3606 = vmatprep.subr.bf16.mxu0 %v3533_v26  ;;  %v3832_v26 = vld [vmem:[%s7455_s11 + $0x128] sm:$0xff] }
 0x5f2   :  { %4281 = vmatmul.mubr.msk.bf16.vlgmr.msra.gmra.mrb[52].mxu0 %vm2674_vm4, %v6942_v30  ;;  %v3808_v30 = vld [vmem:[%s7455_s11 + $0x68] sm:$0xff] }
 0x5f3   :  { %3607 = vmatpush1.bf16.msra.mxu0 %v3532_v28  ;;  %3638 = vmatprep.mubr.bf16.mxu0 %v5524_v11  ;;  %v5326_v35 = vpack.c.bf16 %v3808_v30, %v3807_v33 }
 0x5f4   :  { %3608 = vmatprep.subr.bf16.mxu0 %v3541_v37  ;;  %v5342_v37 = vpack.c.bf16 %v3832_v26, %v3831_v25 }
 0x5f5   :  { %5327 = vmatpush3.bf16.msra.mxu1 %v5326_v35  ;;  %v3849_v35 = vld [vmem:[%s7455_s11 + $0x1b0] sm:$0xff] }
 0x5f6   :  { %5329 = vmatprep.subr.bf16.mxu1 %v5328_v36 }
 0x5f7   :  { %3609 = vmatpush1.bf16.msra.mxu0 %v3540_v34 }
 0x5f8   :  { %3610 = vmatprep.subr.bf16.mxu0 %v3549_v38  ;;  %v3850_v38 = vld [vmem:[%s7455_s11 + $0x1b8] sm:$0xff] }
 0x5f9   :  { %5331 = vmatpush3.bf16.msra.mxu1 %v5330_v44  ;;  %v5344_v41 = vpack.c.bf16 %v3850_v38, %v3849_v35  ;;  %v3851_v44 = vld [vmem:[%s7455_s11 + $0x1c0] sm:$0xff]  ;;  %v3739_v35 = vlaneseq }
 0x5fa   :  { %5365 = vmatprep.subr.bf16.mxu1 %v5364_v47  ;;  %v3835_v47 = vld [vmem:[%s7455_s11 + $0x140] sm:$0xff] }
 0x5fb   :  { %3611 = vmatpush1.bf16.msra.mxu0 %v3548_v43  ;;  %v3834_v43 = vld [vmem:[%s7455_s11 + $0x138] sm:$0xff] }
 0x5fc   :  { %3612 = vmatprep.subr.bf16.mxu0 %v3557_v45  ;;  %v5346_v57 = vpack.c.bf16 %v3834_v43, %v3833_v42 }
 0x5ff   :  { %3613 = vmatpush1.bf16.msra.mxu0 %v3556_v48  ;;  %v3836_v48 = vld [vmem:[%s7455_s11 + $0x148] sm:$0xff] }
 0x600   :  { %3688 = vmatprep.subr.bf16.mxu0 %v3537_v49  ;;  %v5348_v49 = vpack.c.bf16 %v3852_v46, %v3851_v44 }
 0x602   :  { %4283 = vmatmul.mubr.msk.bf16.vlgmr.msra.gmra.mrb[56].mxu0 %vm2674_vm4, %v6956_v5 }
 0x603   :  { %3689 = vmatpush1.bf16.msra.mxu0 %v3536_v50  ;;  %3720 = vmatprep.mubr.bf16.mxu0 %v5524_v11  ;;  %v3853_v50 = vld [vmem:[%s7455_s11 + $0x1d0] sm:$0xff] }
 0x604   :  { %3690 = vmatprep.subr.bf16.mxu0 %v3545_v51  ;;  %v3854_v51 = vld [vmem:[%s7455_s11 + $0x1d8] sm:$0xff] }
 0x607   :  { %3691 = vmatpush1.bf16.msra.mxu0 %v3544_v52  ;;  %v5350_v52 = vpack.c.bf16 %v3836_v48, %v3835_v47 }
 0x608   :  { %3692 = vmatprep.subr.bf16.mxu0 %v3553_v53  ;;  %v5352_v53 = vpack.c.bf16 %v3854_v51, %v3853_v50 }
 0x60b   :  { %3693 = vmatpush1.bf16.msra.mxu0 %v3552_v54  ;;  %v3837_v54 = vld [vmem:[%s7455_s11 + $0x150] sm:$0xff] }
 0x60c   :  { %3694 = vmatprep.subr.bf16.mxu0 %v3561_v55  ;;  %v3838_v55 = vld [vmem:[%s7455_s11 + $0x158] sm:$0xff] }
 0x60f   :  { %3695 = vmatpush1.bf16.msra.mxu0 %v3560_v56  ;;  %v5354_v56 = vpack.c.bf16 %v3838_v55, %v3837_v54 }
 0x610   :  { %5333 = vmatprep.subr.bf16.mxu0 %v5332_v13  ;;  %v3858_v13 = vld [vmem:[%s7455_s11 + $0x1f8] sm:$0xff] }
 0x611   :  { %v5360_v16 = vpack.c.bf16 %v3858_v13, %v3857_v12  ;;  %v3863_v12 = vld [vmem:[%s7455_s11 + $0x220] sm:$0xff]  ;;  %v3864_v13 = vld [vmem:[%s7455_s11 + $0x228] sm:$0xff] }
 0x612   :  { %4285 = vmatmul.mubr.msk.bf16.vlgmr.msra.gmra.mrb[60].mxu0 %vm2674_vm4, %v6956_v5 }
 0x613   :  { %5335 = vmatpush3.bf16.msra.mxu0 %v5334_v17  ;;  %v3841_v17 = vld [vmem:[%s7455_s11 + $0x170] sm:$0xff] }
 0x614   :  { %5337 = vmatprep.subr.bf16.mxu0 %v5336_v18  ;;  %v3842_v18 = vld [vmem:[%s7455_s11 + $0x178] sm:$0xff] }
 0x615   :  { %v5362_v19 = vpack.c.bf16 %v3842_v18, %v3841_v17  ;;  %v5374_v17 = vpack.c.bf16 %v3864_v13, %v3863_v12 }
 0x617   :  { %5339 = vmatpush3.bf16.msra.mxu0 %v5338_v21  ;;  %v3908_v21 = vld [vmem:[%s7455_s11 + $0x388] sm:$0xff] }
 0x618   :  { %5341 = vmatprep.subr.bf16.mxu0 %v5340_v24  ;;  %v5396_v22 = vpack.c.bf16 %v3908_v21, %v3907_v20  ;;  %v3866_v20 = vld [vmem:[%s7455_s11 + $0x238] sm:$0xff] }
 0x61b   :  { %5343 = vmatpush3.bf16.msra.mxu0 %v5342_v37 }
 0x61c   :  { %5345 = vmatprep.subr.bf16.mxu0 %v5344_v41 }
 0x61f   :  { %5347 = vmatpush3.bf16.msra.mxu0 %v5346_v57 }
 0x620   :  { %5349 = vmatprep.subr.bf16.mxu0 %v5348_v49 }
 0x623   :  { %5351 = vmatpush3.bf16.msra.mxu0 %v5350_v52 }
 0x624   :  { %5353 = vmatprep.subr.bf16.mxu0 %v5352_v53  ;;  %v3859_v53 = vld [vmem:[%s7455_s11 + $0x200] sm:$0xff] }
 0x625   :  { %v7088_v58 = vpop.f32.mrb[12].mxu0  ;;  %v3047_v59 = vpop.f32.mrb[12].mxu1 }
 0x626   :  { %v7090_v60 = vpop.f32.mrb[13].mxu0  ;;  %v3049_v11 = vpop.f32.mrb[13].mxu1 }
 0x627   :  { %v2802_v61 = vpop.f32.mrb[14].mxu0  ;;  %v3051_v62 = vpop.f32.mrb[14].mxu1  ;;  %5355 = vmatpush3.bf16.msra.mxu0 %v5354_v56  ;;  %v3878_v56 = vld [vmem:[%s7455_s11 + $0x298] sm:$0xff] }
 0x628   :  { %v2803_v63 = vpop.f32.mrb[15].mxu0  ;;  %v3052_v0 = vpop.f32.mrb[15].mxu1  ;;  %v3839_v62 = vld [vmem:[%s7455_s11 + $0x160] sm:$0xff] }
 0x629   :  { %v3840_v63 = vld [vmem:[%s7455_s11 + $0x168] sm:$0xff] }
 0x635   :  { %v7092_v1 = vpop.f32.mrb[16].mxu0  ;;  %v7094_v2 = vpop.f32.mrb[16].mxu1 }
 0x636   :  { %v7096_v3 = vpop.f32.mrb[17].mxu0  ;;  %v7098_v6 = vpop.f32.mrb[17].mxu1 }
 0x637   :  { %v2843_v7 = vpop.f32.mrb[18].mxu0  ;;  %v3175_v5 = vpop.f32.mrb[18].mxu1 }
 0x638   :  { %v2844_v8 = vpop.f32.mrb[19].mxu0  ;;  %v3176_v4 = vpop.f32.mrb[19].mxu1  ;;  %v5358_v5 = vpack.c.bf16 %v3840_v63, %v3839_v62  ;;  %v3861_v63 = vld [vmem:[%s7455_s11 + $0x210] sm:$0xff] }
 0x645   :  { %v2880_v27 = vpop.f32.mrb[20].mxu0  ;;  %v3253_v28 = vpop.f32.mrb[20].mxu1 }
 0x646   :  { %v3048_v29 = vadd.f32 %v3047_v59, %v2880_v27  ;;  %v2882_v31 = vpop.f32.mrb[21].mxu0  ;;  %v3255_v32 = vpop.f32.mrb[21].mxu1  ;;  %v3855_v59 = vld [vmem:[%s7455_s11 + $0x1e0] sm:$0xff] }
 0x647   :  { %v3050_v33 = vadd.f32 %v3049_v11, %v2882_v31  ;;  %v2884_v30 = vpop.f32.mrb[22].mxu0  ;;  %v3257_v34 = vpop.f32.mrb[22].mxu1  ;;  %v3856_v11 = vld [vmem:[%s7455_s11 + $0x1e8] sm:$0xff] }
 0x648   :  { %v3305_v39 = vadd.f32 %v3253_v28, %v3048_v29  ;;  %v2885_v40 = vpop.f32.mrb[23].mxu0  ;;  %v3258_v36 = vpop.f32.mrb[23].mxu1  ;;  %v5356_v61 = vpack.c.bf16 %v3856_v11, %v3855_v59 }
 0x649   :  { %v3306_v45 = vadd.f32 %v3255_v32, %v3050_v33 }
 0x64a   :  { %5357 = vmatprep.subr.bf16.mxu0 %v5356_v61 }
 0x64b   :  { %5359 = vmatpush3.bf16.msra.mxu0 %v5358_v5  ;;  %v3879_v5 = vld [vmem:[%s7455_s11 + $0x2a0] sm:$0xff] }
 0x64c   :  { %5361 = vmatprep.subr.bf16.mxu0 %v5360_v16  ;;  %v3882_v16 = vld [vmem:[%s7455_s11 + $0x2b8] sm:$0xff] }
 0x64f   :  { %5363 = vmatpush3.bf16.msra.mxu0 %v5362_v19  ;;  %v3865_v19 = vld [vmem:[%s7455_s11 + $0x230] sm:$0xff] }
 0x650   :  { %5397 = vmatprep.subr.bf16.mxu0 %v5396_v22 }
 0x655   :  { %v7184_v0 = vpop.f32.mrb[24].mxu0  ;;  %v3385_v7 = vpop.f32.mrb[24].mxu1 }
 0x656   :  { %v7186_v8 = vpop.f32.mrb[25].mxu0  ;;  %v3387_v4 = vpop.f32.mrb[25].mxu1 }
 0x657   :  { %v2925_v9 = vpop.f32.mrb[26].mxu0  ;;  %v3389_v10 = vpop.f32.mrb[26].mxu1 }
 0x658   :  { %v2926_v14 = vpop.f32.mrb[27].mxu0  ;;  %v3390_v15 = vpop.f32.mrb[27].mxu1 }
 0x659   :  { %v3881_v15 = vld [vmem:[%s7455_s11 + $0x2b0] sm:$0xff] }
 0x65a   :  { %v5376_v18 = vpack.c.bf16 %v3882_v16, %v3881_v15 }
 0x665   :  { %v2965_v23 = vpop.f32.mrb[28].mxu0  ;;  %v3467_v24 = vpop.f32.mrb[28].mxu1 }
 0x666   :  { %v2966_v25 = vadd.f32 %v2965_v23, %v7088_v58  ;;  %v7207_v26 = vadd.f32 %v3467_v24, %v3305_v39  ;;  %v2967_v27 = vpop.f32.mrb[29].mxu0  ;;  %v3469_v28 = vpop.f32.mrb[29].mxu1  ;;  %v7214_v58 = vshrl.u32 %v3739_v35, 7  ;;  %v3883_v24 = vld [vmem:[%s7455_s11 + $0x2c0] sm:$0xff] }
 0x667   :  { %v2968_v37 = vadd.f32 %v2967_v27, %v7090_v60  ;;  %v7210_v29 = vadd.f32 %v3469_v28, %v3306_v45  ;;  %v2969_v31 = vpop.f32.mrb[30].mxu0  ;;  %v3471_v32 = vpop.f32.mrb[30].mxu1  ;;  %v7220_v60 = vld [vmem:[%s7454_s10] sm:$0xff] }
 0x668   :  { %v3301_v33 = vadd.f32 %v7094_v2, %v2966_v25  ;;  %v2970_v30 = vpop.f32.mrb[31].mxu0  ;;  %v3472_v34 = vpop.f32.mrb[31].mxu1  ;;  %v3741_v39 = vsub.s32 0, %v7214_v58  ;;  %v3745_v41 = vsub.s32 1, %v7214_v58  ;;  %v3761_v14 = vsub.s32 5, %v7214_v58  ;;  %v3884_v25 = vld [vmem:[%s7455_s11 + $0x2c8] sm:$0xff] }
 0x669   :  { %v3302_v38 = vadd.f32 %v7098_v6, %v2968_v37  ;;  %v5378_v34 = vpack.c.bf16 %v3866_v20, %v3865_v19 }
 0x66a   :  { %v3515_v40 = vadd.f32 %v3385_v7, %v3301_v33  ;;  %v3742_v2 = vrot.slane %v7220_v60, %v3741_v39  ;;  %v3746_v44 = vrot.slane %v7220_v60, %v3745_v41  ;;  %v3862_v7 = vld [vmem:[%s7455_s11 + $0x218] sm:$0xff]  ;;  %v3762_v23 = vrot.slane %v7220_v60, %v3761_v14 }
 0x66b   :  { %v3516_v36 = vadd.f32 %v3387_v4, %v3302_v38  ;;  %v3880_v4 = vld [vmem:[%s7455_s11 + $0x2a8] sm:$0xff]  ;;  %v5370_v9 = vpack.c.bf16 %v3862_v7, %v3861_v63 }
 0x66c   :  { %v5372_v10 = vpack.c.bf16 %v3880_v4, %v3879_v5 }
 0x675   :  { %v3006_v42 = vpop.f32.mrb[32].mxu0  ;;  %v3599_v43 = vpop.f32.mrb[32].mxu1 }
 0x676   :  { %v7226_v6 = vadd.f32 %v3006_v42, %v7092_v1  ;;  %v3729_v45 = vadd.f32 %v3599_v43, %v3515_v40  ;;  %v3008_v57 = vpop.f32.mrb[33].mxu0  ;;  %v3601_v46 = vpop.f32.mrb[33].mxu1  ;;  %v3860_v1 = vld [vmem:[%s7455_s11 + $0x208] sm:$0xff]  ;;  %v5380_v40 = vpack.c.bf16 %v3884_v25, %v3883_v24  ;;  %v3869_v43 = vld [vmem:[%s7455_s11 + $0x250] sm:$0xff] }
 0x677   :  { %v7229_v47 = vadd.f32 %v3008_v57, %v7096_v3  ;;  %v3730_v48 = vadd.f32 %v3601_v46, %v3516_v36  ;;  %v3010_v49 = vpop.f32.mrb[34].mxu0  ;;  %v3603_v50 = vpop.f32.mrb[34].mxu1  ;;  %v3877_v3 = vld [vmem:[%s7455_s11 + $0x290] sm:$0xff]  ;;  %v5366_v11 = vpack.c.bf16 %v3860_v1, %v3859_v53  ;;  %v3867_v36 = vld [vmem:[%s7455_s11 + $0x240] sm:$0xff]  ;;  %v3888_v57 = vld [vmem:[%s7455_s11 + $0x2e8] sm:$0xff] }
 0x678   :  { %v3779_v51 = vadd.f32 %v3742_v2, %v3729_v45  ;;  %v3011_v52 = vpop.f32.mrb[35].mxu0  ;;  %v3604_v54 = vpop.f32.mrb[35].mxu1  ;;  %v5368_v62 = vpack.c.bf16 %v3878_v56, %v3877_v3  ;;  %v3887_v45 = vld [vmem:[%s7455_s11 + $0x2e0] sm:$0xff]  ;;  %v3890_v53 = vld [vmem:[%s7455_s11 + $0x2f8] sm:$0xff]  ;;  %v3873_v3 = vld [vmem:[%s7455_s11 + $0x270] sm:$0xff] }
 0x679   :  { %v3780_v55 = vadd.f32 %v3746_v44, %v3730_v48  ;;  %v3870_v44 = vld [vmem:[%s7455_s11 + $0x258] sm:$0xff]  ;;  %v3757_v48 = vsub.s32 4, %v7214_v58  ;;  %v5388_v49 = vpack.c.bf16 %v3888_v57, %v3887_v45  ;;  %v3871_v50 = vld [vmem:[%s7455_s11 + $0x260] sm:$0xff]  ;;  %v3889_v52 = vld [vmem:[%s7455_s11 + $0x2f0] sm:$0xff] }
 0x67a   :  { %v3787_v61 = vmax.f32 %v3779_v51, 0.0  ;;  %v5386_v46 = vpack.c.bf16 %v3870_v44, %v3869_v43  ;;  %v3872_v51 = vld [vmem:[%s7455_s11 + $0x268] sm:$0xff]  ;;  %v3874_v56 = vld [vmem:[%s7455_s11 + $0x278] sm:$0xff]  ;;  %v3893_v44 = vld [vmem:[%s7455_s11 + $0x310] sm:$0xff] }
 0x67b   :  { %v3788_v59 = vmax.f32 %v3780_v55, 0.0  ;;  %v5390_v1 = vpack.c.bf16 %v3872_v51, %v3871_v50  ;;  %v3758_v54 = vrot.slane %v7220_v60, %v3757_v48  ;;  %v5392_v55 = vpack.c.bf16 %v3890_v53, %v3889_v52  ;;  %v3894_v45 = vld [vmem:[%s7455_s11 + $0x318] sm:$0xff]  ;;  %v3911_v57 = vld [vmem:[%s7455_s11 + $0x3a0] sm:$0xff]  ;;  %v3896_v51 = vld [vmem:[%s7455_s11 + $0x328] sm:$0xff] }
 0x67c   :  { %v5394_v7 = vpack.c.bf16 %v3874_v56, %v3873_v3  ;;  %v5402_v48 = vpack.c.bf16 %v3894_v45, %v3893_v44  ;;  %v3895_v50 = vld [vmem:[%s7455_s11 + $0x320] sm:$0xff]  ;;  %v3769_v52 = vsub.s32 7, %v7214_v58  ;;  %v3913_v53 = vld [vmem:[%s7455_s11 + $0x3b0] sm:$0xff]  ;;  %v3898_v56 = vld [vmem:[%s7455_s11 + $0x338] sm:$0xff] }
 0x67d   :  { %3994 = vmatprep.mubr.f32.mxu1 %v3788_v59  ;;  %v3897_v3 = vld [vmem:[%s7455_s11 + $0x330] sm:$0xff] }
 0x67e   :  { %3995 = vmatmul.mubr.f32.vlgmr.msra.gmra.mrb[40].mxu1 %v3787_v61 }
 0x67f   :  { %5367 = vmatpush3.bf16.msra.mxu1 %v5366_v11 }
 0x680   :  { %5369 = vmatprep.subr.bf16.mxu1 %v5368_v62 }
 0x683   :  { %5371 = vmatpush3.bf16.msra.mxu1 %v5370_v9 }
 0x684   :  { %5373 = vmatprep.subr.bf16.mxu1 %v5372_v10 }
 0x685   :  { %v3088_v21 = vpop.f32.mrb[36].mxu0  ;;  %v3681_v22 = vpop.f32.mrb[36].mxu1 }
 0x686   :  { %v3089_v27 = vadd.f32 %v3088_v21, %v7184_v0  ;;  %v3733_v28 = vadd.f32 %v3681_v22, %v7207_v26  ;;  %v3090_v37 = vpop.f32.mrb[37].mxu0  ;;  %v3683_v31 = vpop.f32.mrb[37].mxu1  ;;  %v3868_v0 = vld [vmem:[%s7455_s11 + $0x248] sm:$0xff] }
 0x687   :  { %v3091_v32 = vadd.f32 %v3090_v37, %v7186_v8  ;;  %v3734_v33 = vadd.f32 %v3683_v31, %v7210_v29  ;;  %5375 = vmatpush3.bf16.msra.mxu1 %v5374_v17  ;;  %v3092_v30 = vpop.f32.mrb[38].mxu0  ;;  %v3685_v35 = vpop.f32.mrb[38].mxu1  ;;  %v3885_v8 = vld [vmem:[%s7455_s11 + $0x2d0] sm:$0xff]  ;;  %v3886_v29 = vld [vmem:[%s7455_s11 + $0x2d8] sm:$0xff]  ;;  %v5382_v2 = vpack.c.bf16 %v3868_v0, %v3867_v36  ;;  %v3749_v37 = vsub.s32 2, %v7214_v58  ;;  %v3891_v0 = vld [vmem:[%s7455_s11 + $0x300] sm:$0xff] }
 0x688   :  { %v3093_v38 = vpop.f32.mrb[39].mxu0  ;;  %5377 = vmatprep.subr.bf16.mxu1 %v5376_v18  ;;  %v3686_v26 = vpop.f32.mrb[39].mxu1  ;;  %v5384_v42 = vpack.c.bf16 %v3886_v29, %v3885_v8  ;;  %v3783_v5 = vadd.f32 %v3758_v54, %v3733_v28  ;;  %v3909_v8 = vld [vmem:[%s7455_s11 + $0x390] sm:$0xff]  ;;  %v3910_v29 = vld [vmem:[%s7455_s11 + $0x398] sm:$0xff]  ;;  %v5406_v54 = vpack.c.bf16 %v3896_v51, %v3895_v50 }
 0x689   :  { %v3784_v39 = vadd.f32 %v3762_v23, %v3734_v33  ;;  %v3750_v31 = vrot.slane %v7220_v60, %v3749_v37  ;;  %v3892_v26 = vld [vmem:[%s7455_s11 + $0x308] sm:$0xff]  ;;  %v5400_v43 = vpack.c.bf16 %v3910_v29, %v3909_v8  ;;  %v4286_v29 = vld [vmem:[%s7456_s12] ss:$0 sm:$0xff] }
 0x68a   :  { %v3791_v9 = vmax.f32 %v3783_v5, 0.0  ;;  %v3904_v37 = vld [vmem:[%s7455_s11 + $0x368] sm:$0xff] }
 0x68b   :  { %v3792_v41 = vmax.f32 %v3784_v39, 0.0  ;;  %5379 = vmatpush3.bf16.msra.mxu1 %v5378_v34 }
 0x68c   :  { %5381 = vmatprep.subr.bf16.mxu1 %v5380_v40 }
 0x68d   :  { %4134 = vmatprep.mubr.f32.mxu1 %v3792_v41 }
 0x68f   :  { %5383 = vmatpush3.bf16.msra.mxu1 %v5382_v2  ;;  %v5398_v2 = vpack.c.bf16 %v3892_v26, %v3891_v0 }
 0x690   :  { %5385 = vmatprep.subr.bf16.mxu1 %v5384_v42 }
 0x693   :  { %5387 = vmatpush3.bf16.msra.mxu1 %v5386_v46  ;;  %v3912_v46 = vld [vmem:[%s7455_s11 + $0x3a8] sm:$0xff] }
 0x694   :  { %5389 = vmatprep.subr.bf16.mxu1 %v5388_v49  ;;  %v5404_v49 = vpack.c.bf16 %v3912_v46, %v3911_v57 }
 0x695   :  { %v3212_v59 = vpop.f32.mrb[40].mxu0 }
 0x696   :  { %v3303_v11 = vadd.f32 %v3212_v59, %v7226_v6  ;;  %v3214_v61 = vpop.f32.mrb[41].mxu0 }
 0x697   :  { %v3304_v62 = vadd.f32 %v3214_v61, %v7229_v47  ;;  %5391 = vmatpush3.bf16.msra.mxu1 %v5390_v1  ;;  %v3216_v63 = vpop.f32.mrb[42].mxu0  ;;  %v3914_v1 = vld [vmem:[%s7455_s11 + $0x3b8] sm:$0xff]  ;;  %v3915_v61 = vld [vmem:[%s7455_s11 + $0x3c0] sm:$0xff] }
 0x698   :  { %v3217_v4 = vpop.f32.mrb[43].mxu0  ;;  %5393 = vmatprep.subr.bf16.mxu1 %v5392_v55  ;;  %v5408_v55 = vpack.c.bf16 %v3914_v1, %v3913_v53 }
 0x699   :  { %v5410_v4 = vpack.c.bf16 %v3898_v56, %v3897_v3 }
 0x69b   :  { %5395 = vmatpush3.bf16.msra.mxu1 %v5394_v7 }
 0x69e   :  { %4135 = vmatmul.mubr.f32.vlgmr.msra.gmra.mrb[42].mxu1 %v3791_v9 }
 0x6a5   :  { %v3294_v10 = vpop.f32.mrb[44].mxu0 }
 0x6a6   :  { %v3307_v12 = vadd.f32 %v3294_v10, %v3089_v27  ;;  %v3296_v13 = vpop.f32.mrb[45].mxu0  ;;  %v3753_v27 = vsub.s32 3, %v7214_v58 }
 0x6a7   :  { %v3308_v14 = vadd.f32 %v3296_v13, %v3091_v32  ;;  %v3298_v15 = vpop.f32.mrb[46].mxu0  ;;  %v3900_v13 = vld [vmem:[%s7455_s11 + $0x348] sm:$0xff] }
 0x6a8   :  { %v3299_v16 = vpop.f32.mrb[47].mxu0  ;;  %v3754_v33 = vrot.slane %v7220_v60, %v3753_v27  ;;  %v3921_v27 = vld [vmem:[%s7455_s11 + $0x3f0] sm:$0xff] }
 0x6a9   :  { %v3917_v16 = vld [vmem:[%s7455_s11 + $0x3d0] sm:$0xff] }
 0x6b5   :  { %v3426_v17 = vpop.f32.mrb[48].mxu0 }
 0x6b6   :  { %v3517_v6 = vadd.f32 %v3426_v17, %v3303_v11  ;;  %v3428_v18 = vpop.f32.mrb[49].mxu0  ;;  %v3770_v11 = vrot.slane %v7220_v60, %v3769_v52  ;;  %v3918_v17 = vld [vmem:[%s7455_s11 + $0x3d8] sm:$0xff] }
 0x6b7   :  { %v3518_v19 = vadd.f32 %v3428_v18, %v3304_v62  ;;  %v3430_v47 = vpop.f32.mrb[50].mxu0  ;;  %v3916_v62 = vld [vmem:[%s7455_s11 + $0x3c8] sm:$0xff] }
 0x6b8   :  { %v3431_v20 = vpop.f32.mrb[51].mxu0  ;;  %v5412_v10 = vpack.c.bf16 %v3916_v62, %v3915_v61  ;;  %v3901_v47 = vld [vmem:[%s7455_s11 + $0x350] sm:$0xff] }
 0x6b9   :  { %v3902_v20 = vld [vmem:[%s7455_s11 + $0x358] sm:$0xff] }
 0x6c5   :  { %v3508_v21 = vpop.f32.mrb[52].mxu0 }
 0x6c6   :  { %v3521_v22 = vadd.f32 %v3508_v21, %v3307_v12  ;;  %v3510_v23 = vpop.f32.mrb[53].mxu0  ;;  %v3899_v12 = vld [vmem:[%s7455_s11 + $0x340] sm:$0xff] }
 0x6c7   :  { %v3522_v24 = vadd.f32 %v3510_v23, %v3308_v14  ;;  %v3512_v25 = vpop.f32.mrb[54].mxu0  ;;  %v5414_v18 = vpack.c.bf16 %v3900_v13, %v3899_v12  ;;  %v3919_v21 = vld [vmem:[%s7455_s11 + $0x3e0] sm:$0xff]  ;;  %v5418_v23 = vpack.c.bf16 %v3902_v20, %v3901_v47 }
 0x6c8   :  { %v3513_v28 = vpop.f32.mrb[55].mxu0 }
 0x6c9   :  { %v3903_v28 = vld [vmem:[%s7455_s11 + $0x360] sm:$0xff] }
 0x6d5   :  { %v3640_v32 = vpop.f32.mrb[56].mxu0 }
 0x6d6   :  { %v3731_v30 = vadd.f32 %v3640_v32, %v3517_v6  ;;  %v3642_v34 = vpop.f32.mrb[57].mxu0 }
 0x6d7   :  { %v3732_v35 = vadd.f32 %v3642_v34, %v3518_v19  ;;  %v3644_v38 = vpop.f32.mrb[58].mxu0  ;;  %v5416_v19 = vpack.c.bf16 %v3918_v17, %v3917_v16  ;;  %v3906_v34 = vld [vmem:[%s7455_s11 + $0x378] sm:$0xff] }
 0x6d8   :  { %v3781_v40 = vadd.f32 %v3750_v31, %v3731_v30  ;;  %v3645_v36 = vpop.f32.mrb[59].mxu0  ;;  %v3922_v31 = vld [vmem:[%s7455_s11 + $0x3f8] sm:$0xff]  ;;  %v3905_v30 = vld [vmem:[%s7455_s11 + $0x370] sm:$0xff] }
 0x6d9   :  { %v3782_v39 = vadd.f32 %v3754_v33, %v3732_v35  ;;  %v5424_v33 = vpack.c.bf16 %v3922_v31, %v3921_v27  ;;  %v5426_v35 = vpack.c.bf16 %v3906_v34, %v3905_v30 }
 0x6da   :  { %v3789_v42 = vmax.f32 %v3781_v40, 0.0 }
 0x6db   :  { %v3790_v41 = vmax.f32 %v3782_v39, 0.0 }
 0x6dd   :  { %4064 = vmatprep.mubr.f32.mxu0 %v3790_v41 }
 0x6de   :  { %4065 = vmatmul.mubr.f32.vlgmr.msra.gmra.mrb[64].mxu0 %v3789_v42 }
 0x6df   :  { %5399 = vmatpush3.bf16.msra.mxu0 %v5398_v2 }
 0x6e0   :  { %5401 = vmatprep.subr.bf16.mxu0 %v5400_v43 }
 0x6e3   :  { %5403 = vmatpush3.bf16.msra.mxu0 %v5402_v48 }
 0x6e4   :  { %5405 = vmatprep.subr.bf16.mxu0 %v5404_v49 }
 0x6e5   :  { %v3722_v59 = vpop.f32.mrb[60].mxu0 }
 0x6e6   :  { %v3735_v63 = vadd.f32 %v3722_v59, %v3521_v22  ;;  %v3724_v7 = vpop.f32.mrb[61].mxu0  ;;  %v3920_v22 = vld [vmem:[%s7455_s11 + $0x3e8] sm:$0xff]  ;;  %s5525_s11 = smov [#allocation12]  }
 0x6e7   :  { %v3736_v5 = vadd.f32 %v3724_v7, %v3522_v24  ;;  %5407 = vmatpush3.bf16.msra.mxu0 %v5406_v54  ;;  %v3726_v9 = vpop.f32.mrb[62].mxu0  ;;  %v3765_v24 = vsub.s32 6, %v7214_v58  ;;  %v5420_v25 = vpack.c.bf16 %v3920_v22, %v3919_v21  ;;  %v5422_v58 = vpack.c.bf16 %v3904_v37, %v3903_v28  ;;  %s4224_s0 = sshll.u32 %s5525_s11, 4  ;;  %s4225_s0 = int_to_ptr.vmem [resolvable:$true] %s4224_s0 }
 0x6e8   :  { %5409 = vmatprep.subr.bf16.mxu0 %v5408_v55  ;;  %v3727_v14 = vpop.f32.mrb[63].mxu0  ;;  %s5492_s12 = scalar_lea.vmem %s4225_s0, 32  ;;  %p5497_p9 = scmp.lt.s32.totalorder %s4225_s0, %s4225_s0 }
 0x6e9   :  { %v3786_v15 = vadd.f32 %v3770_v11, %v3736_v5  ;;  %v3766_v32 = vrot.slane %v7220_v60, %v3765_v24  ;;  %p5493_p8 = scmp.ne.s32.totalorder %s4225_s0, %s5492_s12  ;;  %p5498_p10 = scmp.lt.s32.totalorder %s5492_s12, %s5492_s12 }
 0x6eb   :  { %v3794_v6 = vmax.f32 %v3786_v15, 0.0  ;;  %5411 = vmatpush3.bf16.msra.mxu0 %v5410_v4  ;;  %v3785_v38 = vadd.f32 %v3766_v32, %v3735_v63  ;;  %p5499_p11 = por %p5498_p10, %p5497_p9 }
 0x6ec   :  { %5413 = vmatprep.subr.bf16.mxu0 %v5412_v10 }
 0x6ed   :  { %4204 = vmatprep.mubr.f32.mxu0 %v3794_v6  ;;  %v3793_v40 = vmax.f32 %v3785_v38, 0.0  ;;  %p5500_p12 = pnand %p5499_p11, %p5493_p8 }
 0x6ef   :  { %5415 = vmatpush3.bf16.msra.mxu0 %v5414_v18 }
 0x6f0   :  { %5417 = vmatprep.subr.bf16.mxu0 %v5416_v19 }
 0x6f3   :  { %5419 = vmatpush3.bf16.msra.mxu0 %v5418_v23 }
 0x6f4   :  { %5421 = vmatprep.subr.bf16.mxu0 %v5420_v25 }
 0x6f7   :  { %5423 = vmatpush3.bf16.msra.mxu0 %v5422_v58 }
 0x6f8   :  { %5425 = vmatprep.subr.bf16.mxu0 %v5424_v33 }
 0x6fb   :  { %5427 = vmatpush3.bf16.msra.mxu0 %v5426_v35 }
 0x6fe   :  { %4205 = vmatmul.mubr.f32.vlgmr.msra.gmra.mrb[66].mxu0 %v3793_v40 }
 0x751   :  { %v4522_v36 = vpop.f32.mrb[40].mxu1 }
 0x752   :  { %v4523_v0 = vpop.f32.mrb[41].mxu1 }
 0x753   :  { %v4524_v60 = vadd.f32 %v4523_v0, %v4522_v36 }
 0x755   :  { %v3997_v42 = vadd.f32 %v4524_v60, %v4286_v29 }
 0x771   :  { %v4592_v26 = vpop.f32.mrb[42].mxu1 }
 0x772   :  { %v4593_v39 = vpop.f32.mrb[43].mxu1 }
 0x773   :  { %v4594_v8 = vadd.f32 %v4593_v39, %v4592_v26 }
 0x7b1   :  { %v4557_v41 = vpop.f32.mrb[64].mxu0 }
 0x7b2   :  { %v4558_v2 = vpop.f32.mrb[65].mxu0 }
 0x7b3   :  { %v4559_v43 = vadd.f32 %v4558_v2, %v4557_v41 }
 0x7b5   :  { %v4067_v44 = vadd.f32 %v4559_v43, %v3997_v42 }
 0x7b7   :  { %v4137_v45 = vadd.f32 %v4594_v8, %v4067_v44 }
 0x7d1   :  { %v4627_v57 = vpop.f32.mrb[66].mxu0 }
 0x7d2   :  { %v4628_v46 = vpop.f32.mrb[67].mxu0 }
 0x7d3   :  { %v4629_v48 = vadd.f32 %v4628_v46, %v4627_v57 }
 0x7d5   :  { %v4207_v49 = vadd.f32 %v4629_v48, %v4137_v45 }
 0x7d7   :  { %v4210_v50 = vsub.f32 0.0, %v4207_v49 }
 0x7d9   :  { %v4211_v51 = vmul.f32 1.442695, %v4210_v50 }
 0x7db   :  { %5466 = vpow2.f32 %v4211_v51 }
 0x7e5   :  { %v5467_v52 = vpop.eup %5466 }
 0x7e6   :  { %v4213_v53 = vadd.f32 1.0, %v5467_v52 }
 0x7e8   :  { %5468 = vrcp.f32 %v4213_v53 }
 0x7f2   :  { %v5469_v1 = vpop.eup %5468 }
 0x7f3   :  { %4217 = vst.msk [vmem:[#allocation12] sm:$0x3] %vm4216_vm6, %v5469_v1 }
 0x7f4   :  { %5503 = shalt.err (!%p5500_p12)
}
 0x7f5   :  { %s5504_s6 = scalar_lea.hbm %s7457_s13, 32 }
 0x7f6   :  { %p5505_p13 = scmp.ne.s32.totalorder %s7457_s13, %s5504_s6  ;;  %p5508_p0 = scmp.lt.u32.totalorder %s5504_s6, %s7457_s13 }
 0x7f8   :  { %p5510_p1 = pnand %p5508_p0, %p5505_p13 }
 0x7fa   :  { %5513 = shalt.err (!%p5510_p1)
}
 0x7fb   :  { %4227 = dma.vmem_to_hbm [thread:$0]  %s4225_s0, 32, %s7457_s13, [#allocation11]  }
 0x7fc   :  { %5518 = dma.done.wait [#allocation11], 32  }
 0x7fd   :  { %5519 = vsyncadd [#allocation11], 4294967264 }
 0x7fe   :  { %4231 = vsyncpa [#allocation10], 1 }
 0x7ff   :  { %4232 = vsyncpa [#allocation11], 1 }
 0x800   :  { %4233 = vsyncmov [#allocation8] }
 0x803   :  { %s4234_s20 = vpop.sfrf %4233 }
 0x804   :  { %p4287_p2 = scmp.ne.s32.totalorder %s4234_s20, 0 }
 0x806   :  { %4238 = shalt.err (%p4287_p2)  }

</bundles_post_ra>
